<compile_context>
chip_gen: v7x
topology: tpu7x:2x2x1
jax: 0.10.0
libtpu: 0.0.40
codegen_flags: <defaults>
</compile_context>

<pallas_src>
import functools

import jax
import jax.numpy as jnp
from jax import lax
from jax.experimental import pallas as pl
from jax.experimental.pallas import tpu as pltpu


def _lstm_kernel(
    gin0_ref,   # (Tc, Bt, 4H) f32  precomputed x@Wih0^T + b_ih0 + b_hh0
    whh0_ref,   # (H, 4H)           W_hh layer0, transposed
    w1_ref,     # (2H, 4H)          [W_ih1^T ; W_hh1^T]
    b1_ref,     # (1, 4H)           b_ih1 + b_hh1
    wfc_ref,    # (H, C)            fc weight, transposed
    bfc_ref,    # (1, C)
    out_ref,    # (Bt, C)
    h0_sc, c0_sc, h1_sc, c1_sc,     # (Bt, H) f32 VMEM scratch (state across T-chunks)
    *, unroll, mxu_dtype,
):
    H = whh0_ref.shape[0]
    Bt = out_ref.shape[0]
    Tc = gin0_ref.shape[0]
    s = pl.program_id(1)            # time-chunk index ("arbitrary" = sequential)

    @pl.when(s == 0)
    def _init():
        z = jnp.zeros((Bt, H), jnp.float32)
        h0_sc[...] = z
        c0_sc[...] = z
        h1_sc[...] = z
        c1_sc[...] = z

    # Hoisted loop invariants (loaded / broadcast once per chunk, not per step).
    whh0 = whh0_ref[...].astype(mxu_dtype)
    w1 = w1_ref[...].astype(mxu_dtype)
    b1 = jnp.broadcast_to(b1_ref[...], (Bt, 4 * H))

    def gate_math(g, c_prev):
        # H == 128 -> each slice is a whole 128-lane tile (aligned, no shuffles).
        i_g = jax.nn.sigmoid(g[:, 0 * H:1 * H])
        f_g = jax.nn.sigmoid(g[:, 1 * H:2 * H])
        g_g = jnp.tanh(g[:, 2 * H:3 * H])
        o_g = jax.nn.sigmoid(g[:, 3 * H:4 * H])
        c_new = f_g * c_prev + i_g * g_g
        h_new = o_g * jnp.tanh(c_new)
        return h_new, c_new

    def step(t, carry):
        h0, c0, h1, c1 = carry
        # Layer 0: input projection precomputed; only the recurrent dot remains.
        g0 = gin0_ref[t] + jnp.dot(h0.astype(mxu_dtype), whh0,
                                   preferred_element_type=jnp.float32)
        h0n, c0n = gate_math(g0, c0)
        # Layer 1: fused input+recurrent dot. (Dropout between LSTM layers is
        # identity in eval mode -> nothing to apply here.)
        hcat = jnp.concatenate([h0n, h1], axis=1).astype(mxu_dtype)   # (Bt, 2H)
        g1 = jnp.dot(hcat, w1, preferred_element_type=jnp.float32) + b1
        h1n, c1n = gate_math(g1, c1)
        return h0n, c0n, h1n, c1n

    carry0 = (h0_sc[...], c0_sc[...], h1_sc[...], c1_sc[...])
    h0, c0, h1, c1 = lax.fori_loop(0, Tc, step, carry0, unroll=unroll)
    h0_sc[...], c0_sc[...], h1_sc[...], c1_sc[...] = h0, c0, h1, c1

    @pl.when(s == pl.num_programs(1) - 1)
    def _finalize():
        # out = h_last(layer1) @ W_fc^T + b_fc  (dropout identity at inference)
        out_ref[...] = (
            jnp.dot(h1.astype(mxu_dtype), wfc_ref[...].astype(mxu_dtype),
                    preferred_element_type=jnp.float32)
            + bfc_ref[...]
        )


def _round_up(a, b):
    return (a + b - 1) // b * b


def _pick_t_chunk(T, bt, H, budget_bytes=4 << 20):
    """Largest divisor of T whose precomputed gate chunk fits the VMEM budget."""
    per_step = bt * 4 * H * 4  # f32 bytes per time step of the gate slab
    tc = max(1, min(T, budget_bytes // max(per_step, 1)))
    while T % tc:
        tc -= 1
    return tc


def lstm_classifier_forward(x, params, *, mxu_dtype=jnp.float32):
    """x: (B, input_size, T) -- same layout as the PyTorch module's input."""
    B, I, T = x.shape
    H = params["w_hh0"].shape[1]          # w_hh0 stored as (4H, H)
    C = params["w_fc"].shape[0]           # (C, H)

    # Pad batch to >= one full f32 sublane tile; tile it for the grid.
    bt = min(128, _round_up(B, 8))
    B_pad = _round_up(B, bt)

    # permute(0,2,1) then (T, B, I) so time indexes the leading axis.
    x_tbi = jnp.transpose(x, (2, 0, 1)).astype(jnp.float32)
    if B_pad != B:
        x_tbi = jnp.pad(x_tbi, ((0, 0), (0, B_pad - B), (0, 0)))

    # Hoisted layer-0 input projection: one big GEMM over all T*B rows, with
    # both layer-0 biases folded in.  (T, B_pad, 4H), lane-dense last dim.
    gin0 = (
        jnp.einsum("tbi,gi->tbg", x_tbi, params["w_ih0"],
                   preferred_element_type=jnp.float32)
        + (params["b_ih0"] + params["b_hh0"])
    ).astype(jnp.float32)

    whh0 = params["w_hh0"].T                                            # (H, 4H)
    w1 = jnp.concatenate([params["w_ih1"].T, params["w_hh1"].T], axis=0)  # (2H, 4H)
    b1 = (params["b_ih1"] + params["b_hh1"]).reshape(1, -1)             # (1, 4H)
    wfc = params["w_fc"].T                                              # (H, C)
    bfc = params["b_fc"].reshape(1, -1)                                 # (1, C)

    Tc = _pick_t_chunk(T, bt, H)
    unroll = True if Tc <= 32 else 8

    kernel = functools.partial(_lstm_kernel, unroll=unroll, mxu_dtype=mxu_dtype)

    out = pl.pallas_call(
        kernel,
        out_shape=jax.ShapeDtypeStruct((B_pad, C), jnp.float32),
        grid=(B_pad // bt, T // Tc),
        in_specs=[
            pl.BlockSpec((Tc, bt, 4 * H), lambda b, s: (s, b, 0)),
            pl.BlockSpec((H, 4 * H), lambda b, s: (0, 0)),
            pl.BlockSpec((2 * H, 4 * H), lambda b, s: (0, 0)),
            pl.BlockSpec((1, 4 * H), lambda b, s: (0, 0)),
            pl.BlockSpec((H, C), lambda b, s: (0, 0)),
            pl.BlockSpec((1, C), lambda b, s: (0, 0)),
        ],
        out_specs=pl.BlockSpec((bt, C), lambda b, s: (b, 0)),
        scratch_shapes=[pltpu.VMEM((bt, H), jnp.float32)] * 4,
        compiler_params=pltpu.CompilerParams(
            dimension_semantics=("parallel", "arbitrary"),
            vmem_limit_bytes=32 * 1024 * 1024,
        ),
    )(gin0, whh0, w1, b1, wfc, bfc)
    return out[:B]


def _reference_forward(x, params):
    """Pure-JAX reference mirroring torch nn.LSTM + Linear (eval mode)."""
    B, I, T = x.shape
    H = params["w_hh0"].shape[1]
    xs = jnp.transpose(x, (0, 2, 1)).astype(jnp.float32)  # (B, T, I)

    def cell(x_t, h, c, w_ih, w_hh, b_ih, b_hh):
        g = x_t @ w_ih.T + h @ w_hh.T + b_ih + b_hh
        i = jax.nn.sigmoid(g[:, 0 * H:1 * H])
        f = jax.nn.sigmoid(g[:, 1 * H:2 * H])
        gg = jnp.tanh(g[:, 2 * H:3 * H])
        o = jax.nn.sigmoid(g[:, 3 * H:4 * H])
        c = f * c + i * gg
        h = o * jnp.tanh(c)
        return h, c

    h0 = c0 = h1 = c1 = jnp.zeros((B, H), jnp.float32)
    for t in range(T):
        h0, c0 = cell(xs[:, t, :], h0, c0, params["w_ih0"], params["w_hh0"],
                      params["b_ih0"], params["b_hh0"])
        h1, c1 = cell(h0, h1, c1, params["w_ih1"], params["w_hh1"],
                      params["b_ih1"], params["b_hh1"])
    return h1 @ params["w_fc"].T + params["b_fc"]


def _init_params(key, input_size, hidden_size, num_classes):
    """Deterministic init, uniform(-1/sqrt(H), 1/sqrt(H)) like PyTorch defaults."""
    H = hidden_size
    k = 1.0 / jnp.sqrt(jnp.float32(H))
    names_shapes = [
        ("w_ih0", (4 * H, input_size)), ("w_hh0", (4 * H, H)),
        ("b_ih0", (4 * H,)), ("b_hh0", (4 * H,)),
        ("w_ih1", (4 * H, H)), ("w_hh1", (4 * H, H)),
        ("b_ih1", (4 * H,)), ("b_hh1", (4 * H,)),
        ("w_fc", (num_classes, H)), ("b_fc", (num_classes,)),
    ]
    keys = jax.random.split(key, len(names_shapes))
    return {
        name: jax.random.uniform(kk, shape, jnp.float32, -k, k)
        for kk, (name, shape) in zip(keys, names_shapes)
    }


if __name__ == "__main__":
    # Small shapes consistent with the module's forward:
    #   x: (batch, input_size, seq_len), hidden_size=128, num_classes=4.
    batch, input_size, seq_len = 2, 4, 8
    hidden_size, num_classes = 128, 4

    key = jax.random.PRNGKey(0)
    k_x, k_p = jax.random.split(key)
    x = jax.random.normal(k_x, (batch, input_size, seq_len), jnp.float32)
    params = _init_params(k_p, input_size, hidden_size, num_classes)

    out = jax.block_until_ready(lstm_classifier_forward(x, params))
    ref = _reference_forward(x, params)
    assert out.shape == (batch, num_classes)
    # Both kernel and reference matmuls run at the TPU's default f32 MXU
    # precision (bf16 passes), so allow a few-e-3 tolerance.
    err = float(jnp.max(jnp.abs(out - ref)))
    assert jnp.allclose(out, ref, atol=3e-3, rtol=3e-3), f"mismatch vs reference: {err}"

    # bf16-MXU-operand variant (f32 accumulation / f32 state math) — looser check.
    out_bf16 = jax.block_until_ready(
        lstm_classifier_forward(x, params, mxu_dtype=jnp.bfloat16))
    assert jnp.allclose(out_bf16, ref, atol=2e-2, rtol=2e-2), "bf16 variant mismatch"

    print("KERNEL_OK")
</pallas_src>

<mosaic_0001>
module attributes {stable_mosaic.version = 11 : i64} {
  func.func @_lstm_kernel(%arg0: i32, %arg1: i32, %arg2: memref<8x8x512xf32, #tpu.memory_space<vmem>>, %arg3: memref<128x512xf32, #tpu.memory_space<vmem>>, %arg4: memref<256x512xf32, #tpu.memory_space<vmem>>, %arg5: memref<1x512xf32, #tpu.memory_space<vmem>>, %arg6: memref<128x4xf32, #tpu.memory_space<vmem>>, %arg7: memref<1x4xf32, #tpu.memory_space<vmem>>, %arg8: memref<8x4xf32, #tpu.memory_space<vmem>>, %arg9: memref<8x128xf32, #tpu.memory_space<vmem>>, %arg10: memref<8x128xf32, #tpu.memory_space<vmem>>, %arg11: memref<8x128xf32, #tpu.memory_space<vmem>>, %arg12: memref<8x128xf32, #tpu.memory_space<vmem>>) attributes {dimension_semantics = [#tpu.dimension_semantics<parallel>, #tpu.dimension_semantics<arbitrary>], iteration_bounds = array<i64: 1, 1>, scalar_prefetch = 0 : i64, scratch_operands = 4 : i64, tpu.core_type = #tpu.core_type<tc>, window_params = [{transform_indices = @transform_0, window_bounds = array<i64: 8, 8, 512>}, {pipeline_mode = #tpu.pipeline_mode<synchronous>, transform_indices = @transform_1, window_bounds = array<i64: 128, 512>}, {pipeline_mode = #tpu.pipeline_mode<synchronous>, transform_indices = @transform_2, window_bounds = array<i64: 256, 512>}, {pipeline_mode = #tpu.pipeline_mode<synchronous>, transform_indices = @transform_3, window_bounds = array<i64: 1, 512>}, {pipeline_mode = #tpu.pipeline_mode<synchronous>, transform_indices = @transform_4, window_bounds = array<i64: 128, 4>}, {pipeline_mode = #tpu.pipeline_mode<synchronous>, transform_indices = @transform_5, window_bounds = array<i64: 1, 4>}, {transform_indices = @transform_6, window_bounds = array<i64: 8, 4>}]} {
    %c0_i32 = arith.constant 0 : i32
    %0 = arith.cmpi eq, %arg1, %c0_i32 : i32
    %1 = arith.extui %0 : i1 to i32
    %c0_i32_0 = arith.constant 0 : i32
    %2 = arith.cmpi ne, %1, %c0_i32_0 : i32
    scf.if %2 {
      %cst_104 = arith.constant 0.000000e+00 : f32
      %483 = vector.broadcast %cst_104 : f32 to vector<8x128xf32>
      %c0_105 = arith.constant 0 : index
      %c0_106 = arith.constant 0 : index
      %484 = vector.load %arg9[%c0_105, %c0_106] : memref<8x128xf32, #tpu.memory_space<vmem>>, vector<8x128xf32>
      tpu.vector_store %arg9[%c0_105, %c0_106], %483 {strides = array<i32>} : memref<8x128xf32, #tpu.memory_space<vmem>>, vector<8x128xf32>,
      %c0_107 = arith.constant 0 : index
      %c0_108 = arith.constant 0 : index
      %485 = vector.load %arg10[%c0_107, %c0_108] : memref<8x128xf32, #tpu.memory_space<vmem>>, vector<8x128xf32>
      tpu.vector_store %arg10[%c0_107, %c0_108], %483 {strides = array<i32>} : memref<8x128xf32, #tpu.memory_space<vmem>>, vector<8x128xf32>,
      %c0_109 = arith.constant 0 : index
      %c0_110 = arith.constant 0 : index
      %486 = vector.load %arg11[%c0_109, %c0_110] : memref<8x128xf32, #tpu.memory_space<vmem>>, vector<8x128xf32>
      tpu.vector_store %arg11[%c0_109, %c0_110], %483 {strides = array<i32>} : memref<8x128xf32, #tpu.memory_space<vmem>>, vector<8x128xf32>,
      %c0_111 = arith.constant 0 : index
      %c0_112 = arith.constant 0 : index
      %487 = vector.load %arg12[%c0_111, %c0_112] : memref<8x128xf32, #tpu.memory_space<vmem>>, vector<8x128xf32>
      tpu.vector_store %arg12[%c0_111, %c0_112], %483 {strides = array<i32>} : memref<8x128xf32, #tpu.memory_space<vmem>>, vector<8x128xf32>,
    } else {
    }
    %c0 = arith.constant 0 : index
    %c0_1 = arith.constant 0 : index
    %3 = vector.load %arg3[%c0, %c0_1] : memref<128x512xf32, #tpu.memory_space<vmem>>, vector<128x512xf32>
    %c0_2 = arith.constant 0 : index
    %c0_3 = arith.constant 0 : index
    %4 = vector.load %arg4[%c0_2, %c0_3] : memref<256x512xf32, #tpu.memory_space<vmem>>, vector<256x512xf32>
    %c0_4 = arith.constant 0 : index
    %c0_5 = arith.constant 0 : index
    %5 = vector.load %arg5[%c0_4, %c0_5] : memref<1x512xf32, #tpu.memory_space<vmem>>, vector<1x512xf32>
    %6 = vector.shape_cast %5 : vector<1x512xf32> to vector<1x512xf32>
    %7 = vector.broadcast %6 : vector<1x512xf32> to vector<8x512xf32>
    %c0_6 = arith.constant 0 : index
    %c0_7 = arith.constant 0 : index
    %8 = vector.load %arg9[%c0_6, %c0_7] : memref<8x128xf32, #tpu.memory_space<vmem>>, vector<8x128xf32>
    %c0_8 = arith.constant 0 : index
    %c0_9 = arith.constant 0 : index
    %9 = vector.load %arg10[%c0_8, %c0_9] : memref<8x128xf32, #tpu.memory_space<vmem>>, vector<8x128xf32>
    %c0_10 = arith.constant 0 : index
    %c0_11 = arith.constant 0 : index
    %10 = vector.load %arg11[%c0_10, %c0_11] : memref<8x128xf32, #tpu.memory_space<vmem>>, vector<8x128xf32>
    %c0_12 = arith.constant 0 : index
    %c0_13 = arith.constant 0 : index
    %11 = vector.load %arg12[%c0_12, %c0_13] : memref<8x128xf32, #tpu.memory_space<vmem>>, vector<8x128xf32>
    %c0_i32_14 = arith.constant 0 : i32
    %12 = arith.index_cast %c0_i32_14 : i32 to index
    %c0_15 = arith.constant 0 : index
    %c0_16 = arith.constant 0 : index
    %13 = vector.load %arg2[%12, %c0_15, %c0_16] : memref<8x8x512xf32, #tpu.memory_space<vmem>>, vector<1x8x512xf32>
    %14 = vector.shape_cast %13 : vector<1x8x512xf32> to vector<8x512xf32>
    %cst = arith.constant dense<0.000000e+00> : vector<8x512xf32>
    %15 = tpu.matmul %8, %3, %cst {dimension_numbers = #tpu.dot_dimension_numbers<[1], [0], [0], [1], [0, 0, 1, 1], [], []>} : vector<8x128xf32>, vector<128x512xf32>, vector<8x512xf32> -> vector<8x512xf32>
    %16 = arith.addf %14, %15 : vector<8x512xf32>
    %17 = vector.extract_strided_slice %16 {offsets = [0, 0], sizes = [8, 128], strides = [1, 1]} : vector<8x512xf32> to vector<8x128xf32>
    %18 = arith.negf %17 : vector<8x128xf32>
    %19 = math.exp %18 : vector<8x128xf32>
    %cst_17 = arith.constant 1.000000e+00 : f32
    %20 = vector.broadcast %cst_17 : f32 to vector<8x128xf32>
    %21 = arith.addf %20, %19 : vector<8x128xf32>
    %22 = arith.divf %20, %21 : vector<8x128xf32>
    %23 = vector.extract_strided_slice %16 {offsets = [0, 128], sizes = [8, 128], strides = [1, 1]} : vector<8x512xf32> to vector<8x128xf32>
    %24 = arith.negf %23 : vector<8x128xf32>
    %25 = math.exp %24 : vector<8x128xf32>
    %cst_18 = arith.constant 1.000000e+00 : f32
    %26 = vector.broadcast %cst_18 : f32 to vector<8x128xf32>
    %27 = arith.addf %26, %25 : vector<8x128xf32>
    %28 = arith.divf %26, %27 : vector<8x128xf32>
    %29 = vector.extract_strided_slice %16 {offsets = [0, 256], sizes = [8, 128], strides = [1, 1]} : vector<8x512xf32> to vector<8x128xf32>
    %30 = math.tanh %29 : vector<8x128xf32>
    %31 = vector.extract_strided_slice %16 {offsets = [0, 384], sizes = [8, 128], strides = [1, 1]} : vector<8x512xf32> to vector<8x128xf32>
    %32 = arith.negf %31 : vector<8x128xf32>
    %33 = math.exp %32 : vector<8x128xf32>
    %cst_19 = arith.constant 1.000000e+00 : f32
    %34 = vector.broadcast %cst_19 : f32 to vector<8x128xf32>
    %35 = arith.addf %34, %33 : vector<8x128xf32>
    %36 = arith.divf %34, %35 : vector<8x128xf32>
    %37 = arith.mulf %28, %9 : vector<8x128xf32>
    %38 = arith.mulf %22, %30 : vector<8x128xf32>
    %39 = arith.addf %37, %38 : vector<8x128xf32>
    %40 = math.tanh %39 : vector<8x128xf32>
    %41 = arith.mulf %36, %40 : vector<8x128xf32>
    %42 = tpu.concatenate %41, %10 in 1 : vector<8x128xf32>, vector<8x128xf32> -> vector<8x256xf32>
    %cst_20 = arith.constant dense<0.000000e+00> : vector<8x512xf32>
    %43 = tpu.matmul %42, %4, %cst_20 {dimension_numbers = #tpu.dot_dimension_numbers<[1], [0], [0], [1], [0, 0, 1, 1], [], []>} : vector<8x256xf32>, vector<256x512xf32>, vector<8x512xf32> -> vector<8x512xf32>
    %44 = arith.addf %43, %7 : vector<8x512xf32>
    %45 = vector.extract_strided_slice %44 {offsets = [0, 0], sizes = [8, 128], strides = [1, 1]} : vector<8x512xf32> to vector<8x128xf32>
    %46 = arith.negf %45 : vector<8x128xf32>
    %47 = math.exp %46 : vector<8x128xf32>
    %cst_21 = arith.constant 1.000000e+00 : f32
    %48 = vector.broadcast %cst_21 : f32 to vector<8x128xf32>
    %49 = arith.addf %48, %47 : vector<8x128xf32>
    %50 = arith.divf %48, %49 : vector<8x128xf32>
    %51 = vector.extract_strided_slice %44 {offsets = [0, 128], sizes = [8, 128], strides = [1, 1]} : vector<8x512xf32> to vector<8x128xf32>
    %52 = arith.negf %51 : vector<8x128xf32>
    %53 = math.exp %52 : vector<8x128xf32>
    %cst_22 = arith.constant 1.000000e+00 : f32
    %54 = vector.broadcast %cst_22 : f32 to vector<8x128xf32>
    %55 = arith.addf %54, %53 : vector<8x128xf32>
    %56 = arith.divf %54, %55 : vector<8x128xf32>
    %57 = vector.extract_strided_slice %44 {offsets = [0, 256], sizes = [8, 128], strides = [1, 1]} : vector<8x512xf32> to vector<8x128xf32>
    %58 = math.tanh %57 : vector<8x128xf32>
    %59 = vector.extract_strided_slice %44 {offsets = [0, 384], sizes = [8, 128], strides = [1, 1]} : vector<8x512xf32> to vector<8x128xf32>
    %60 = arith.negf %59 : vector<8x128xf32>
    %61 = math.exp %60 : vector<8x128xf32>
    %cst_23 = arith.constant 1.000000e+00 : f32
    %62 = vector.broadcast %cst_23 : f32 to vector<8x128xf32>
    %63 = arith.addf %62, %61 : vector<8x128xf32>
    %64 = arith.divf %62, %63 : vector<8x128xf32>
    %65 = arith.mulf %56, %11 : vector<8x128xf32>
    %66 = arith.mulf %50, %58 : vector<8x128xf32>
    %67 = arith.addf %65, %66 : vector<8x128xf32>
    %68 = math.tanh %67 : vector<8x128xf32>
    %69 = arith.mulf %64, %68 : vector<8x128xf32>
    %c1_i32 = arith.constant 1 : i32
    %70 = arith.index_cast %c1_i32 : i32 to index
    %c0_24 = arith.constant 0 : index
    %c0_25 = arith.constant 0 : index
    %71 = vector.load %arg2[%70, %c0_24, %c0_25] : memref<8x8x512xf32, #tpu.memory_space<vmem>>, vector<1x8x512xf32>
    %72 = vector.shape_cast %71 : vector<1x8x512xf32> to vector<8x512xf32>
    %cst_26 = arith.constant dense<0.000000e+00> : vector<8x512xf32>
    %73 = tpu.matmul %41, %3, %cst_26 {dimension_numbers = #tpu.dot_dimension_numbers<[1], [0], [0], [1], [0, 0, 1, 1], [], []>} : vector<8x128xf32>, vector<128x512xf32>, vector<8x512xf32> -> vector<8x512xf32>
    %74 = arith.addf %72, %73 : vector<8x512xf32>
    %75 = vector.extract_strided_slice %74 {offsets = [0, 0], sizes = [8, 128], strides = [1, 1]} : vector<8x512xf32> to vector<8x128xf32>
    %76 = arith.negf %75 : vector<8x128xf32>
    %77 = math.exp %76 : vector<8x128xf32>
    %cst_27 = arith.constant 1.000000e+00 : f32
    %78 = vector.broadcast %cst_27 : f32 to vector<8x128xf32>
    %79 = arith.addf %78, %77 : vector<8x128xf32>
    %80 = arith.divf %78, %79 : vector<8x128xf32>
    %81 = vector.extract_strided_slice %74 {offsets = [0, 128], sizes = [8, 128], strides = [1, 1]} : vector<8x512xf32> to vector<8x128xf32>
    %82 = arith.negf %81 : vector<8x128xf32>
    %83 = math.exp %82 : vector<8x128xf32>
    %cst_28 = arith.constant 1.000000e+00 : f32
    %84 = vector.broadcast %cst_28 : f32 to vector<8x128xf32>
    %85 = arith.addf %84, %83 : vector<8x128xf32>
    %86 = arith.divf %84, %85 : vector<8x128xf32>
    %87 = vector.extract_strided_slice %74 {offsets = [0, 256], sizes = [8, 128], strides = [1, 1]} : vector<8x512xf32> to vector<8x128xf32>
    %88 = math.tanh %87 : vector<8x128xf32>
    %89 = vector.extract_strided_slice %74 {offsets = [0, 384], sizes = [8, 128], strides = [1, 1]} : vector<8x512xf32> to vector<8x128xf32>
    %90 = arith.negf %89 : vector<8x128xf32>
    %91 = math.exp %90 : vector<8x128xf32>
    %cst_29 = arith.constant 1.000000e+00 : f32
    %92 = vector.broadcast %cst_29 : f32 to vector<8x128xf32>
    %93 = arith.addf %92, %91 : vector<8x128xf32>
    %94 = arith.divf %92, %93 : vector<8x128xf32>
    %95 = arith.mulf %86, %39 : vector<8x128xf32>
    %96 = arith.mulf %80, %88 : vector<8x128xf32>
    %97 = arith.addf %95, %96 : vector<8x128xf32>
    %98 = math.tanh %97 : vector<8x128xf32>
    %99 = arith.mulf %94, %98 : vector<8x128xf32>
    %100 = tpu.concatenate %99, %69 in 1 : vector<8x128xf32>, vector<8x128xf32> -> vector<8x256xf32>
    %cst_30 = arith.constant dense<0.000000e+00> : vector<8x512xf32>
    %101 = tpu.matmul %100, %4, %cst_30 {dimension_numbers = #tpu.dot_dimension_numbers<[1], [0], [0], [1], [0, 0, 1, 1], [], []>} : vector<8x256xf32>, vector<256x512xf32>, vector<8x512xf32> -> vector<8x512xf32>
    %102 = arith.addf %101, %7 : vector<8x512xf32>
    %103 = vector.extract_strided_slice %102 {offsets = [0, 0], sizes = [8, 128], strides = [1, 1]} : vector<8x512xf32> to vector<8x128xf32>
    %104 = arith.negf %103 : vector<8x128xf32>
    %105 = math.exp %104 : vector<8x128xf32>
    %cst_31 = arith.constant 1.000000e+00 : f32
    %106 = vector.broadcast %cst_31 : f32 to vector<8x128xf32>
    %107 = arith.addf %106, %105 : vector<8x128xf32>
    %108 = arith.divf %106, %107 : vector<8x128xf32>
    %109 = vector.extract_strided_slice %102 {offsets = [0, 128], sizes = [8, 128], strides = [1, 1]} : vector<8x512xf32> to vector<8x128xf32>
    %110 = arith.negf %109 : vector<8x128xf32>
    %111 = math.exp %110 : vector<8x128xf32>
    %cst_32 = arith.constant 1.000000e+00 : f32
    %112 = vector.broadcast %cst_32 : f32 to vector<8x128xf32>
    %113 = arith.addf %112, %111 : vector<8x128xf32>
    %114 = arith.divf %112, %113 : vector<8x128xf32>
    %115 = vector.extract_strided_slice %102 {offsets = [0, 256], sizes = [8, 128], strides = [1, 1]} : vector<8x512xf32> to vector<8x128xf32>
    %116 = math.tanh %115 : vector<8x128xf32>
    %117 = vector.extract_strided_slice %102 {offsets = [0, 384], sizes = [8, 128], strides = [1, 1]} : vector<8x512xf32> to vector<8x128xf32>
    %118 = arith.negf %117 : vector<8x128xf32>
    %119 = math.exp %118 : vector<8x128xf32>
    %cst_33 = arith.constant 1.000000e+00 : f32
    %120 = vector.broadcast %cst_33 : f32 to vector<8x128xf32>
    %121 = arith.addf %120, %119 : vector<8x128xf32>
    %122 = arith.divf %120, %121 : vector<8x128xf32>
    %123 = arith.mulf %114, %67 : vector<8x128xf32>
    %124 = arith.mulf %108, %116 : vector<8x128xf32>
    %125 = arith.addf %123, %124 : vector<8x128xf32>
    %126 = math.tanh %125 : vector<8x128xf32>
    %127 = arith.mulf %122, %126 : vector<8x128xf32>
    %c2_i32 = arith.constant 2 : i32
    %128 = arith.index_cast %c2_i32 : i32 to index
    %c0_34 = arith.constant 0 : index
    %c0_35 = arith.constant 0 : index
    %129 = vector.load %arg2[%128, %c0_34, %c0_35] : memref<8x8x512xf32, #tpu.memory_space<vmem>>, vector<1x8x512xf32>
    %130 = vector.shape_cast %129 : vector<1x8x512xf32> to vector<8x512xf32>
    %cst_36 = arith.constant dense<0.000000e+00> : vector<8x512xf32>
    %131 = tpu.matmul %99, %3, %cst_36 {dimension_numbers = #tpu.dot_dimension_numbers<[1], [0], [0], [1], [0, 0, 1, 1], [], []>} : vector<8x128xf32>, vector<128x512xf32>, vector<8x512xf32> -> vector<8x512xf32>
    %132 = arith.addf %130, %131 : vector<8x512xf32>
    %133 = vector.extract_strided_slice %132 {offsets = [0, 0], sizes = [8, 128], strides = [1, 1]} : vector<8x512xf32> to vector<8x128xf32>
    %134 = arith.negf %133 : vector<8x128xf32>
    %135 = math.exp %134 : vector<8x128xf32>
    %cst_37 = arith.constant 1.000000e+00 : f32
    %136 = vector.broadcast %cst_37 : f32 to vector<8x128xf32>
    %137 = arith.addf %136, %135 : vector<8x128xf32>
    %138 = arith.divf %136, %137 : vector<8x128xf32>
    %139 = vector.extract_strided_slice %132 {offsets = [0, 128], sizes = [8, 128], strides = [1, 1]} : vector<8x512xf32> to vector<8x128xf32>
    %140 = arith.negf %139 : vector<8x128xf32>
    %141 = math.exp %140 : vector<8x128xf32>
    %cst_38 = arith.constant 1.000000e+00 : f32
    %142 = vector.broadcast %cst_38 : f32 to vector<8x128xf32>
    %143 = arith.addf %142, %141 : vector<8x128xf32>
    %144 = arith.divf %142, %143 : vector<8x128xf32>
    %145 = vector.extract_strided_slice %132 {offsets = [0, 256], sizes = [8, 128], strides = [1, 1]} : vector<8x512xf32> to vector<8x128xf32>
    %146 = math.tanh %145 : vector<8x128xf32>
    %147 = vector.extract_strided_slice %132 {offsets = [0, 384], sizes = [8, 128], strides = [1, 1]} : vector<8x512xf32> to vector<8x128xf32>
    %148 = arith.negf %147 : vector<8x128xf32>
    %149 = math.exp %148 : vector<8x128xf32>
    %cst_39 = arith.constant 1.000000e+00 : f32
    %150 = vector.broadcast %cst_39 : f32 to vector<8x128xf32>
    %151 = arith.addf %150, %149 : vector<8x128xf32>
    %152 = arith.divf %150, %151 : vector<8x128xf32>
    %153 = arith.mulf %144, %97 : vector<8x128xf32>
    %154 = arith.mulf %138, %146 : vector<8x128xf32>
    %155 = arith.addf %153, %154 : vector<8x128xf32>
    %156 = math.tanh %155 : vector<8x128xf32>
    %157 = arith.mulf %152, %156 : vector<8x128xf32>
    %158 = tpu.concatenate %157, %127 in 1 : vector<8x128xf32>, vector<8x128xf32> -> vector<8x256xf32>
    %cst_40 = arith.constant dense<0.000000e+00> : vector<8x512xf32>
    %159 = tpu.matmul %158, %4, %cst_40 {dimension_numbers = #tpu.dot_dimension_numbers<[1], [0], [0], [1], [0, 0, 1, 1], [], []>} : vector<8x256xf32>, vector<256x512xf32>, vector<8x512xf32> -> vector<8x512xf32>
    %160 = arith.addf %159, %7 : vector<8x512xf32>
    %161 = vector.extract_strided_slice %160 {offsets = [0, 0], sizes = [8, 128], strides = [1, 1]} : vector<8x512xf32> to vector<8x128xf32>
    %162 = arith.negf %161 : vector<8x128xf32>
    %163 = math.exp %162 : vector<8x128xf32>
    %cst_41 = arith.constant 1.000000e+00 : f32
    %164 = vector.broadcast %cst_41 : f32 to vector<8x128xf32>
    %165 = arith.addf %164, %163 : vector<8x128xf32>
    %166 = arith.divf %164, %165 : vector<8x128xf32>
    %167 = vector.extract_strided_slice %160 {offsets = [0, 128], sizes = [8, 128], strides = [1, 1]} : vector<8x512xf32> to vector<8x128xf32>
    %168 = arith.negf %167 : vector<8x128xf32>
    %169 = math.exp %168 : vector<8x128xf32>
    %cst_42 = arith.constant 1.000000e+00 : f32
    %170 = vector.broadcast %cst_42 : f32 to vector<8x128xf32>
    %171 = arith.addf %170, %169 : vector<8x128xf32>
    %172 = arith.divf %170, %171 : vector<8x128xf32>
    %173 = vector.extract_strided_slice %160 {offsets = [0, 256], sizes = [8, 128], strides = [1, 1]} : vector<8x512xf32> to vector<8x128xf32>
    %174 = math.tanh %173 : vector<8x128xf32>
    %175 = vector.extract_strided_slice %160 {offsets = [0, 384], sizes = [8, 128], strides = [1, 1]} : vector<8x512xf32> to vector<8x128xf32>
    %176 = arith.negf %175 : vector<8x128xf32>
    %177 = math.exp %176 : vector<8x128xf32>
    %cst_43 = arith.constant 1.000000e+00 : f32
    %178 = vector.broadcast %cst_43 : f32 to vector<8x128xf32>
    %179 = arith.addf %178, %177 : vector<8x128xf32>
    %180 = arith.divf %178, %179 : vector<8x128xf32>
    %181 = arith.mulf %172, %125 : vector<8x128xf32>
    %182 = arith.mulf %166, %174 : vector<8x128xf32>
    %183 = arith.addf %181, %182 : vector<8x128xf32>
    %184 = math.tanh %183 : vector<8x128xf32>
    %185 = arith.mulf %180, %184 : vector<8x128xf32>
    %c3_i32 = arith.constant 3 : i32
    %186 = arith.index_cast %c3_i32 : i32 to index
    %c0_44 = arith.constant 0 : index
    %c0_45 = arith.constant 0 : index
    %187 = vector.load %arg2[%186, %c0_44, %c0_45] : memref<8x8x512xf32, #tpu.memory_space<vmem>>, vector<1x8x512xf32>
    %188 = vector.shape_cast %187 : vector<1x8x512xf32> to vector<8x512xf32>
    %cst_46 = arith.constant dense<0.000000e+00> : vector<8x512xf32>
    %189 = tpu.matmul %157, %3, %cst_46 {dimension_numbers = #tpu.dot_dimension_numbers<[1], [0], [0], [1], [0, 0, 1, 1], [], []>} : vector<8x128xf32>, vector<128x512xf32>, vector<8x512xf32> -> vector<8x512xf32>
    %190 = arith.addf %188, %189 : vector<8x512xf32>
    %191 = vector.extract_strided_slice %190 {offsets = [0, 0], sizes = [8, 128], strides = [1, 1]} : vector<8x512xf32> to vector<8x128xf32>
    %192 = arith.negf %191 : vector<8x128xf32>
    %193 = math.exp %192 : vector<8x128xf32>
    %cst_47 = arith.constant 1.000000e+00 : f32
    %194 = vector.broadcast %cst_47 : f32 to vector<8x128xf32>
    %195 = arith.addf %194, %193 : vector<8x128xf32>
    %196 = arith.divf %194, %195 : vector<8x128xf32>
    %197 = vector.extract_strided_slice %190 {offsets = [0, 128], sizes = [8, 128], strides = [1, 1]} : vector<8x512xf32> to vector<8x128xf32>
    %198 = arith.negf %197 : vector<8x128xf32>
    %199 = math.exp %198 : vector<8x128xf32>
    %cst_48 = arith.constant 1.000000e+00 : f32
    %200 = vector.broadcast %cst_48 : f32 to vector<8x128xf32>
    %201 = arith.addf %200, %199 : vector<8x128xf32>
    %202 = arith.divf %200, %201 : vector<8x128xf32>
    %203 = vector.extract_strided_slice %190 {offsets = [0, 256], sizes = [8, 128], strides = [1, 1]} : vector<8x512xf32> to vector<8x128xf32>
    %204 = math.tanh %203 : vector<8x128xf32>
    %205 = vector.extract_strided_slice %190 {offsets = [0, 384], sizes = [8, 128], strides = [1, 1]} : vector<8x512xf32> to vector<8x128xf32>
    %206 = arith.negf %205 : vector<8x128xf32>
    %207 = math.exp %206 : vector<8x128xf32>
    %cst_49 = arith.constant 1.000000e+00 : f32
    %208 = vector.broadcast %cst_49 : f32 to vector<8x128xf32>
    %209 = arith.addf %208, %207 : vector<8x128xf32>
    %210 = arith.divf %208, %209 : vector<8x128xf32>
    %211 = arith.mulf %202, %155 : vector<8x128xf32>
    %212 = arith.mulf %196, %204 : vector<8x128xf32>
    %213 = arith.addf %211, %212 : vector<8x128xf32>
    %214 = math.tanh %213 : vector<8x128xf32>
    %215 = arith.mulf %210, %214 : vector<8x128xf32>
    %216 = tpu.concatenate %215, %185 in 1 : vector<8x128xf32>, vector<8x128xf32> -> vector<8x256xf32>
    %cst_50 = arith.constant dense<0.000000e+00> : vector<8x512xf32>
    %217 = tpu.matmul %216, %4, %cst_50 {dimension_numbers = #tpu.dot_dimension_numbers<[1], [0], [0], [1], [0, 0, 1, 1], [], []>} : vector<8x256xf32>, vector<256x512xf32>, vector<8x512xf32> -> vector<8x512xf32>
    %218 = arith.addf %217, %7 : vector<8x512xf32>
    %219 = vector.extract_strided_slice %218 {offsets = [0, 0], sizes = [8, 128], strides = [1, 1]} : vector<8x512xf32> to vector<8x128xf32>
    %220 = arith.negf %219 : vector<8x128xf32>
    %221 = math.exp %220 : vector<8x128xf32>
    %cst_51 = arith.constant 1.000000e+00 : f32
    %222 = vector.broadcast %cst_51 : f32 to vector<8x128xf32>
    %223 = arith.addf %222, %221 : vector<8x128xf32>
    %224 = arith.divf %222, %223 : vector<8x128xf32>
    %225 = vector.extract_strided_slice %218 {offsets = [0, 128], sizes = [8, 128], strides = [1, 1]} : vector<8x512xf32> to vector<8x128xf32>
    %226 = arith.negf %225 : vector<8x128xf32>
    %227 = math.exp %226 : vector<8x128xf32>
    %cst_52 = arith.constant 1.000000e+00 : f32
    %228 = vector.broadcast %cst_52 : f32 to vector<8x128xf32>
    %229 = arith.addf %228, %227 : vector<8x128xf32>
    %230 = arith.divf %228, %229 : vector<8x128xf32>
    %231 = vector.extract_strided_slice %218 {offsets = [0, 256], sizes = [8, 128], strides = [1, 1]} : vector<8x512xf32> to vector<8x128xf32>
    %232 = math.tanh %231 : vector<8x128xf32>
    %233 = vector.extract_strided_slice %218 {offsets = [0, 384], sizes = [8, 128], strides = [1, 1]} : vector<8x512xf32> to vector<8x128xf32>
    %234 = arith.negf %233 : vector<8x128xf32>
    %235 = math.exp %234 : vector<8x128xf32>
    %cst_53 = arith.constant 1.000000e+00 : f32
    %236 = vector.broadcast %cst_53 : f32 to vector<8x128xf32>
    %237 = arith.addf %236, %235 : vector<8x128xf32>
    %238 = arith.divf %236, %237 : vector<8x128xf32>
    %239 = arith.mulf %230, %183 : vector<8x128xf32>
    %240 = arith.mulf %224, %232 : vector<8x128xf32>
    %241 = arith.addf %239, %240 : vector<8x128xf32>
    %242 = math.tanh %241 : vector<8x128xf32>
    %243 = arith.mulf %238, %242 : vector<8x128xf32>
    %c4_i32 = arith.constant 4 : i32
    %244 = arith.index_cast %c4_i32 : i32 to index
    %c0_54 = arith.constant 0 : index
    %c0_55 = arith.constant 0 : index
    %245 = vector.load %arg2[%244, %c0_54, %c0_55] : memref<8x8x512xf32, #tpu.memory_space<vmem>>, vector<1x8x512xf32>
    %246 = vector.shape_cast %245 : vector<1x8x512xf32> to vector<8x512xf32>
    %cst_56 = arith.constant dense<0.000000e+00> : vector<8x512xf32>
    %247 = tpu.matmul %215, %3, %cst_56 {dimension_numbers = #tpu.dot_dimension_numbers<[1], [0], [0], [1], [0, 0, 1, 1], [], []>} : vector<8x128xf32>, vector<128x512xf32>, vector<8x512xf32> -> vector<8x512xf32>
    %248 = arith.addf %246, %247 : vector<8x512xf32>
    %249 = vector.extract_strided_slice %248 {offsets = [0, 0], sizes = [8, 128], strides = [1, 1]} : vector<8x512xf32> to vector<8x128xf32>
    %250 = arith.negf %249 : vector<8x128xf32>
    %251 = math.exp %250 : vector<8x128xf32>
    %cst_57 = arith.constant 1.000000e+00 : f32
    %252 = vector.broadcast %cst_57 : f32 to vector<8x128xf32>
    %253 = arith.addf %252, %251 : vector<8x128xf32>
    %254 = arith.divf %252, %253 : vector<8x128xf32>
    %255 = vector.extract_strided_slice %248 {offsets = [0, 128], sizes = [8, 128], strides = [1, 1]} : vector<8x512xf32> to vector<8x128xf32>
    %256 = arith.negf %255 : vector<8x128xf32>
    %257 = math.exp %256 : vector<8x128xf32>
    %cst_58 = arith.constant 1.000000e+00 : f32
    %258 = vector.broadcast %cst_58 : f32 to vector<8x128xf32>
    %259 = arith.addf %258, %257 : vector<8x128xf32>
    %260 = arith.divf %258, %259 : vector<8x128xf32>
    %261 = vector.extract_strided_slice %248 {offsets = [0, 256], sizes = [8, 128], strides = [1, 1]} : vector<8x512xf32> to vector<8x128xf32>
    %262 = math.tanh %261 : vector<8x128xf32>
    %263 = vector.extract_strided_slice %248 {offsets = [0, 384], sizes = [8, 128], strides = [1, 1]} : vector<8x512xf32> to vector<8x128xf32>
    %264 = arith.negf %263 : vector<8x128xf32>
    %265 = math.exp %264 : vector<8x128xf32>
    %cst_59 = arith.constant 1.000000e+00 : f32
    %266 = vector.broadcast %cst_59 : f32 to vector<8x128xf32>
    %267 = arith.addf %266, %265 : vector<8x128xf32>
    %268 = arith.divf %266, %267 : vector<8x128xf32>
    %269 = arith.mulf %260, %213 : vector<8x128xf32>
    %270 = arith.mulf %254, %262 : vector<8x128xf32>
    %271 = arith.addf %269, %270 : vector<8x128xf32>
    %272 = math.tanh %271 : vector<8x128xf32>
    %273 = arith.mulf %268, %272 : vector<8x128xf32>
    %274 = tpu.concatenate %273, %243 in 1 : vector<8x128xf32>, vector<8x128xf32> -> vector<8x256xf32>
    %cst_60 = arith.constant dense<0.000000e+00> : vector<8x512xf32>
    %275 = tpu.matmul %274, %4, %cst_60 {dimension_numbers = #tpu.dot_dimension_numbers<[1], [0], [0], [1], [0, 0, 1, 1], [], []>} : vector<8x256xf32>, vector<256x512xf32>, vector<8x512xf32> -> vector<8x512xf32>
    %276 = arith.addf %275, %7 : vector<8x512xf32>
    %277 = vector.extract_strided_slice %276 {offsets = [0, 0], sizes = [8, 128], strides = [1, 1]} : vector<8x512xf32> to vector<8x128xf32>
    %278 = arith.negf %277 : vector<8x128xf32>
    %279 = math.exp %278 : vector<8x128xf32>
    %cst_61 = arith.constant 1.000000e+00 : f32
    %280 = vector.broadcast %cst_61 : f32 to vector<8x128xf32>
    %281 = arith.addf %280, %279 : vector<8x128xf32>
    %282 = arith.divf %280, %281 : vector<8x128xf32>
    %283 = vector.extract_strided_slice %276 {offsets = [0, 128], sizes = [8, 128], strides = [1, 1]} : vector<8x512xf32> to vector<8x128xf32>
    %284 = arith.negf %283 : vector<8x128xf32>
    %285 = math.exp %284 : vector<8x128xf32>
    %cst_62 = arith.constant 1.000000e+00 : f32
    %286 = vector.broadcast %cst_62 : f32 to vector<8x128xf32>
    %287 = arith.addf %286, %285 : vector<8x128xf32>
    %288 = arith.divf %286, %287 : vector<8x128xf32>
    %289 = vector.extract_strided_slice %276 {offsets = [0, 256], sizes = [8, 128], strides = [1, 1]} : vector<8x512xf32> to vector<8x128xf32>
    %290 = math.tanh %289 : vector<8x128xf32>
    %291 = vector.extract_strided_slice %276 {offsets = [0, 384], sizes = [8, 128], strides = [1, 1]} : vector<8x512xf32> to vector<8x128xf32>
    %292 = arith.negf %291 : vector<8x128xf32>
    %293 = math.exp %292 : vector<8x128xf32>
    %cst_63 = arith.constant 1.000000e+00 : f32
    %294 = vector.broadcast %cst_63 : f32 to vector<8x128xf32>
    %295 = arith.addf %294, %293 : vector<8x128xf32>
    %296 = arith.divf %294, %295 : vector<8x128xf32>
    %297 = arith.mulf %288, %241 : vector<8x128xf32>
    %298 = arith.mulf %282, %290 : vector<8x128xf32>
    %299 = arith.addf %297, %298 : vector<8x128xf32>
    %300 = math.tanh %299 : vector<8x128xf32>
    %301 = arith.mulf %296, %300 : vector<8x128xf32>
    %c5_i32 = arith.constant 5 : i32
    %302 = arith.index_cast %c5_i32 : i32 to index
    %c0_64 = arith.constant 0 : index
    %c0_65 = arith.constant 0 : index
    %303 = vector.load %arg2[%302, %c0_64, %c0_65] : memref<8x8x512xf32, #tpu.memory_space<vmem>>, vector<1x8x512xf32>
    %304 = vector.shape_cast %303 : vector<1x8x512xf32> to vector<8x512xf32>
    %cst_66 = arith.constant dense<0.000000e+00> : vector<8x512xf32>
    %305 = tpu.matmul %273, %3, %cst_66 {dimension_numbers = #tpu.dot_dimension_numbers<[1], [0], [0], [1], [0, 0, 1, 1], [], []>} : vector<8x128xf32>, vector<128x512xf32>, vector<8x512xf32> -> vector<8x512xf32>
    %306 = arith.addf %304, %305 : vector<8x512xf32>
    %307 = vector.extract_strided_slice %306 {offsets = [0, 0], sizes = [8, 128], strides = [1, 1]} : vector<8x512xf32> to vector<8x128xf32>
    %308 = arith.negf %307 : vector<8x128xf32>
    %309 = math.exp %308 : vector<8x128xf32>
    %cst_67 = arith.constant 1.000000e+00 : f32
    %310 = vector.broadcast %cst_67 : f32 to vector<8x128xf32>
    %311 = arith.addf %310, %309 : vector<8x128xf32>
    %312 = arith.divf %310, %311 : vector<8x128xf32>
    %313 = vector.extract_strided_slice %306 {offsets = [0, 128], sizes = [8, 128], strides = [1, 1]} : vector<8x512xf32> to vector<8x128xf32>
    %314 = arith.negf %313 : vector<8x128xf32>
    %315 = math.exp %314 : vector<8x128xf32>
    %cst_68 = arith.constant 1.000000e+00 : f32
    %316 = vector.broadcast %cst_68 : f32 to vector<8x128xf32>
    %317 = arith.addf %316, %315 : vector<8x128xf32>
    %318 = arith.divf %316, %317 : vector<8x128xf32>
    %319 = vector.extract_strided_slice %306 {offsets = [0, 256], sizes = [8, 128], strides = [1, 1]} : vector<8x512xf32> to vector<8x128xf32>
    %320 = math.tanh %319 : vector<8x128xf32>
    %321 = vector.extract_strided_slice %306 {offsets = [0, 384], sizes = [8, 128], strides = [1, 1]} : vector<8x512xf32> to vector<8x128xf32>
    %322 = arith.negf %321 : vector<8x128xf32>
    %323 = math.exp %322 : vector<8x128xf32>
    %cst_69 = arith.constant 1.000000e+00 : f32
    %324 = vector.broadcast %cst_69 : f32 to vector<8x128xf32>
    %325 = arith.addf %324, %323 : vector<8x128xf32>
    %326 = arith.divf %324, %325 : vector<8x128xf32>
    %327 = arith.mulf %318, %271 : vector<8x128xf32>
    %328 = arith.mulf %312, %320 : vector<8x128xf32>
    %329 = arith.addf %327, %328 : vector<8x128xf32>
    %330 = math.tanh %329 : vector<8x128xf32>
    %331 = arith.mulf %326, %330 : vector<8x128xf32>
    %332 = tpu.concatenate %331, %301 in 1 : vector<8x128xf32>, vector<8x128xf32> -> vector<8x256xf32>
    %cst_70 = arith.constant dense<0.000000e+00> : vector<8x512xf32>
    %333 = tpu.matmul %332, %4, %cst_70 {dimension_numbers = #tpu.dot_dimension_numbers<[1], [0], [0], [1], [0, 0, 1, 1], [], []>} : vector<8x256xf32>, vector<256x512xf32>, vector<8x512xf32> -> vector<8x512xf32>
    %334 = arith.addf %333, %7 : vector<8x512xf32>
    %335 = vector.extract_strided_slice %334 {offsets = [0, 0], sizes = [8, 128], strides = [1, 1]} : vector<8x512xf32> to vector<8x128xf32>
    %336 = arith.negf %335 : vector<8x128xf32>
    %337 = math.exp %336 : vector<8x128xf32>
    %cst_71 = arith.constant 1.000000e+00 : f32
    %338 = vector.broadcast %cst_71 : f32 to vector<8x128xf32>
    %339 = arith.addf %338, %337 : vector<8x128xf32>
    %340 = arith.divf %338, %339 : vector<8x128xf32>
    %341 = vector.extract_strided_slice %334 {offsets = [0, 128], sizes = [8, 128], strides = [1, 1]} : vector<8x512xf32> to vector<8x128xf32>
    %342 = arith.negf %341 : vector<8x128xf32>
    %343 = math.exp %342 : vector<8x128xf32>
    %cst_72 = arith.constant 1.000000e+00 : f32
    %344 = vector.broadcast %cst_72 : f32 to vector<8x128xf32>
    %345 = arith.addf %344, %343 : vector<8x128xf32>
    %346 = arith.divf %344, %345 : vector<8x128xf32>
    %347 = vector.extract_strided_slice %334 {offsets = [0, 256], sizes = [8, 128], strides = [1, 1]} : vector<8x512xf32> to vector<8x128xf32>
    %348 = math.tanh %347 : vector<8x128xf32>
    %349 = vector.extract_strided_slice %334 {offsets = [0, 384], sizes = [8, 128], strides = [1, 1]} : vector<8x512xf32> to vector<8x128xf32>
    %350 = arith.negf %349 : vector<8x128xf32>
    %351 = math.exp %350 : vector<8x128xf32>
    %cst_73 = arith.constant 1.000000e+00 : f32
    %352 = vector.broadcast %cst_73 : f32 to vector<8x128xf32>
    %353 = arith.addf %352, %351 : vector<8x128xf32>
    %354 = arith.divf %352, %353 : vector<8x128xf32>
    %355 = arith.mulf %346, %299 : vector<8x128xf32>
    %356 = arith.mulf %340, %348 : vector<8x128xf32>
    %357 = arith.addf %355, %356 : vector<8x128xf32>
    %358 = math.tanh %357 : vector<8x128xf32>
    %359 = arith.mulf %354, %358 : vector<8x128xf32>
    %c6_i32 = arith.constant 6 : i32
    %360 = arith.index_cast %c6_i32 : i32 to index
    %c0_74 = arith.constant 0 : index
    %c0_75 = arith.constant 0 : index
    %361 = vector.load %arg2[%360, %c0_74, %c0_75] : memref<8x8x512xf32, #tpu.memory_space<vmem>>, vector<1x8x512xf32>
    %362 = vector.shape_cast %361 : vector<1x8x512xf32> to vector<8x512xf32>
    %cst_76 = arith.constant dense<0.000000e+00> : vector<8x512xf32>
    %363 = tpu.matmul %331, %3, %cst_76 {dimension_numbers = #tpu.dot_dimension_numbers<[1], [0], [0], [1], [0, 0, 1, 1], [], []>} : vector<8x128xf32>, vector<128x512xf32>, vector<8x512xf32> -> vector<8x512xf32>
    %364 = arith.addf %362, %363 : vector<8x512xf32>
    %365 = vector.extract_strided_slice %364 {offsets = [0, 0], sizes = [8, 128], strides = [1, 1]} : vector<8x512xf32> to vector<8x128xf32>
    %366 = arith.negf %365 : vector<8x128xf32>
    %367 = math.exp %366 : vector<8x128xf32>
    %cst_77 = arith.constant 1.000000e+00 : f32
    %368 = vector.broadcast %cst_77 : f32 to vector<8x128xf32>
    %369 = arith.addf %368, %367 : vector<8x128xf32>
    %370 = arith.divf %368, %369 : vector<8x128xf32>
    %371 = vector.extract_strided_slice %364 {offsets = [0, 128], sizes = [8, 128], strides = [1, 1]} : vector<8x512xf32> to vector<8x128xf32>
    %372 = arith.negf %371 : vector<8x128xf32>
    %373 = math.exp %372 : vector<8x128xf32>
    %cst_78 = arith.constant 1.000000e+00 : f32
    %374 = vector.broadcast %cst_78 : f32 to vector<8x128xf32>
    %375 = arith.addf %374, %373 : vector<8x128xf32>
    %376 = arith.divf %374, %375 : vector<8x128xf32>
    %377 = vector.extract_strided_slice %364 {offsets = [0, 256], sizes = [8, 128], strides = [1, 1]} : vector<8x512xf32> to vector<8x128xf32>
    %378 = math.tanh %377 : vector<8x128xf32>
    %379 = vector.extract_strided_slice %364 {offsets = [0, 384], sizes = [8, 128], strides = [1, 1]} : vector<8x512xf32> to vector<8x128xf32>
    %380 = arith.negf %379 : vector<8x128xf32>
    %381 = math.exp %380 : vector<8x128xf32>
    %cst_79 = arith.constant 1.000000e+00 : f32
    %382 = vector.broadcast %cst_79 : f32 to vector<8x128xf32>
    %383 = arith.addf %382, %381 : vector<8x128xf32>
    %384 = arith.divf %382, %383 : vector<8x128xf32>
    %385 = arith.mulf %376, %329 : vector<8x128xf32>
    %386 = arith.mulf %370, %378 : vector<8x128xf32>
    %387 = arith.addf %385, %386 : vector<8x128xf32>
    %388 = math.tanh %387 : vector<8x128xf32>
    %389 = arith.mulf %384, %388 : vector<8x128xf32>
    %390 = tpu.concatenate %389, %359 in 1 : vector<8x128xf32>, vector<8x128xf32> -> vector<8x256xf32>
    %cst_80 = arith.constant dense<0.000000e+00> : vector<8x512xf32>
    %391 = tpu.matmul %390, %4, %cst_80 {dimension_numbers = #tpu.dot_dimension_numbers<[1], [0], [0], [1], [0, 0, 1, 1], [], []>} : vector<8x256xf32>, vector<256x512xf32>, vector<8x512xf32> -> vector<8x512xf32>
    %392 = arith.addf %391, %7 : vector<8x512xf32>
    %393 = vector.extract_strided_slice %392 {offsets = [0, 0], sizes = [8, 128], strides = [1, 1]} : vector<8x512xf32> to vector<8x128xf32>
    %394 = arith.negf %393 : vector<8x128xf32>
    %395 = math.exp %394 : vector<8x128xf32>
    %cst_81 = arith.constant 1.000000e+00 : f32
    %396 = vector.broadcast %cst_81 : f32 to vector<8x128xf32>
    %397 = arith.addf %396, %395 : vector<8x128xf32>
    %398 = arith.divf %396, %397 : vector<8x128xf32>
    %399 = vector.extract_strided_slice %392 {offsets = [0, 128], sizes = [8, 128], strides = [1, 1]} : vector<8x512xf32> to vector<8x128xf32>
    %400 = arith.negf %399 : vector<8x128xf32>
    %401 = math.exp %400 : vector<8x128xf32>
    %cst_82 = arith.constant 1.000000e+00 : f32
    %402 = vector.broadcast %cst_82 : f32 to vector<8x128xf32>
    %403 = arith.addf %402, %401 : vector<8x128xf32>
    %404 = arith.divf %402, %403 : vector<8x128xf32>
    %405 = vector.extract_strided_slice %392 {offsets = [0, 256], sizes = [8, 128], strides = [1, 1]} : vector<8x512xf32> to vector<8x128xf32>
    %406 = math.tanh %405 : vector<8x128xf32>
    %407 = vector.extract_strided_slice %392 {offsets = [0, 384], sizes = [8, 128], strides = [1, 1]} : vector<8x512xf32> to vector<8x128xf32>
    %408 = arith.negf %407 : vector<8x128xf32>
    %409 = math.exp %408 : vector<8x128xf32>
    %cst_83 = arith.constant 1.000000e+00 : f32
    %410 = vector.broadcast %cst_83 : f32 to vector<8x128xf32>
    %411 = arith.addf %410, %409 : vector<8x128xf32>
    %412 = arith.divf %410, %411 : vector<8x128xf32>
    %413 = arith.mulf %404, %357 : vector<8x128xf32>
    %414 = arith.mulf %398, %406 : vector<8x128xf32>
    %415 = arith.addf %413, %414 : vector<8x128xf32>
    %416 = math.tanh %415 : vector<8x128xf32>
    %417 = arith.mulf %412, %416 : vector<8x128xf32>
    %c7_i32 = arith.constant 7 : i32
    %418 = arith.index_cast %c7_i32 : i32 to index
    %c0_84 = arith.constant 0 : index
    %c0_85 = arith.constant 0 : index
    %419 = vector.load %arg2[%418, %c0_84, %c0_85] : memref<8x8x512xf32, #tpu.memory_space<vmem>>, vector<1x8x512xf32>
    %420 = vector.shape_cast %419 : vector<1x8x512xf32> to vector<8x512xf32>
    %cst_86 = arith.constant dense<0.000000e+00> : vector<8x512xf32>
    %421 = tpu.matmul %389, %3, %cst_86 {dimension_numbers = #tpu.dot_dimension_numbers<[1], [0], [0], [1], [0, 0, 1, 1], [], []>} : vector<8x128xf32>, vector<128x512xf32>, vector<8x512xf32> -> vector<8x512xf32>
    %422 = arith.addf %420, %421 : vector<8x512xf32>
    %423 = vector.extract_strided_slice %422 {offsets = [0, 0], sizes = [8, 128], strides = [1, 1]} : vector<8x512xf32> to vector<8x128xf32>
    %424 = arith.negf %423 : vector<8x128xf32>
    %425 = math.exp %424 : vector<8x128xf32>
    %cst_87 = arith.constant 1.000000e+00 : f32
    %426 = vector.broadcast %cst_87 : f32 to vector<8x128xf32>
    %427 = arith.addf %426, %425 : vector<8x128xf32>
    %428 = arith.divf %426, %427 : vector<8x128xf32>
    %429 = vector.extract_strided_slice %422 {offsets = [0, 128], sizes = [8, 128], strides = [1, 1]} : vector<8x512xf32> to vector<8x128xf32>
    %430 = arith.negf %429 : vector<8x128xf32>
    %431 = math.exp %430 : vector<8x128xf32>
    %cst_88 = arith.constant 1.000000e+00 : f32
    %432 = vector.broadcast %cst_88 : f32 to vector<8x128xf32>
    %433 = arith.addf %432, %431 : vector<8x128xf32>
    %434 = arith.divf %432, %433 : vector<8x128xf32>
    %435 = vector.extract_strided_slice %422 {offsets = [0, 256], sizes = [8, 128], strides = [1, 1]} : vector<8x512xf32> to vector<8x128xf32>
    %436 = math.tanh %435 : vector<8x128xf32>
    %437 = vector.extract_strided_slice %422 {offsets = [0, 384], sizes = [8, 128], strides = [1, 1]} : vector<8x512xf32> to vector<8x128xf32>
    %438 = arith.negf %437 : vector<8x128xf32>
    %439 = math.exp %438 : vector<8x128xf32>
    %cst_89 = arith.constant 1.000000e+00 : f32
    %440 = vector.broadcast %cst_89 : f32 to vector<8x128xf32>
    %441 = arith.addf %440, %439 : vector<8x128xf32>
    %442 = arith.divf %440, %441 : vector<8x128xf32>
    %443 = arith.mulf %434, %387 : vector<8x128xf32>
    %444 = arith.mulf %428, %436 : vector<8x128xf32>
    %445 = arith.addf %443, %444 : vector<8x128xf32>
    %446 = math.tanh %445 : vector<8x128xf32>
    %447 = arith.mulf %442, %446 : vector<8x128xf32>
    %448 = tpu.concatenate %447, %417 in 1 : vector<8x128xf32>, vector<8x128xf32> -> vector<8x256xf32>
    %cst_90 = arith.constant dense<0.000000e+00> : vector<8x512xf32>
    %449 = tpu.matmul %448, %4, %cst_90 {dimension_numbers = #tpu.dot_dimension_numbers<[1], [0], [0], [1], [0, 0, 1, 1], [], []>} : vector<8x256xf32>, vector<256x512xf32>, vector<8x512xf32> -> vector<8x512xf32>
    %450 = arith.addf %449, %7 : vector<8x512xf32>
    %451 = vector.extract_strided_slice %450 {offsets = [0, 0], sizes = [8, 128], strides = [1, 1]} : vector<8x512xf32> to vector<8x128xf32>
    %452 = arith.negf %451 : vector<8x128xf32>
    %453 = math.exp %452 : vector<8x128xf32>
    %cst_91 = arith.constant 1.000000e+00 : f32
    %454 = vector.broadcast %cst_91 : f32 to vector<8x128xf32>
    %455 = arith.addf %454, %453 : vector<8x128xf32>
    %456 = arith.divf %454, %455 : vector<8x128xf32>
    %457 = vector.extract_strided_slice %450 {offsets = [0, 128], sizes = [8, 128], strides = [1, 1]} : vector<8x512xf32> to vector<8x128xf32>
    %458 = arith.negf %457 : vector<8x128xf32>
    %459 = math.exp %458 : vector<8x128xf32>
    %cst_92 = arith.constant 1.000000e+00 : f32
    %460 = vector.broadcast %cst_92 : f32 to vector<8x128xf32>
    %461 = arith.addf %460, %459 : vector<8x128xf32>
    %462 = arith.divf %460, %461 : vector<8x128xf32>
    %463 = vector.extract_strided_slice %450 {offsets = [0, 256], sizes = [8, 128], strides = [1, 1]} : vector<8x512xf32> to vector<8x128xf32>
    %464 = math.tanh %463 : vector<8x128xf32>
    %465 = vector.extract_strided_slice %450 {offsets = [0, 384], sizes = [8, 128], strides = [1, 1]} : vector<8x512xf32> to vector<8x128xf32>
    %466 = arith.negf %465 : vector<8x128xf32>
    %467 = math.exp %466 : vector<8x128xf32>
    %cst_93 = arith.constant 1.000000e+00 : f32
    %468 = vector.broadcast %cst_93 : f32 to vector<8x128xf32>
    %469 = arith.addf %468, %467 : vector<8x128xf32>
    %470 = arith.divf %468, %469 : vector<8x128xf32>
    %471 = arith.mulf %462, %415 : vector<8x128xf32>
    %472 = arith.mulf %456, %464 : vector<8x128xf32>
    %473 = arith.addf %471, %472 : vector<8x128xf32>
    %474 = math.tanh %473 : vector<8x128xf32>
    %475 = arith.mulf %470, %474 : vector<8x128xf32>
    %c8_i32 = arith.constant 8 : i32
    %c0_94 = arith.constant 0 : index
    %c0_95 = arith.constant 0 : index
    %476 = vector.load %arg9[%c0_94, %c0_95] : memref<8x128xf32, #tpu.memory_space<vmem>>, vector<8x128xf32>
    tpu.vector_store %arg9[%c0_94, %c0_95], %447 {strides = array<i32>} : memref<8x128xf32, #tpu.memory_space<vmem>>, vector<8x128xf32>,
    %c0_96 = arith.constant 0 : index
    %c0_97 = arith.constant 0 : index
    %477 = vector.load %arg10[%c0_96, %c0_97] : memref<8x128xf32, #tpu.memory_space<vmem>>, vector<8x128xf32>
    tpu.vector_store %arg10[%c0_96, %c0_97], %445 {strides = array<i32>} : memref<8x128xf32, #tpu.memory_space<vmem>>, vector<8x128xf32>,
    %c0_98 = arith.constant 0 : index
    %c0_99 = arith.constant 0 : index
    %478 = vector.load %arg11[%c0_98, %c0_99] : memref<8x128xf32, #tpu.memory_space<vmem>>, vector<8x128xf32>
    tpu.vector_store %arg11[%c0_98, %c0_99], %475 {strides = array<i32>} : memref<8x128xf32, #tpu.memory_space<vmem>>, vector<8x128xf32>,
    %c0_100 = arith.constant 0 : index
    %c0_101 = arith.constant 0 : index
    %479 = vector.load %arg12[%c0_100, %c0_101] : memref<8x128xf32, #tpu.memory_space<vmem>>, vector<8x128xf32>
    tpu.vector_store %arg12[%c0_100, %c0_101], %473 {strides = array<i32>} : memref<8x128xf32, #tpu.memory_space<vmem>>, vector<8x128xf32>,
    %c0_i32_102 = arith.constant 0 : i32
    %480 = arith.cmpi eq, %arg1, %c0_i32_102 : i32
    %481 = arith.extui %480 : i1 to i32
    %c0_i32_103 = arith.constant 0 : i32
    %482 = arith.cmpi ne, %481, %c0_i32_103 : i32
    scf.if %482 {
      %c0_104 = arith.constant 0 : index
      %c0_105 = arith.constant 0 : index
      %483 = vector.load %arg6[%c0_104, %c0_105] : memref<128x4xf32, #tpu.memory_space<vmem>>, vector<128x4xf32>
      %cst_106 = arith.constant dense<0.000000e+00> : vector<8x4xf32>
      %484 = tpu.matmul %475, %483, %cst_106 {dimension_numbers = #tpu.dot_dimension_numbers<[1], [0], [0], [1], [0, 0, 1, 1], [], []>} : vector<8x128xf32>, vector<128x4xf32>, vector<8x4xf32> -> vector<8x4xf32>
      %c0_107 = arith.constant 0 : index
      %c0_108 = arith.constant 0 : index
      %485 = vector.load %arg7[%c0_107, %c0_108] : memref<1x4xf32, #tpu.memory_space<vmem>>, vector<1x4xf32>
      %486 = vector.broadcast %485 : vector<1x4xf32> to vector<8x4xf32>
      %487 = arith.addf %484, %486 : vector<8x4xf32>
      %c0_109 = arith.constant 0 : index
      %c0_110 = arith.constant 0 : index
      %488 = vector.load %arg8[%c0_109, %c0_110] : memref<8x4xf32, #tpu.memory_space<vmem>>, vector<8x4xf32>
      tpu.vector_store %arg8[%c0_109, %c0_110], %487 {strides = array<i32>} : memref<8x4xf32, #tpu.memory_space<vmem>>, vector<8x4xf32>,
    } else {
    }
    return
  }
  func.func @transform_0(%arg0: i32, %arg1: i32) -> (i32, i32, i32) {
    %c0_i32 = arith.constant 0 : i32
    %c0_i32_0 = arith.constant 0 : i32
    return %arg1, %arg0, %c0_i32 : i32, i32, i32
  }
  func.func @transform_1(%arg0: i32, %arg1: i32) -> (i32, i32) {
    %c0_i32 = arith.constant 0 : i32
    %c0_i32_0 = arith.constant 0 : i32
    %c0_i32_1 = arith.constant 0 : i32
    return %c0_i32, %c0_i32_0 : i32, i32
  }
  func.func @transform_2(%arg0: i32, %arg1: i32) -> (i32, i32) {
    %c0_i32 = arith.constant 0 : i32
    %c0_i32_0 = arith.constant 0 : i32
    %c0_i32_1 = arith.constant 0 : i32
    return %c0_i32, %c0_i32_0 : i32, i32
  }
  func.func @transform_3(%arg0: i32, %arg1: i32) -> (i32, i32) {
    %c0_i32 = arith.constant 0 : i32
    %c0_i32_0 = arith.constant 0 : i32
    %c0_i32_1 = arith.constant 0 : i32
    return %c0_i32, %c0_i32_0 : i32, i32
  }
  func.func @transform_4(%arg0: i32, %arg1: i32) -> (i32, i32) {
    %c0_i32 = arith.constant 0 : i32
    %c0_i32_0 = arith.constant 0 : i32
    %c0_i32_1 = arith.constant 0 : i32
    return %c0_i32, %c0_i32_0 : i32, i32
  }
  func.func @transform_5(%arg0: i32, %arg1: i32) -> (i32, i32) {
    %c0_i32 = arith.constant 0 : i32
    %c0_i32_0 = arith.constant 0 : i32
    %c0_i32_1 = arith.constant 0 : i32
    return %c0_i32, %c0_i32_0 : i32, i32
  }
  func.func @transform_6(%arg0: i32, %arg1: i32) -> (i32, i32) {
    %c0_i32 = arith.constant 0 : i32
    %c0_i32_0 = arith.constant 0 : i32
    return %arg0, %c0_i32 : i32, i32
  }
}

</mosaic_0001>

<bundles_post_ra>
// kernel: tpu_custom_call.1
= control target key start
LH: loop header
LB: loop body
LE: loop exit
PB: predicated region body
PF: predicated region fallthrough
CT: control target
= control target key end

     0   :  { %11 = vsyncpa [#allocation7], 0  ;;  %s6349_s0 = inlined_call_operand.hbm [shape: f32[8,8,512], index: 0, kind: input, shape index: {}]   ;;  %s6350_s1 = inlined_call_operand.hbm [shape: f32[128,512], index: 1, kind: input, shape index: {}]   ;;  %s6351_s2 = inlined_call_operand.hbm [shape: f32[256,512], index: 2, kind: input, shape index: {}]   ;;  %s6352_s3 = inlined_call_operand.vmem [shape: f32[1,512], index: 3, kind: input, shape index: {}]   ;;  %s6353_s4 = inlined_call_operand.vmem [shape: f32[128,4], index: 4, kind: input, shape index: {}]   ;;  %s6354_s5 = inlined_call_operand.vmem [shape: f32[1,4], index: 5, kind: input, shape index: {}]   ;;  %s6355_s6 = inlined_call_operand.vmem [shape: f32[8,4], index: 6, kind: output, shape index: {}]  }
   0x1   :  { %12 = vsyncpa [#allocation9], 0  ;;  %s5120_s21 = smov [#allocation8]   ;;  %s5121_s23 = smov [#allocation6]  }
   0x2   :  { %s30_s22 = sshll.u32 %s5120_s21, 4  ;;  %s18_s24 = sshll.u32 %s5121_s23, 4  ;;  %s31_s22 = int_to_ptr.vmem [resolvable:$true] %s30_s22  ;;  %s5163_s24 = int_to_ptr.vmem [resolvable:$true] %s18_s24 }
   0x3   :  { %s5050_s27 = scalar_lea.hbm %s6350_s1, 8192 }
   0x4   :  { %p5051_p0 = scmp.ne.s32.totalorder %s6350_s1, %s5050_s27  ;;  %p5054_p1 = scmp.lt.u32.totalorder %s5050_s27, %s6350_s1 }
   0x6   :  { %p5056_p2 = pnand %p5054_p1, %p5051_p0 }
   0x8   :  { %5059 = shalt.err (!%p5056_p2)
}
   0x9   :  { %s5060_s8 = scalar_lea.vmem %s31_s22, 8192  ;;  %p5065_p4 = scmp.lt.s32.totalorder %s31_s22, %s31_s22 }
   0xa   :  { %p5061_p3 = scmp.ne.s32.totalorder %s31_s22, %s5060_s8  ;;  %p5066_p5 = scmp.lt.s32.totalorder %s5060_s8, %s5060_s8 }
   0xc   :  { %p5067_p6 = por %p5066_p5, %p5065_p4 }
   0xe   :  { %p5068_p7 = pnand %p5067_p6, %p5061_p3 }
  0x10   :  { %5071 = shalt.err (!%p5068_p7)
}
  0x11   :  { %s5122_s9 = smov 512   ;;  %s5123_s10 = smov 32  }
  0x12   :  { %36 = dma.hbm_to_vmem [thread:$0]  %s6350_s1, 8192, %s31_s22, [#allocation9], %s5122_s9, %s5122_s9, %s5123_s10  }
  0x13   :  { %s5072_s15 = scalar_lea.hbm %s6349_s0, 4096 }
  0x14   :  { %p5073_p8 = scmp.ne.s32.totalorder %s6349_s0, %s5072_s15  ;;  %p5076_p9 = scmp.lt.u32.totalorder %s5072_s15, %s6349_s0 }
  0x16   :  { %p5078_p10 = pnand %p5076_p9, %p5073_p8 }
  0x18   :  { %5081 = shalt.err (!%p5078_p10)
}
  0x19   :  { %s5082_s20 = scalar_lea.vmem %s5163_s24, 4096  ;;  %p5087_p12 = scmp.lt.s32.totalorder %s5163_s24, %s5163_s24 }
  0x1a   :  { %p5083_p11 = scmp.ne.s32.totalorder %s5163_s24, %s5082_s20  ;;  %p5088_p13 = scmp.lt.s32.totalorder %s5082_s20, %s5082_s20 }
  0x1c   :  { %p5089_p0 = por %p5088_p13, %p5087_p12 }
  0x1e   :  { %p5090_p1 = pnand %p5089_p0, %p5083_p11 }
  0x20   :  { %5093 = shalt.err (!%p5090_p1)
}
  0x21   :  { %24 = dma.hbm_to_vmem [thread:$0]  %s6349_s0, 4096, %s5163_s24, [#allocation7], %s5122_s9, %s5122_s9, %s5123_s10  }
  0x22   :  { %s5124_s22 = smov [#allocation10]   ;;  %s5094_s27 = scalar_lea.hbm %s6351_s2, 16384 }
  0x23   :  { %s42_s23 = sshll.u32 %s5124_s22, 4  ;;  %p5095_p2 = scmp.ne.s32.totalorder %s6351_s2, %s5094_s27  ;;  %s43_s23 = int_to_ptr.vmem [resolvable:$true] %s42_s23 }
  0x24   :  { %p5098_p3 = scmp.lt.u32.totalorder %s5094_s27, %s6351_s2 }
  0x26   :  { %p5100_p4 = pnand %p5098_p3, %p5095_p2 }
  0x28   :  { %5103 = shalt.err (!%p5100_p4)
}
  0x29   :  { %s5104_s8 = scalar_lea.vmem %s43_s23, 16384  ;;  %p5109_p6 = scmp.lt.s32.totalorder %s43_s23, %s43_s23 }
  0x2a   :  { %p5105_p5 = scmp.ne.s32.totalorder %s43_s23, %s5104_s8  ;;  %p5110_p7 = scmp.lt.s32.totalorder %s5104_s8, %s5104_s8 }
  0x2c   :  { %p5111_p8 = por %p5110_p7, %p5109_p6 }
  0x2e   :  { %p5112_p9 = pnand %p5111_p8, %p5105_p5 }
  0x30   :  { %5115 = shalt.err (!%p5112_p9)
}
  0x31   :  { %48 = dma.hbm_to_vmem [thread:$0]  %s6351_s2, 16384, %s43_s23, [#allocation9], %s5122_s9, %s5122_s9, %s5123_s10  }
  0x32   :  { %5116 = dma.done.wait [#allocation7], 4096  }
  0x33   :  { %5117 = vsyncadd [#allocation7], 4294963200 }
  0x34   :  { %5118 = dma.done.wait [#allocation9], 24576  }
  0x35   :  { %5119 = vsyncadd [#allocation9], 4294942720  ;;  %v6356_v0 = vmov 0.0   ;;  %v73_v1 = vld [vmem:[#allocation8 + $0x8] sm:$0xff]  ;;  %v72_v3 = vld [vmem:[#allocation8] sm:$0xff]  ;;  %vm5127_vm0 = vmmov 0  }
  0x36   :  { %358 = vmatprep.mubr.f32.mxu0 %v6356_v0  ;;  %429 = vmatprep.mubr.f32.mxu1 %v6356_v0  ;;  %v77_v2 = vld [vmem:[#allocation8 + $0x28] sm:$0xff]  ;;  %v76_v5 = vld [vmem:[#allocation8 + $0x20] sm:$0xff]  ;;  %v75_v19 = vld [vmem:[#allocation8 + $0x18] sm:$0xff]  ;;  %vm3117_vm1 = vcmask 31744  }
  0x37   :  { %v5217_v4 = vpack.c.bf16 %v77_v2, %v73_v1  ;;  %v81_v6 = vld [vmem:[#allocation8 + $0x48] sm:$0xff]  ;;  %v5219_v8 = vpack.c.bf16 %v76_v5, %v72_v3  ;;  %v80_v10 = vld [vmem:[#allocation8 + $0x40] sm:$0xff]  ;;  %v79_v20 = vld [vmem:[#allocation8 + $0x38] sm:$0xff] }
  0x38   :  { %v85_v7 = vld [vmem:[#allocation8 + $0x68] sm:$0xff]  ;;  %v84_v11 = vld [vmem:[#allocation8 + $0x60] sm:$0xff]  ;;  %v5230_v22 = vpack.c.bf16 %v79_v20, %v75_v19  ;;  %v74_v23 = vld [vmem:[#allocation8 + $0x10] sm:$0xff] }
  0x39   :  { %6476 = vst [vmem:[#allocation13_spill] sm:$0xff] %v5217_v4  ;;  %v5221_v9 = vpack.c.bf16 %v85_v7, %v81_v6  ;;  %v89_v12 = vld [vmem:[#allocation8 + $0x88] sm:$0xff]  ;;  %3227 = vmatprep.subr.bf16.mxu0 %v5217_v4  ;;  %v5225_v14 = vpack.c.bf16 %v84_v11, %v80_v10  ;;  %v88_v15 = vld [vmem:[#allocation8 + $0x80] sm:$0xff]  ;;  %v78_v24 = vld [vmem:[#allocation8 + $0x30] sm:$0xff] }
  0x3a   :  { %v93_v13 = vld [vmem:[#allocation8 + $0xa8] sm:$0xff]  ;;  %3229 = vmatpush1.bf16.msra.mxu0 %v5219_v8  ;;  %v92_v16 = vld [vmem:[#allocation8 + $0xa0] sm:$0xff]  ;;  %6477 = vst [vmem:[#allocation14_spill] sm:$0xff] %v5230_v22  ;;  %v5232_v25 = vpack.c.bf16 %v78_v24, %v74_v23  ;;  %3259 = vmatprep.subr.bf16.mxu1 %v5230_v22  ;;  %v83_v27 = vld [vmem:[#allocation8 + $0x58] sm:$0xff] }
  0x3b   :  { %3231 = vmatprep.subr.bf16.mxu0 %v5221_v9  ;;  %v5228_v17 = vpack.c.bf16 %v93_v13, %v89_v12  ;;  %v97_v18 = vld [vmem:[#allocation8 + $0xc8] sm:$0xff]  ;;  %v5235_v26 = vpack.c.bf16 %v92_v16, %v88_v15  ;;  %v87_v28 = vld [vmem:[#allocation8 + $0x78] sm:$0xff]  ;;  %v82_v29 = vld [vmem:[#allocation8 + $0x50] sm:$0xff] }
  0x3c   :  { %v101_v21 = vld [vmem:[#allocation8 + $0xe8] sm:$0xff]  ;;  %v96_v31 = vld [vmem:[#allocation8 + $0xc0] sm:$0xff]  ;;  %3261 = vmatpush1.bf16.msra.mxu1 %v5232_v25  ;;  %v5242_v33 = vpack.c.bf16 %v87_v28, %v83_v27  ;;  %v86_v34 = vld [vmem:[#allocation8 + $0x70] sm:$0xff] }
  0x3d   :  { %v5239_v30 = vpack.c.bf16 %v101_v21, %v97_v18  ;;  %v100_v32 = vld [vmem:[#allocation8 + $0xe0] sm:$0xff]  ;;  %v105_v35 = vld [vmem:[#allocation8 + $0x108] sm:$0xff]  ;;  %v5244_v37 = vpack.c.bf16 %v86_v34, %v82_v29  ;;  %v91_v38 = vld [vmem:[#allocation8 + $0x98] sm:$0xff] }
  0x3e   :  { %3233 = vmatpush1.bf16.msra.mxu0 %v5225_v14  ;;  %v109_v36 = vld [vmem:[#allocation8 + $0x128] sm:$0xff]  ;;  %3263 = vmatprep.subr.bf16.mxu1 %v5242_v33  ;;  %v95_v39 = vld [vmem:[#allocation8 + $0xb8] sm:$0xff]  ;;  %v90_v40 = vld [vmem:[#allocation8 + $0x90] sm:$0xff]  ;;  %v5248_v42 = vpack.c.bf16 %v100_v32, %v96_v31 }
  0x3f   :  { %3235 = vmatprep.subr.bf16.mxu0 %v5228_v17  ;;  %v94_v41 = vld [vmem:[#allocation8 + $0xb0] sm:$0xff]  ;;  %v104_v43 = vld [vmem:[#allocation8 + $0x100] sm:$0xff]  ;;  %v5250_v45 = vpack.c.bf16 %v95_v39, %v91_v38  ;;  %v5253_v46 = vpack.c.bf16 %v109_v36, %v105_v35  ;;  %v113_v47 = vld [vmem:[#allocation8 + $0x148] sm:$0xff] }
  0x40   :  { %v108_v44 = vld [vmem:[#allocation8 + $0x120] sm:$0xff]  ;;  %3265 = vmatpush1.bf16.msra.mxu1 %v5244_v37  ;;  %v5256_v48 = vpack.c.bf16 %v94_v41, %v90_v40  ;;  %v99_v49 = vld [vmem:[#allocation8 + $0xd8] sm:$0xff]  ;;  %v117_v51 = vld [vmem:[#allocation8 + $0x168] sm:$0xff] }
  0x41   :  { %v103_v50 = vld [vmem:[#allocation8 + $0xf8] sm:$0xff]  ;;  %3267 = vmatprep.subr.bf16.mxu1 %v5250_v45  ;;  %v98_v53 = vld [vmem:[#allocation8 + $0xd0] sm:$0xff]  ;;  %v5262_v55 = vpack.c.bf16 %v108_v44, %v104_v43  ;;  %v5265_v58 = vpack.c.bf16 %v117_v51, %v113_v47  ;;  %v112_v59 = vld [vmem:[#allocation8 + $0x140] sm:$0xff] }
  0x42   :  { %3237 = vmatpush1.bf16.msra.mxu0 %v5235_v26  ;;  %v5259_v52 = vpack.c.bf16 %v103_v50, %v99_v49  ;;  %v102_v54 = vld [vmem:[#allocation8 + $0xf0] sm:$0xff]  ;;  %v107_v56 = vld [vmem:[#allocation8 + $0x118] sm:$0xff]  ;;  %v116_v60 = vld [vmem:[#allocation8 + $0x160] sm:$0xff] }
  0x43   :  { %3239 = vmatprep.subr.bf16.mxu0 %v5239_v30  ;;  %v111_v57 = vld [vmem:[#allocation8 + $0x138] sm:$0xff]  ;;  %v121_v61 = vld [vmem:[#allocation8 + $0x188] sm:$0xff]  ;;  %v5268_v62 = vpack.c.bf16 %v102_v54, %v98_v53  ;;  %v106_v2 = vld [vmem:[#allocation8 + $0x110] sm:$0xff]  ;;  %v5274_v7 = vpack.c.bf16 %v116_v60, %v112_v59 }
  0x44   :  { %3269 = vmatpush1.bf16.msra.mxu1 %v5256_v48  ;;  %v125_v63 = vld [vmem:[#allocation8 + $0x1a8] sm:$0xff]  ;;  %v5271_v1 = vpack.c.bf16 %v111_v57, %v107_v56  ;;  %v110_v3 = vld [vmem:[#allocation8 + $0x130] sm:$0xff]  ;;  %v115_v5 = vld [vmem:[#allocation8 + $0x158] sm:$0xff] }
  0x45   :  { %3271 = vmatprep.subr.bf16.mxu1 %v5259_v52  ;;  %v119_v6 = vld [vmem:[#allocation8 + $0x178] sm:$0xff]  ;;  %v5277_v10 = vpack.c.bf16 %v125_v63, %v121_v61  ;;  %v120_v11 = vld [vmem:[#allocation8 + $0x180] sm:$0xff]  ;;  %v129_v13 = vld [vmem:[#allocation8 + $0x1c8] sm:$0xff]  ;;  %v5280_v15 = vpack.c.bf16 %v110_v3, %v106_v2 }
  0x46   :  { %3241 = vmatpush1.bf16.msra.mxu0 %v5248_v42  ;;  %v124_v12 = vld [vmem:[#allocation8 + $0x1a0] sm:$0xff]  ;;  %v133_v16 = vld [vmem:[#allocation8 + $0x1e8] sm:$0xff]  ;;  %v5283_v18 = vpack.c.bf16 %v119_v6, %v115_v5  ;;  %v114_v19 = vld [vmem:[#allocation8 + $0x150] sm:$0xff] }
  0x47   :  { %3243 = vmatprep.subr.bf16.mxu0 %v5253_v46  ;;  %v118_v20 = vld [vmem:[#allocation8 + $0x170] sm:$0xff]  ;;  %v123_v21 = vld [vmem:[#allocation8 + $0x198] sm:$0xff]  ;;  %v5286_v24 = vpack.c.bf16 %v124_v12, %v120_v11  ;;  %v5289_v27 = vpack.c.bf16 %v133_v16, %v129_v13  ;;  %v128_v28 = vld [vmem:[#allocation8 + $0x1c0] sm:$0xff] }
  0x48   :  { %3273 = vmatpush1.bf16.msra.mxu1 %v5268_v62  ;;  %v127_v23 = vld [vmem:[#allocation8 + $0x1b8] sm:$0xff]  ;;  %v132_v29 = vld [vmem:[#allocation8 + $0x1e0] sm:$0xff]  ;;  %v5292_v31 = vpack.c.bf16 %v118_v20, %v114_v19  ;;  %v122_v32 = vld [vmem:[#allocation8 + $0x190] sm:$0xff] }
  0x49   :  { %3275 = vmatprep.subr.bf16.mxu1 %v5271_v1  ;;  %v5295_v34 = vpack.c.bf16 %v127_v23, %v123_v21  ;;  %v126_v35 = vld [vmem:[#allocation8 + $0x1b0] sm:$0xff]  ;;  %v137_v36 = vld [vmem:[#allocation10 + $0x8] sm:$0xff]  ;;  %v131_v39 = vld [vmem:[#allocation8 + $0x1d8] sm:$0xff]  ;;  %v5298_v41 = vpack.c.bf16 %v132_v29, %v128_v28 }
  0x4a   :  { %3245 = vmatpush1.bf16.msra.mxu0 %v5262_v55  ;;  %v141_v38 = vld [vmem:[#allocation10 + $0x28] sm:$0xff]  ;;  %v135_v40 = vld [vmem:[#allocation8 + $0x1f8] sm:$0xff]  ;;  %v5302_v43 = vpack.c.bf16 %v126_v35, %v122_v32  ;;  %v130_v44 = vld [vmem:[#allocation8 + $0x1d0] sm:$0xff] }
  0x4b   :  { %3247 = vmatprep.subr.bf16.mxu0 %v5265_v58  ;;  %v5304_v47 = vpack.c.bf16 %v141_v38, %v137_v36  ;;  %v136_v49 = vld [vmem:[#allocation10] sm:$0xff]  ;;  %v5307_v51 = vpack.c.bf16 %v135_v40, %v131_v39  ;;  %v134_v53 = vld [vmem:[#allocation8 + $0x1f0] sm:$0xff]  ;;  %v145_v54 = vld [vmem:[#allocation10 + $0x48] sm:$0xff] }
  0x4c   :  { %3277 = vmatpush1.bf16.msra.mxu1 %v5280_v15  ;;  %v140_v50 = vld [vmem:[#allocation10 + $0x20] sm:$0xff]  ;;  %v149_v56 = vld [vmem:[#allocation10 + $0x68] sm:$0xff]  ;;  %v139_v57 = vld [vmem:[#allocation10 + $0x18] sm:$0xff]  ;;  %v5313_v61 = vpack.c.bf16 %v134_v53, %v130_v44 }
  0x4d   :  { %3279 = vmatprep.subr.bf16.mxu1 %v5283_v18  ;;  %v143_v59 = vld [vmem:[#allocation10 + $0x38] sm:$0xff]  ;;  %v5310_v60 = vpack.c.bf16 %v140_v50, %v136_v49  ;;  %v138_v63 = vld [vmem:[#allocation10 + $0x10] sm:$0xff]  ;;  %v5316_v2 = vpack.c.bf16 %v149_v56, %v145_v54  ;;  %v144_v3 = vld [vmem:[#allocation10 + $0x40] sm:$0xff] }
  0x4e   :  { %3249 = vmatpush1.bf16.msra.mxu0 %v5274_v7  ;;  %v148_v5 = vld [vmem:[#allocation10 + $0x60] sm:$0xff]  ;;  %v5319_v6 = vpack.c.bf16 %v143_v59, %v139_v57  ;;  %v142_v11 = vld [vmem:[#allocation10 + $0x30] sm:$0xff]  ;;  %v153_v12 = vld [vmem:[#allocation10 + $0x88] sm:$0xff] }
  0x4f   :  { %3251 = vmatprep.subr.bf16.mxu0 %v5277_v10  ;;  %v157_v13 = vld [vmem:[#allocation10 + $0xa8] sm:$0xff]  ;;  %v147_v16 = vld [vmem:[#allocation10 + $0x58] sm:$0xff]  ;;  %v5323_v20 = vpack.c.bf16 %v148_v5, %v144_v3  ;;  %v5327_v21 = vpack.c.bf16 %v142_v11, %v138_v63  ;;  %v146_v23 = vld [vmem:[#allocation10 + $0x50] sm:$0xff] }
  0x50   :  { %3281 = vmatpush1.bf16.msra.mxu1 %v5292_v31  ;;  %v151_v19 = vld [vmem:[#allocation10 + $0x78] sm:$0xff]  ;;  %v5330_v28 = vpack.c.bf16 %v157_v13, %v153_v12  ;;  %v152_v29 = vld [vmem:[#allocation10 + $0x80] sm:$0xff]  ;;  %v150_v36 = vld [vmem:[#allocation10 + $0x70] sm:$0xff] }
  0x51   :  { %3283 = vmatprep.subr.bf16.mxu1 %v5295_v34  ;;  %v156_v32 = vld [vmem:[#allocation10 + $0xa0] sm:$0xff]  ;;  %v5333_v35 = vpack.c.bf16 %v151_v19, %v147_v16  ;;  %v161_v38 = vld [vmem:[#allocation10 + $0xc8] sm:$0xff]  ;;  %v155_v40 = vld [vmem:[#allocation10 + $0x98] sm:$0xff]  ;;  %v5340_v50 = vpack.c.bf16 %v150_v36, %v146_v23 }
  0x52   :  { %3253 = vmatpush1.bf16.msra.mxu0 %v5286_v24  ;;  %v165_v39 = vld [vmem:[#allocation10 + $0xe8] sm:$0xff]  ;;  %v159_v44 = vld [vmem:[#allocation10 + $0xb8] sm:$0xff]  ;;  %v5337_v49 = vpack.c.bf16 %v156_v32, %v152_v29  ;;  %v154_v53 = vld [vmem:[#allocation10 + $0x90] sm:$0xff] }
  0x53   :  { %3255 = vmatprep.subr.bf16.mxu0 %v5289_v27  ;;  %v5343_v54 = vpack.c.bf16 %v165_v39, %v161_v38  ;;  %v160_v56 = vld [vmem:[#allocation10 + $0xc0] sm:$0xff]  ;;  %v5346_v59 = vpack.c.bf16 %v159_v44, %v155_v40  ;;  %v158_v63 = vld [vmem:[#allocation10 + $0xb0] sm:$0xff]  ;;  %v169_v3 = vld [vmem:[#allocation10 + $0x108] sm:$0xff] }
  0x54   :  { %3285 = vmatpush1.bf16.msra.mxu1 %v5302_v43  ;;  %v164_v57 = vld [vmem:[#allocation10 + $0xe0] sm:$0xff]  ;;  %v173_v5 = vld [vmem:[#allocation10 + $0x128] sm:$0xff]  ;;  %v163_v11 = vld [vmem:[#allocation10 + $0xd8] sm:$0xff]  ;;  %v5353_v16 = vpack.c.bf16 %v158_v63, %v154_v53 }
  0x55   :  { %3287 = vmatprep.subr.bf16.mxu1 %v5307_v51  ;;  %6478 = vst [vmem:[#allocation15_spill] sm:$0xff] %v5343_v54  ;;  %v167_v12 = vld [vmem:[#allocation10 + $0xf8] sm:$0xff]  ;;  %v5350_v13 = vpack.c.bf16 %v164_v57, %v160_v56  ;;  %v5356_v19 = vpack.c.bf16 %v173_v5, %v169_v3  ;;  %v168_v23 = vld [vmem:[#allocation10 + $0x100] sm:$0xff]  ;;  %v162_v36 = vld [vmem:[#allocation10 + $0xd0] sm:$0xff] }
  0x56   :  { %3257 = vmatpush1.bf16.msra.mxu0 %v5298_v41  ;;  %6480 = vst [vmem:[#allocation17_spill] sm:$0xff] %v5353_v16  ;;  %v172_v29 = vld [vmem:[#allocation10 + $0x120] sm:$0xff]  ;;  %v5359_v32 = vpack.c.bf16 %v167_v12, %v163_v11  ;;  %v166_v38 = vld [vmem:[#allocation10 + $0xf0] sm:$0xff]  ;;  %v171_v39 = vld [vmem:[#allocation10 + $0x118] sm:$0xff] }
  0x57   :  { %3291 = vmatprep.subr.bf16.mxu0 %v5304_v47  ;;  %6479 = vst [vmem:[#allocation16_spill] sm:$0xff] %v5350_v13  ;;  %6481 = vst [vmem:[#allocation18_spill] sm:$0xff] %v5356_v19  ;;  %v175_v40 = vld [vmem:[#allocation10 + $0x138] sm:$0xff]  ;;  %v5362_v44 = vpack.c.bf16 %v172_v29, %v168_v23  ;;  %v5365_v53 = vpack.c.bf16 %v166_v38, %v162_v36  ;;  %v170_v57 = vld [vmem:[#allocation10 + $0x110] sm:$0xff] }
  0x58   :  { %3289 = vmatpush1.bf16.msra.mxu1 %v5313_v61  ;;  %6482 = vst [vmem:[#allocation19_spill] sm:$0xff] %v5359_v32  ;;  %v5369_v56 = vpack.c.bf16 %v175_v40, %v171_v39  ;;  %v174_v63 = vld [vmem:[#allocation10 + $0x130] sm:$0xff]  ;;  %v177_v5 = vld [vmem:[#allocation10 + $0x148] sm:$0xff]  ;;  %v179_v12 = vld [vmem:[#allocation10 + $0x158] sm:$0xff] }
  0x59   :  { %359 = vmatmul.mubr.f32.vlgmr.msra.gmra.mrb[0].mxu0 %v6356_v0  ;;  %3355 = vmatprep.subr.bf16.mxu1 %v5319_v6  ;;  %6483 = vst [vmem:[#allocation20_spill] sm:$0xff] %v5362_v44  ;;  %6484 = vst [vmem:[#allocation21_spill] sm:$0xff] %v5365_v53  ;;  %v5373_v3 = vpack.c.bf16 %v174_v63, %v170_v57  ;;  %v181_v11 = vld [vmem:[#allocation10 + $0x168] sm:$0xff]  ;;  %v183_v29 = vld [vmem:[#allocation10 + $0x178] sm:$0xff] }
  0x5a   :  { %3293 = vmatpush1.bf16.msra.mxu0 %v5310_v60  ;;  %528 = vmatprep.mubr.f32.mxu0 %v6356_v0  ;;  %6485 = vst [vmem:[#allocation22_spill] sm:$0xff] %v5369_v56  ;;  %v5377_v23 = vpack.c.bf16 %v181_v11, %v177_v5  ;;  %v176_v36 = vld [vmem:[#allocation10 + $0x140] sm:$0xff]  ;;  %v5379_v39 = vpack.c.bf16 %v183_v29, %v179_v12  ;;  %v185_v63 = vld [vmem:[#allocation10 + $0x188] sm:$0xff]  ;;  %v187_v11 = vld [vmem:[#allocation10 + $0x198] sm:$0xff] }
  0x5b   :  { %3295 = vmatprep.subr.bf16.mxu0 %v5316_v2  ;;  %430 = vmatmul.mubr.f32.vlgmr.msra.gmra.mrb[0].mxu1 %v6356_v0  ;;  %6486 = vst [vmem:[#allocation23_spill] sm:$0xff] %v5373_v3  ;;  %v180_v38 = vld [vmem:[#allocation10 + $0x160] sm:$0xff]  ;;  %v189_v5 = vld [vmem:[#allocation10 + $0x1a8] sm:$0xff]  ;;  %v191_v12 = vld [vmem:[#allocation10 + $0x1b8] sm:$0xff] }
  0x5c   :  { %3357 = vmatpush1.bf16.msra.mxu1 %v5327_v21  ;;  %599 = vmatprep.mubr.f32.mxu1 %v6356_v0  ;;  %6487 = vst [vmem:[#allocation24_spill] sm:$0xff] %v5377_v23  ;;  %6488 = vst [vmem:[#allocation25_spill] sm:$0xff] %v5379_v39  ;;  %v5381_v40 = vpack.c.bf16 %v180_v38, %v176_v36  ;;  %v178_v0 = vld [vmem:[#allocation10 + $0x150] sm:$0xff]  ;;  %v184_v29 = vld [vmem:[#allocation10 + $0x180] sm:$0xff]  ;;  %v5391_v38 = vpack.c.bf16 %v191_v12, %v187_v11 }
  0x5d   :  { %3359 = vmatprep.subr.bf16.mxu1 %v5333_v35  ;;  %v188_v36 = vld [vmem:[#allocation10 + $0x1a0] sm:$0xff]  ;;  %v199_v11 = vld [vmem:[#allocation10 + $0x1f8] sm:$0xff] }
  0x5e   :  { %3297 = vmatpush1.bf16.msra.mxu0 %v5323_v20  ;;  %6489 = vst [vmem:[#allocation26_spill] sm:$0xff] %v5381_v40  ;;  %6492 = vst [vmem:[#allocation29_spill] sm:$0xff] %v5391_v38  ;;  %v192_v12 = vld [vmem:[#allocation10 + $0x1c0] sm:$0xff] }
  0x5f   :  { %3299 = vmatprep.subr.bf16.mxu0 %v5330_v28 }
  0x60   :  { %3361 = vmatpush1.bf16.msra.mxu1 %v5340_v50 }
  0x61   :  { %3363 = vmatprep.subr.bf16.mxu1 %v5346_v59 }
  0x62   :  { %3301 = vmatpush1.bf16.msra.mxu0 %v5337_v49 }
  0x63   :  { %3303 = vmatprep.subr.bf16.mxu0 %v5343_v54 }
  0x64   :  { %3365 = vmatpush1.bf16.msra.mxu1 %v5353_v16 }
  0x65   :  { %3367 = vmatprep.subr.bf16.mxu1 %v5359_v32 }
  0x66   :  { %3305 = vmatpush1.bf16.msra.mxu0 %v5350_v13 }
  0x67   :  { %3307 = vmatprep.subr.bf16.mxu0 %v5356_v19  ;;  %v253_v19 = vld [vmem:[#allocation10 + $0x3a8] sm:$0xff] }
  0x68   :  { %3369 = vmatpush1.bf16.msra.mxu1 %v5365_v53  ;;  %v248_v53 = vld [vmem:[#allocation10 + $0x380] sm:$0xff] }
  0x69   :  { %3371 = vmatprep.subr.bf16.mxu1 %v5369_v56  ;;  %v5393_v56 = vpack.c.bf16 %v188_v36, %v184_v29  ;;  %v196_v29 = vld [vmem:[#allocation10 + $0x1e0] sm:$0xff] }
  0x6a   :  { %3309 = vmatpush1.bf16.msra.mxu0 %v5362_v44  ;;  %v182_v44 = vld [vmem:[#allocation10 + $0x170] sm:$0xff] }
  0x6b   :  { %3311 = vmatprep.subr.bf16.mxu0 %v5377_v23  ;;  %v5384_v57 = vpack.c.bf16 %v182_v44, %v178_v0  ;;  %6493 = vst [vmem:[#allocation30_spill] sm:$0xff] %v5393_v56  ;;  %v186_v0 = vld [vmem:[#allocation10 + $0x190] sm:$0xff]  ;;  %v5405_v23 = vpack.c.bf16 %v196_v29, %v192_v12  ;;  %v204_v12 = vld [vmem:[#allocation10 + $0x220] sm:$0xff] }
  0x6c   :  { %3373 = vmatpush1.bf16.msra.mxu1 %v5373_v3  ;;  %v5389_v3 = vpack.c.bf16 %v189_v5, %v185_v63  ;;  %v190_v44 = vld [vmem:[#allocation10 + $0x1b0] sm:$0xff]  ;;  %v197_v63 = vld [vmem:[#allocation10 + $0x1e8] sm:$0xff]  ;;  %v195_v5 = vld [vmem:[#allocation10 + $0x1d8] sm:$0xff] }
  0x6d   :  { %6490 = vst [vmem:[#allocation27_spill] sm:$0xff] %v5384_v57  ;;  %3375 = vmatprep.subr.bf16.mxu1 %v5379_v39  ;;  %v5396_v39 = vpack.c.bf16 %v190_v44, %v186_v0  ;;  %v5403_v36 = vpack.c.bf16 %v199_v11, %v195_v5  ;;  %6497 = vst [vmem:[#allocation34_spill] sm:$0xff] %v5405_v23  ;;  %v194_v0 = vld [vmem:[#allocation10 + $0x1d0] sm:$0xff]  ;;  %v207_v5 = vld [vmem:[#allocation10 + $0x238] sm:$0xff] }
  0x6e   :  { %3313 = vmatpush1.bf16.msra.mxu0 %v5381_v40  ;;  %6491 = vst [vmem:[#allocation28_spill] sm:$0xff] %v5389_v3  ;;  %v198_v44 = vld [vmem:[#allocation10 + $0x1f0] sm:$0xff]  ;;  %v200_v11 = vld [vmem:[#allocation10 + $0x200] sm:$0xff] }
  0x6f   :  { %3315 = vmatprep.subr.bf16.mxu0 %v5389_v3  ;;  %6494 = vst [vmem:[#allocation31_spill] sm:$0xff] %v5396_v39  ;;  %6496 = vst [vmem:[#allocation33_spill] sm:$0xff] %v5403_v36  ;;  %v5417_v3 = vpack.c.bf16 %v204_v12, %v200_v11  ;;  %v208_v11 = vld [vmem:[#allocation10 + $0x240] sm:$0xff] }
  0x70   :  { %3377 = vmatpush1.bf16.msra.mxu1 %v5384_v57  ;;  %v193_v57 = vld [vmem:[#allocation10 + $0x1c8] sm:$0xff]  ;;  %v212_v12 = vld [vmem:[#allocation10 + $0x260] sm:$0xff] }
  0x71   :  { %3379 = vmatprep.subr.bf16.mxu1 %v5391_v38  ;;  %v5401_v40 = vpack.c.bf16 %v197_v63, %v193_v57  ;;  %v5408_v38 = vpack.c.bf16 %v198_v44, %v194_v0  ;;  %v205_v57 = vld [vmem:[#allocation10 + $0x228] sm:$0xff]  ;;  %v203_v63 = vld [vmem:[#allocation10 + $0x218] sm:$0xff]  ;;  %6501 = vst [vmem:[#allocation38_spill] sm:$0xff] %v5417_v3  ;;  %v202_v0 = vld [vmem:[#allocation10 + $0x210] sm:$0xff] }
  0x72   :  { %3317 = vmatpush1.bf16.msra.mxu0 %v5393_v56  ;;  %v5415_v29 = vpack.c.bf16 %v207_v5, %v203_v63  ;;  %v206_v44 = vld [vmem:[#allocation10 + $0x230] sm:$0xff] }
  0x73   :  { %6495 = vst [vmem:[#allocation32_spill] sm:$0xff] %v5401_v40  ;;  %3319 = vmatprep.subr.bf16.mxu0 %v5401_v40  ;;  %6498 = vst [vmem:[#allocation35_spill] sm:$0xff] %v5408_v38  ;;  %v210_v40 = vld [vmem:[#allocation10 + $0x250] sm:$0xff] }
  0x74   :  { %3381 = vmatpush1.bf16.msra.mxu1 %v5396_v39  ;;  %v201_v39 = vld [vmem:[#allocation10 + $0x208] sm:$0xff]  ;;  %6500 = vst [vmem:[#allocation37_spill] sm:$0xff] %v5415_v29 }
  0x75   :  { %3383 = vmatprep.subr.bf16.mxu1 %v5403_v36  ;;  %v5413_v56 = vpack.c.bf16 %v205_v57, %v201_v39  ;;  %v5420_v36 = vpack.c.bf16 %v206_v44, %v202_v0  ;;  %v213_v39 = vld [vmem:[#allocation10 + $0x268] sm:$0xff]  ;;  %v211_v57 = vld [vmem:[#allocation10 + $0x258] sm:$0xff]  ;;  %v214_v0 = vld [vmem:[#allocation10 + $0x270] sm:$0xff] }
  0x76   :  { %3321 = vmatpush1.bf16.msra.mxu0 %v5405_v23  ;;  %v215_v23 = vld [vmem:[#allocation10 + $0x278] sm:$0xff]  ;;  %v5433_v44 = vpack.c.bf16 %v214_v0, %v210_v40  ;;  %v225_v0 = vld [vmem:[#allocation10 + $0x2c8] sm:$0xff] }
  0x77   :  { %6499 = vst [vmem:[#allocation36_spill] sm:$0xff] %v5413_v56  ;;  %3323 = vmatprep.subr.bf16.mxu0 %v5413_v56  ;;  %6502 = vst [vmem:[#allocation39_spill] sm:$0xff] %v5420_v36  ;;  %v5427_v5 = vpack.c.bf16 %v215_v23, %v211_v57  ;;  %v5429_v56 = vpack.c.bf16 %v212_v12, %v208_v11  ;;  %v223_v23 = vld [vmem:[#allocation10 + $0x2b8] sm:$0xff]  ;;  %v220_v57 = vld [vmem:[#allocation10 + $0x2a0] sm:$0xff] }
  0x78   :  { %3385 = vmatpush1.bf16.msra.mxu1 %v5408_v38  ;;  %v209_v38 = vld [vmem:[#allocation10 + $0x248] sm:$0xff]  ;;  %6506 = vst [vmem:[#allocation43_spill] sm:$0xff] %v5433_v44 }
  0x79   :  { %3387 = vmatprep.subr.bf16.mxu1 %v5415_v29  ;;  %v5425_v63 = vpack.c.bf16 %v213_v39, %v209_v38  ;;  %6504 = vst [vmem:[#allocation41_spill] sm:$0xff] %v5427_v5  ;;  %6505 = vst [vmem:[#allocation42_spill] sm:$0xff] %v5429_v56  ;;  %v219_v29 = vld [vmem:[#allocation10 + $0x298] sm:$0xff]  ;;  %v216_v39 = vld [vmem:[#allocation10 + $0x280] sm:$0xff] }
  0x7a   :  { %3325 = vmatpush1.bf16.msra.mxu0 %v5417_v3  ;;  %v221_v3 = vld [vmem:[#allocation10 + $0x2a8] sm:$0xff]  ;;  %v5439_v11 = vpack.c.bf16 %v223_v23, %v219_v29  ;;  %v5441_v12 = vpack.c.bf16 %v220_v57, %v216_v39  ;;  %v224_v29 = vld [vmem:[#allocation10 + $0x2c0] sm:$0xff] }
  0x7b   :  { %6503 = vst [vmem:[#allocation40_spill] sm:$0xff] %v5425_v63  ;;  %3327 = vmatprep.subr.bf16.mxu0 %v5425_v63  ;;  %v218_v63 = vld [vmem:[#allocation10 + $0x290] sm:$0xff]  ;;  %v228_v23 = vld [vmem:[#allocation10 + $0x2e0] sm:$0xff] }
  0x7c   :  { %3389 = vmatpush1.bf16.msra.mxu1 %v5420_v36  ;;  %v217_v36 = vld [vmem:[#allocation10 + $0x288] sm:$0xff]  ;;  %6508 = vst [vmem:[#allocation45_spill] sm:$0xff] %v5439_v11  ;;  %6509 = vst [vmem:[#allocation46_spill] sm:$0xff] %v5441_v12  ;;  %v5453_v57 = vpack.c.bf16 %v228_v23, %v224_v29 }
  0x7d   :  { %3391 = vmatprep.subr.bf16.mxu1 %v5427_v5  ;;  %v5436_v38 = vpack.c.bf16 %v221_v3, %v217_v36  ;;  %v222_v5 = vld [vmem:[#allocation10 + $0x2b0] sm:$0xff]  ;;  %v229_v3 = vld [vmem:[#allocation10 + $0x2e8] sm:$0xff]  ;;  %v227_v36 = vld [vmem:[#allocation10 + $0x2d8] sm:$0xff] }
  0x7e   :  { %3329 = vmatpush1.bf16.msra.mxu0 %v5429_v56  ;;  %v5444_v40 = vpack.c.bf16 %v222_v5, %v218_v63  ;;  %v5448_v56 = vpack.c.bf16 %v229_v3, %v225_v0  ;;  %6513 = vst [vmem:[#allocation50_spill] sm:$0xff] %v5453_v57  ;;  %v226_v63 = vld [vmem:[#allocation10 + $0x2d0] sm:$0xff]  ;;  %v237_v0 = vld [vmem:[#allocation10 + $0x328] sm:$0xff]  ;;  %v235_v3 = vld [vmem:[#allocation10 + $0x318] sm:$0xff] }
  0x7f   :  { %6507 = vst [vmem:[#allocation44_spill] sm:$0xff] %v5436_v38  ;;  %3331 = vmatprep.subr.bf16.mxu0 %v5436_v38  ;;  %v230_v5 = vld [vmem:[#allocation10 + $0x2f0] sm:$0xff] }
  0x80   :  { %3393 = vmatpush1.bf16.msra.mxu1 %v5433_v44  ;;  %6510 = vst [vmem:[#allocation47_spill] sm:$0xff] %v5444_v40  ;;  %6511 = vst [vmem:[#allocation48_spill] sm:$0xff] %v5448_v56  ;;  %v231_v44 = vld [vmem:[#allocation10 + $0x2f8] sm:$0xff] }
  0x81   :  { %3395 = vmatprep.subr.bf16.mxu1 %v5439_v11  ;;  %v5451_v39 = vpack.c.bf16 %v231_v44, %v227_v36  ;;  %v5456_v11 = vpack.c.bf16 %v230_v5, %v226_v63  ;;  %v232_v44 = vld [vmem:[#allocation10 + $0x300] sm:$0xff]  ;;  %v234_v63 = vld [vmem:[#allocation10 + $0x310] sm:$0xff] }
  0x82   :  { %3333 = vmatpush1.bf16.msra.mxu0 %v5441_v12  ;;  %v233_v12 = vld [vmem:[#allocation10 + $0x308] sm:$0xff]  ;;  %v236_v36 = vld [vmem:[#allocation10 + $0x320] sm:$0xff]  ;;  %v238_v5 = vld [vmem:[#allocation10 + $0x330] sm:$0xff] }
  0x83   :  { %6512 = vst [vmem:[#allocation49_spill] sm:$0xff] %v5451_v39  ;;  %3335 = vmatprep.subr.bf16.mxu0 %v5448_v56  ;;  %6514 = vst [vmem:[#allocation51_spill] sm:$0xff] %v5456_v11  ;;  %v5460_v38 = vpack.c.bf16 %v237_v0, %v233_v12  ;;  %v5465_v23 = vpack.c.bf16 %v236_v36, %v232_v44  ;;  %v245_v12 = vld [vmem:[#allocation10 + $0x368] sm:$0xff]  ;;  %v243_v0 = vld [vmem:[#allocation10 + $0x358] sm:$0xff] }
  0x84   :  { %3397 = vmatpush1.bf16.msra.mxu1 %v5444_v40  ;;  %v239_v40 = vld [vmem:[#allocation10 + $0x338] sm:$0xff] }
  0x85   :  { %3399 = vmatprep.subr.bf16.mxu1 %v5451_v39  ;;  %6515 = vst [vmem:[#allocation52_spill] sm:$0xff] %v5460_v38  ;;  %v5463_v29 = vpack.c.bf16 %v239_v40, %v235_v3  ;;  %6517 = vst [vmem:[#allocation54_spill] sm:$0xff] %v5465_v23  ;;  %v5468_v39 = vpack.c.bf16 %v238_v5, %v234_v63  ;;  %v240_v40 = vld [vmem:[#allocation10 + $0x340] sm:$0xff]  ;;  %v242_v63 = vld [vmem:[#allocation10 + $0x350] sm:$0xff] }
  0x86   :  { %3337 = vmatpush1.bf16.msra.mxu0 %v5453_v57  ;;  %v241_v57 = vld [vmem:[#allocation10 + $0x348] sm:$0xff]  ;;  %v244_v3 = vld [vmem:[#allocation10 + $0x360] sm:$0xff]  ;;  %v246_v5 = vld [vmem:[#allocation10 + $0x370] sm:$0xff] }
  0x87   :  { %6516 = vst [vmem:[#allocation53_spill] sm:$0xff] %v5463_v29  ;;  %3339 = vmatprep.subr.bf16.mxu0 %v5460_v38  ;;  %6518 = vst [vmem:[#allocation55_spill] sm:$0xff] %v5468_v39  ;;  %v5472_v56 = vpack.c.bf16 %v245_v12, %v241_v57  ;;  %v5477_v36 = vpack.c.bf16 %v244_v3, %v240_v40  ;;  %v249_v38 = vld [vmem:[#allocation10 + $0x388] sm:$0xff]  ;;  %v255_v12 = vld [vmem:[#allocation10 + $0x3b8] sm:$0xff] }
  0x88   :  { %3401 = vmatpush1.bf16.msra.mxu1 %v5456_v11  ;;  %v247_v11 = vld [vmem:[#allocation10 + $0x378] sm:$0xff]  ;;  %v5483_v57 = vpack.c.bf16 %v253_v19, %v249_v38  ;;  %v250_v40 = vld [vmem:[#allocation10 + $0x390] sm:$0xff]  ;;  %v261_v19 = vld [vmem:[#allocation10 + $0x3e8] sm:$0xff] }
  0x89   :  { %3403 = vmatprep.subr.bf16.mxu1 %v5463_v29  ;;  %6519 = vst [vmem:[#allocation56_spill] sm:$0xff] %v5472_v56  ;;  %v5475_v44 = vpack.c.bf16 %v247_v11, %v243_v0  ;;  %6521 = vst [vmem:[#allocation58_spill] sm:$0xff] %v5477_v36  ;;  %v5480_v29 = vpack.c.bf16 %v246_v5, %v242_v63  ;;  %v254_v3 = vld [vmem:[#allocation10 + $0x3b0] sm:$0xff]  ;;  %v257_v63 = vld [vmem:[#allocation10 + $0x3c8] sm:$0xff] }
  0x8a   :  { %3341 = vmatpush1.bf16.msra.mxu0 %v5465_v23  ;;  %v251_v23 = vld [vmem:[#allocation10 + $0x398] sm:$0xff]  ;;  %6523 = vst [vmem:[#allocation60_spill] sm:$0xff] %v5483_v57  ;;  %v5492_v5 = vpack.c.bf16 %v254_v3, %v250_v40  ;;  %v291_v3 = vld [vmem:[#allocation6 + $0x8] sm:$0xff] }
  0x8b   :  { %6520 = vst [vmem:[#allocation57_spill] sm:$0xff] %v5475_v44  ;;  %3343 = vmatprep.subr.bf16.mxu0 %v5472_v56  ;;  %6522 = vst [vmem:[#allocation59_spill] sm:$0xff] %v5480_v29  ;;  %v5486_v11 = vpack.c.bf16 %v255_v12, %v251_v23  ;;  %v259_v38 = vld [vmem:[#allocation10 + $0x3d8] sm:$0xff]  ;;  %v5495_v56 = vpack.c.bf16 %v261_v19, %v257_v63  ;;  %v258_v12 = vld [vmem:[#allocation10 + $0x3d0] sm:$0xff] }
  0x8c   :  { %3405 = vmatpush1.bf16.msra.mxu1 %v5468_v39  ;;  %v252_v39 = vld [vmem:[#allocation10 + $0x3a0] sm:$0xff]  ;;  %6526 = vst [vmem:[#allocation63_spill] sm:$0xff] %v5492_v5 }
  0x8d   :  { %3407 = vmatprep.subr.bf16.mxu1 %v5475_v44  ;;  %6524 = vst [vmem:[#allocation61_spill] sm:$0xff] %v5486_v11  ;;  %v5488_v0 = vpack.c.bf16 %v252_v39, %v248_v53  ;;  %v263_v44 = vld [vmem:[#allocation10 + $0x3f8] sm:$0xff]  ;;  %6527 = vst [vmem:[#allocation64_spill] sm:$0xff] %v5495_v56  ;;  %v256_v53 = vld [vmem:[#allocation10 + $0x3c0] sm:$0xff] }
  0x8e   :  { %3345 = vmatpush1.bf16.msra.mxu0 %v5477_v36  ;;  %v5497_v23 = vpack.c.bf16 %v263_v44, %v259_v38  ;;  %v260_v39 = vld [vmem:[#allocation10 + $0x3e0] sm:$0xff]  ;;  %v262_v36 = vld [vmem:[#allocation10 + $0x3f0] sm:$0xff] }
  0x8f   :  { %6525 = vst [vmem:[#allocation62_spill] sm:$0xff] %v5488_v0  ;;  %3347 = vmatprep.subr.bf16.mxu0 %v5483_v57  ;;  %v5504_v40 = vpack.c.bf16 %v262_v36, %v258_v12  ;;  %v290_v44 = vld [vmem:[#allocation6] sm:$0xff]  ;;  %v293_v36 = vld [vmem:[#allocation6 + $0x18] sm:$0xff] }
  0x90   :  { %3409 = vmatpush1.bf16.msra.mxu1 %v5480_v29  ;;  %6528 = vst [vmem:[#allocation65_spill] sm:$0xff] %v5497_v23  ;;  %v5500_v29 = vpack.c.bf16 %v260_v39, %v256_v53 }
  0x91   :  { %3411 = vmatprep.subr.bf16.mxu1 %v5486_v11  ;;  %6530 = vst [vmem:[#allocation67_spill] sm:$0xff] %v5504_v40 }
  0x92   :  { %3349 = vmatpush1.bf16.msra.mxu0 %v5488_v0  ;;  %6529 = vst [vmem:[#allocation66_spill] sm:$0xff] %v5500_v29 }
  0x93   :  { %3351 = vmatprep.subr.bf16.mxu0 %v5495_v56 }
  0x94   :  { %3413 = vmatpush1.bf16.msra.mxu1 %v5492_v5  ;;  %v292_v5 = vld [vmem:[#allocation6 + $0x10] sm:$0xff] }
  0x95   :  { %3415 = vmatprep.subr.bf16.mxu1 %v5497_v23 }
  0x96   :  { %3353 = vmatpush1.bf16.msra.mxu0 %v5500_v29 }
  0x97   :  { %3419 = vmatprep.subr.bf16.mxu0 %v5217_v4 }
  0x98   :  { %3417 = vmatpush1.bf16.msra.mxu1 %v5504_v40 }
  0x99   :  { %3451 = vmatprep.subr.bf16.mxu1 %v5230_v22 }
 0x12c   :  { %v360_v63 = vpop.f32.mrb[0].mxu0 }
 0x12d   :  { %v436_v19 = vadd.f32 %v360_v63, %v290_v44  ;;  %v362_v38 = vpop.f32.mrb[1].mxu0 }
 0x12e   :  { %v437_v53 = vadd.f32 %v362_v38, %v291_v3  ;;  %v431_v12 = vpop.f32.mrb[0].mxu1 }
 0x12f   :  { %v3125_v39 = vmul.f32 -1.442695, %v436_v19  ;;  %v433_v23 = vpop.f32.mrb[1].mxu1  ;;  %v438_v0 = vadd.f32 %v431_v12, %v292_v5  ;;  %v6538_v12 = vld [vmem:[#allocation25_spill] sm:$0xff] }
 0x130   :  { %v3126_v56 = vmul.f32 -1.442695, %v437_v53  ;;  %v439_v29 = vadd.f32 %v433_v23, %v293_v36  ;;  %v6537_v36 = vld [vmem:[#allocation24_spill] sm:$0xff] }
 0x131   :  { %4794 = vpow2.f32 %v3125_v39 }
 0x132   :  { %4796 = vpow2.f32 %v3126_v56  ;;  %v3127_v40 = vmul.f32 -1.442695, %v439_v29 }
 0x134   :  { %4798 = vpow2.f32 %v3127_v40  ;;  %v6536_v40 = vld [vmem:[#allocation23_spill] sm:$0xff] }
 0x135   :  { %4800 = vtanh.f32 %v438_v0  ;;  %v6535_v0 = vld [vmem:[#allocation20_spill] sm:$0xff] }
 0x13b   :  { %v4795_v4 = vpop.eup %4794 }
 0x13c   :  { %v4797_v22 = vpop.eup %4796  ;;  %v443_v11 = vadd.f32 1.0, %v4795_v4  ;;  %v6531_v4 = vmov 0.0  }
 0x13d   :  { %v449_v57 = vadd.f32 1.0, %v4797_v22  ;;  %v6532_v22 = vld [vmem:[#allocation21_spill] sm:$0xff] }
 0x13e   :  { %4802 = vrcp.f32 %v443_v11  ;;  %v4799_v44 = vpop.eup %4798  ;;  %v6534_v11 = vld [vmem:[#allocation22_spill] sm:$0xff] }
 0x13f   :  { %4804 = vrcp.f32 %v449_v57  ;;  %v4801_v3 = vpop.eup %4800  ;;  %v456_v19 = vadd.f32 1.0, %v4799_v44  ;;  %v6533_v57 = vld [vmem:[#allocation18_spill] sm:$0xff] }
 0x140   :  { %v6539_v44 = vld [vmem:[#allocation26_spill] sm:$0xff] }
 0x141   :  { %4806 = vrcp.f32 %v456_v19  ;;  %v6542_v19 = vld [vmem:[#allocation29_spill] sm:$0xff] }
 0x148   :  { %v4803_v63 = vpop.eup %4802 }
 0x149   :  { %v4805_v38 = vpop.eup %4804  ;;  %v460_v53 = vmul.f32 %v4803_v63, %v4801_v3  ;;  %v6540_v3 = vld [vmem:[#allocation27_spill] sm:$0xff]  ;;  %v6541_v63 = vld [vmem:[#allocation28_spill] sm:$0xff] }
 0x14a   :  { %v459_v56 = vmul.f32 0.0, %v4805_v38  ;;  %v6543_v38 = vld [vmem:[#allocation30_spill] sm:$0xff] }
 0x14b   :  { %v4807_v29 = vpop.eup %4806 }
 0x14c   :  { %v5511_v39 = vadd.f32 %v460_v53, %v459_v56  ;;  %v6544_v53 = vld [vmem:[#allocation31_spill] sm:$0xff]  ;;  %v6545_v56 = vld [vmem:[#allocation32_spill] sm:$0xff] }
 0x14e   :  { %4808 = vtanh.f32 %v5511_v39 }
 0x158   :  { %v4809_v5 = vpop.eup %4808 }
 0x159   :  { %v463_v23 = vmul.f32 %v4809_v5, %v4807_v29  ;;  %v6546_v29 = vld [vmem:[#allocation33_spill] sm:$0xff]  ;;  %v6547_v5 = vld [vmem:[#allocation34_spill] sm:$0xff] }
 0x15b   :  { %529 = vmatmul.mubr.f32.vlgmr.msra.gmra.mrb[2].mxu0 %v463_v23  ;;  %600 = vmatmul.mubr.f32.vlgmr.msra.gmra.mrb[2].mxu1 %v463_v23 }
 0x15c   :  { %3421 = vmatpush1.bf16.msra.mxu0 %v5219_v8  ;;  %3453 = vmatpush1.bf16.msra.mxu1 %v5232_v25 }
 0x15d   :  { %3423 = vmatprep.subr.bf16.mxu0 %v5221_v9  ;;  %3455 = vmatprep.subr.bf16.mxu1 %v5242_v33 }
 0x15e   :  { %699 = vmatprep.mubr.f32.mxu0 %v6531_v4  ;;  %770 = vmatprep.mubr.f32.mxu1 %v6531_v4 }
 0x160   :  { %3425 = vmatpush1.bf16.msra.mxu0 %v5225_v14  ;;  %3457 = vmatpush1.bf16.msra.mxu1 %v5244_v37 }
 0x161   :  { %3427 = vmatprep.subr.bf16.mxu0 %v5228_v17  ;;  %3459 = vmatprep.subr.bf16.mxu1 %v5250_v45 }
 0x164   :  { %3429 = vmatpush1.bf16.msra.mxu0 %v5235_v26  ;;  %3461 = vmatpush1.bf16.msra.mxu1 %v5256_v48 }
 0x165   :  { %3431 = vmatprep.subr.bf16.mxu0 %v5239_v30  ;;  %3463 = vmatprep.subr.bf16.mxu1 %v5259_v52 }
 0x168   :  { %3433 = vmatpush1.bf16.msra.mxu0 %v5248_v42  ;;  %3465 = vmatpush1.bf16.msra.mxu1 %v5268_v62 }
 0x169   :  { %3435 = vmatprep.subr.bf16.mxu0 %v5253_v46  ;;  %3467 = vmatprep.subr.bf16.mxu1 %v5271_v1 }
 0x16c   :  { %3437 = vmatpush1.bf16.msra.mxu0 %v5262_v55  ;;  %3469 = vmatpush1.bf16.msra.mxu1 %v5280_v15 }
 0x16d   :  { %3439 = vmatprep.subr.bf16.mxu0 %v5265_v58  ;;  %3471 = vmatprep.subr.bf16.mxu1 %v5283_v18 }
 0x170   :  { %3441 = vmatpush1.bf16.msra.mxu0 %v5274_v7  ;;  %3473 = vmatpush1.bf16.msra.mxu1 %v5292_v31 }
 0x171   :  { %3443 = vmatprep.subr.bf16.mxu0 %v5277_v10  ;;  %3475 = vmatprep.subr.bf16.mxu1 %v5295_v34 }
 0x174   :  { %3445 = vmatpush1.bf16.msra.mxu0 %v5286_v24  ;;  %3477 = vmatpush1.bf16.msra.mxu1 %v5302_v43 }
 0x175   :  { %3447 = vmatprep.subr.bf16.mxu0 %v5289_v27  ;;  %3479 = vmatprep.subr.bf16.mxu1 %v5307_v51 }
 0x178   :  { %3449 = vmatpush1.bf16.msra.mxu0 %v5298_v41  ;;  %3481 = vmatpush1.bf16.msra.mxu1 %v5313_v61 }
 0x179   :  { %3483 = vmatprep.subr.bf16.mxu0 %v5304_v47  ;;  %3547 = vmatprep.subr.bf16.mxu1 %v5319_v6 }
 0x17b   :  { %700 = vmatmul.mubr.f32.vlgmr.msra.gmra.mrb[4].mxu0 %v463_v23  ;;  %771 = vmatmul.mubr.f32.vlgmr.msra.gmra.mrb[4].mxu1 %v463_v23  ;;  %v6548_v23 = vld [vmem:[#allocation35_spill] sm:$0xff] }
 0x17c   :  { %3485 = vmatpush1.bf16.msra.mxu0 %v5310_v60  ;;  %3549 = vmatpush1.bf16.msra.mxu1 %v5327_v21 }
 0x17d   :  { %3487 = vmatprep.subr.bf16.mxu0 %v5316_v2  ;;  %3551 = vmatprep.subr.bf16.mxu1 %v5333_v35 }
 0x180   :  { %3489 = vmatpush1.bf16.msra.mxu0 %v5323_v20  ;;  %3553 = vmatpush1.bf16.msra.mxu1 %v5340_v50 }
 0x181   :  { %3491 = vmatprep.subr.bf16.mxu0 %v5330_v28  ;;  %3555 = vmatprep.subr.bf16.mxu1 %v5346_v59 }
 0x184   :  { %3493 = vmatpush1.bf16.msra.mxu0 %v5337_v49  ;;  %3557 = vmatpush1.bf16.msra.mxu1 %v5353_v16 }
 0x185   :  { %3495 = vmatprep.subr.bf16.mxu0 %v5343_v54  ;;  %3559 = vmatprep.subr.bf16.mxu1 %v5359_v32 }
 0x188   :  { %3497 = vmatpush1.bf16.msra.mxu0 %v5350_v13  ;;  %3561 = vmatpush1.bf16.msra.mxu1 %v6532_v22 }
 0x189   :  { %3499 = vmatprep.subr.bf16.mxu0 %v6533_v57  ;;  %3563 = vmatprep.subr.bf16.mxu1 %v6534_v11 }
 0x18c   :  { %3501 = vmatpush1.bf16.msra.mxu0 %v6535_v0  ;;  %3565 = vmatpush1.bf16.msra.mxu1 %v6536_v40 }
 0x18d   :  { %3503 = vmatprep.subr.bf16.mxu0 %v6537_v36  ;;  %3567 = vmatprep.subr.bf16.mxu1 %v6538_v12  ;;  %v6549_v12 = vld [vmem:[#allocation36_spill] sm:$0xff] }
 0x190   :  { %3505 = vmatpush1.bf16.msra.mxu0 %v6539_v44  ;;  %3569 = vmatpush1.bf16.msra.mxu1 %v6540_v3  ;;  %v6550_v44 = vld [vmem:[#allocation37_spill] sm:$0xff]  ;;  %v6551_v3 = vld [vmem:[#allocation38_spill] sm:$0xff] }
 0x191   :  { %3507 = vmatprep.subr.bf16.mxu0 %v6541_v63  ;;  %3571 = vmatprep.subr.bf16.mxu1 %v6542_v19  ;;  %v6552_v63 = vld [vmem:[#allocation39_spill] sm:$0xff]  ;;  %v6553_v19 = vld [vmem:[#allocation40_spill] sm:$0xff] }
 0x194   :  { %3509 = vmatpush1.bf16.msra.mxu0 %v6543_v38  ;;  %3573 = vmatpush1.bf16.msra.mxu1 %v6544_v53  ;;  %v6554_v38 = vld [vmem:[#allocation41_spill] sm:$0xff]  ;;  %v6555_v53 = vld [vmem:[#allocation42_spill] sm:$0xff] }
 0x195   :  { %3511 = vmatprep.subr.bf16.mxu0 %v6545_v56  ;;  %3575 = vmatprep.subr.bf16.mxu1 %v6546_v29  ;;  %v6556_v56 = vld [vmem:[#allocation43_spill] sm:$0xff]  ;;  %v6557_v29 = vld [vmem:[#allocation44_spill] sm:$0xff] }
 0x198   :  { %3513 = vmatpush1.bf16.msra.mxu0 %v6547_v5  ;;  %3577 = vmatpush1.bf16.msra.mxu1 %v6548_v23  ;;  %v6558_v5 = vld [vmem:[#allocation45_spill] sm:$0xff]  ;;  %v6559_v23 = vld [vmem:[#allocation46_spill] sm:$0xff] }
 0x199   :  { %3515 = vmatprep.subr.bf16.mxu0 %v6549_v12  ;;  %3579 = vmatprep.subr.bf16.mxu1 %v6550_v44  ;;  %v6560_v12 = vld [vmem:[#allocation47_spill] sm:$0xff]  ;;  %v6561_v44 = vld [vmem:[#allocation48_spill] sm:$0xff] }
 0x19c   :  { %3517 = vmatpush1.bf16.msra.mxu0 %v6551_v3  ;;  %3581 = vmatpush1.bf16.msra.mxu1 %v6552_v63  ;;  %v6562_v3 = vld [vmem:[#allocation49_spill] sm:$0xff]  ;;  %v6563_v63 = vld [vmem:[#allocation50_spill] sm:$0xff] }
 0x19d   :  { %3519 = vmatprep.subr.bf16.mxu0 %v6553_v19  ;;  %3583 = vmatprep.subr.bf16.mxu1 %v6554_v38  ;;  %v6564_v19 = vld [vmem:[#allocation51_spill] sm:$0xff]  ;;  %v6565_v38 = vld [vmem:[#allocation52_spill] sm:$0xff] }
 0x1a0   :  { %3521 = vmatpush1.bf16.msra.mxu0 %v6555_v53  ;;  %3585 = vmatpush1.bf16.msra.mxu1 %v6556_v56  ;;  %v6566_v53 = vld [vmem:[#allocation53_spill] sm:$0xff]  ;;  %v6567_v56 = vld [vmem:[#allocation54_spill] sm:$0xff] }
 0x1a1   :  { %3523 = vmatprep.subr.bf16.mxu0 %v6557_v29  ;;  %3587 = vmatprep.subr.bf16.mxu1 %v6558_v5  ;;  %v6568_v29 = vld [vmem:[#allocation55_spill] sm:$0xff]  ;;  %v6569_v5 = vld [vmem:[#allocation56_spill] sm:$0xff] }
 0x1a4   :  { %3525 = vmatpush1.bf16.msra.mxu0 %v6559_v23  ;;  %3589 = vmatpush1.bf16.msra.mxu1 %v6560_v12  ;;  %v6570_v23 = vld [vmem:[#allocation57_spill] sm:$0xff]  ;;  %v6571_v12 = vld [vmem:[#allocation58_spill] sm:$0xff] }
 0x1a5   :  { %3527 = vmatprep.subr.bf16.mxu0 %v6561_v44  ;;  %3591 = vmatprep.subr.bf16.mxu1 %v6562_v3  ;;  %v6572_v44 = vld [vmem:[#allocation59_spill] sm:$0xff]  ;;  %v6573_v3 = vld [vmem:[#allocation60_spill] sm:$0xff] }
 0x1a8   :  { %3529 = vmatpush1.bf16.msra.mxu0 %v6563_v63  ;;  %3593 = vmatpush1.bf16.msra.mxu1 %v6564_v19  ;;  %v6574_v63 = vld [vmem:[#allocation61_spill] sm:$0xff]  ;;  %v6575_v19 = vld [vmem:[#allocation62_spill] sm:$0xff] }
 0x1a9   :  { %3531 = vmatprep.subr.bf16.mxu0 %v6565_v38  ;;  %3595 = vmatprep.subr.bf16.mxu1 %v6566_v53  ;;  %v6576_v38 = vld [vmem:[#allocation63_spill] sm:$0xff]  ;;  %v6577_v53 = vld [vmem:[#allocation64_spill] sm:$0xff] }
 0x1ac   :  { %3533 = vmatpush1.bf16.msra.mxu0 %v6567_v56  ;;  %3597 = vmatpush1.bf16.msra.mxu1 %v6568_v29  ;;  %v6578_v56 = vld [vmem:[#allocation65_spill] sm:$0xff]  ;;  %v6579_v29 = vld [vmem:[#allocation66_spill] sm:$0xff] }
 0x1ad   :  { %3535 = vmatprep.subr.bf16.mxu0 %v6569_v5  ;;  %3599 = vmatprep.subr.bf16.mxu1 %v6570_v23  ;;  %v6580_v5 = vld [vmem:[#allocation67_spill] sm:$0xff]  ;;  %v6581_v23 = vld [vmem:[#allocation13_spill] sm:$0xff] }
 0x1b0   :  { %3537 = vmatpush1.bf16.msra.mxu0 %v6571_v12  ;;  %3601 = vmatpush1.bf16.msra.mxu1 %v6572_v44  ;;  %v6582_v12 = vld [vmem:[#allocation14_spill] sm:$0xff]  ;;  %v266_v44 = vlaneseq }
 0x1b1   :  { %3539 = vmatprep.subr.bf16.mxu0 %v6573_v3  ;;  %3603 = vmatprep.subr.bf16.mxu1 %v6574_v63 }
 0x1b2   :  { %v267_v3 = vshrl.u32 %v266_v44, 7 }
 0x1b4   :  { %3541 = vmatpush1.bf16.msra.mxu0 %v6575_v19  ;;  %3605 = vmatpush1.bf16.msra.mxu1 %v6576_v38  ;;  %v268_v36 = vsub.s32 0, %v267_v3  ;;  %v264_v19 = vld [vmem:[%s6352_s3] sm:$0xf]  ;;  %v272_v38 = vsub.s32 1, %v267_v3  ;;  %v280_v40 = vsub.s32 3, %v267_v3  ;;  %v276_v22 = vsub.s32 2, %v267_v3 }
 0x1b5   :  { %3543 = vmatprep.subr.bf16.mxu0 %v6577_v53  ;;  %3607 = vmatprep.subr.bf16.mxu1 %v6578_v56 }
 0x1b6   :  { %v5615_v63 = vrot.slane %v264_v19, %v268_v36  ;;  %v5617_v53 = vrot.slane %v264_v19, %v272_v38  ;;  %v5621_v57 = vrot.slane %v264_v19, %v280_v40  ;;  %v5624_v38 = vrot.slane %v264_v19, %v276_v22  ;;  %v631_v22 = vld [vmem:[#allocation6 + $0x20] sm:$0xff]  ;;  %v632_v19 = vld [vmem:[#allocation6 + $0x28] sm:$0xff] }
 0x1b8   :  { %3545 = vmatpush1.bf16.msra.mxu0 %v6579_v29  ;;  %3609 = vmatpush1.bf16.msra.mxu1 %v6580_v5  ;;  %6583 = vst [vmem:[#allocation68_spill] sm:$0xff] %v5615_v63  ;;  %6584 = vst [vmem:[#allocation69_spill] sm:$0xff] %v5617_v53 }
 0x1b9   :  { %3611 = vmatprep.subr.bf16.mxu0 %v6581_v23  ;;  %3643 = vmatprep.subr.bf16.mxu1 %v6582_v12  ;;  %6585 = vst [vmem:[#allocation70_spill] sm:$0xff] %v5621_v57  ;;  %6586 = vst [vmem:[#allocation71_spill] sm:$0xff] %v5624_v38 }
 0x22e   :  { %v530_v56 = vpop.f32.mrb[2].mxu0  ;;  %v601_v29 = vpop.f32.mrb[2].mxu1 }
 0x22f   :  { %v531_v5 = vadd.f32 %v530_v56, %v5615_v63  ;;  %v532_v23 = vpop.f32.mrb[3].mxu0  ;;  %v603_v0 = vpop.f32.mrb[3].mxu1  ;;  %v602_v32 = vadd.f32 %v601_v29, %v5624_v38 }
 0x230   :  { %v533_v12 = vadd.f32 %v532_v23, %v5617_v53  ;;  %v604_v36 = vadd.f32 %v603_v0, %v5621_v57  ;;  %v634_v57 = vld [vmem:[#allocation6 + $0x38] sm:$0xff] }
 0x231   :  { %v3128_v44 = vmul.f32 -1.442695, %v531_v5 }
 0x232   :  { %v3129_v11 = vmul.f32 -1.442695, %v533_v12  ;;  %v3130_v13 = vmul.f32 -1.442695, %v604_v36 }
 0x233   :  { %4810 = vpow2.f32 %v3128_v44 }
 0x234   :  { %4812 = vpow2.f32 %v3129_v11 }
 0x235   :  { %4814 = vpow2.f32 %v3130_v13 }
 0x236   :  { %4816 = vtanh.f32 %v602_v32 }
 0x23d   :  { %v4811_v54 = vpop.eup %4810 }
 0x23e   :  { %v4813_v56 = vpop.eup %4812  ;;  %v609_v63 = vadd.f32 1.0, %v4811_v54 }
 0x23f   :  { %v615_v23 = vadd.f32 1.0, %v4813_v56  ;;  %v4815_v40 = vpop.eup %4814 }
 0x240   :  { %4818 = vrcp.f32 %v609_v63  ;;  %v4817_v12 = vpop.eup %4816  ;;  %v622_v44 = vadd.f32 1.0, %v4815_v40 }
 0x241   :  { %4820 = vrcp.f32 %v615_v23 }
 0x242   :  { %4822 = vrcp.f32 %v622_v44 }
 0x24a   :  { %v4819_v5 = vpop.eup %4818 }
 0x24b   :  { %v4821_v3 = vpop.eup %4820  ;;  %v626_v11 = vmul.f32 %v4819_v5, %v4817_v12  ;;  %v633_v12 = vld [vmem:[#allocation6 + $0x30] sm:$0xff] }
 0x24c   :  { %v625_v0 = vmul.f32 0.0, %v4821_v3  ;;  %v4823_v5 = vpop.eup %4822 }
 0x24e   :  { %v5627_v36 = vadd.f32 %v626_v11, %v625_v0  ;;  %v701_v29 = vpop.f32.mrb[4].mxu0  ;;  %v772_v38 = vpop.f32.mrb[4].mxu1 }
 0x24f   :  { %v777_v54 = vadd.f32 %v701_v29, %v631_v22  ;;  %v703_v13 = vpop.f32.mrb[5].mxu0  ;;  %v774_v32 = vpop.f32.mrb[5].mxu1  ;;  %v779_v0 = vadd.f32 %v772_v38, %v633_v12  ;;  %v6589_v12 = vld [vmem:[#allocation19_spill] sm:$0xff] }
 0x250   :  { %4824 = vtanh.f32 %v5627_v36  ;;  %v778_v63 = vadd.f32 %v703_v13, %v632_v19  ;;  %v780_v40 = vadd.f32 %v774_v32, %v634_v57 }
 0x251   :  { %v3131_v56 = vmul.f32 -1.442695, %v777_v54 }
 0x252   :  { %v3132_v23 = vmul.f32 -1.442695, %v778_v63  ;;  %v3133_v11 = vmul.f32 -1.442695, %v780_v40  ;;  %v6588_v40 = vld [vmem:[#allocation15_spill] sm:$0xff] }
 0x253   :  { %4826 = vpow2.f32 %v3131_v56 }
 0x254   :  { %4828 = vpow2.f32 %v3132_v23 }
 0x255   :  { %4830 = vpow2.f32 %v3133_v11  ;;  %v6592_v11 = vld [vmem:[#allocation18_spill] sm:$0xff] }
 0x256   :  { %4832 = vtanh.f32 %v779_v0  ;;  %v6593_v0 = vld [vmem:[#allocation22_spill] sm:$0xff] }
 0x25a   :  { %v4825_v3 = vpop.eup %4824 }
 0x25b   :  { %v629_v53 = vmul.f32 %v4825_v3, %v4823_v5  ;;  %v6590_v5 = vld [vmem:[#allocation16_spill] sm:$0xff]  ;;  %v6591_v3 = vld [vmem:[#allocation21_spill] sm:$0xff] }
 0x25d   :  { %v4827_v16 = vpop.eup %4826  ;;  %869 = vmatprep.mubr.f32.mxu0 %v629_v53  ;;  %940 = vmatprep.mubr.f32.mxu1 %v629_v53 }
 0x25e   :  { %v4829_v44 = vpop.eup %4828  ;;  %v784_v22 = vadd.f32 1.0, %v4827_v16 }
 0x25f   :  { %v790_v19 = vadd.f32 1.0, %v4829_v44  ;;  %v4831_v29 = vpop.eup %4830  ;;  %v6594_v44 = vld [vmem:[#allocation20_spill] sm:$0xff] }
 0x260   :  { %4834 = vrcp.f32 %v784_v22  ;;  %v4833_v54 = vpop.eup %4832  ;;  %v797_v63 = vadd.f32 1.0, %v4831_v29  ;;  %v6595_v22 = vld [vmem:[#allocation23_spill] sm:$0xff]  ;;  %v6597_v29 = vld [vmem:[#allocation25_spill] sm:$0xff] }
 0x261   :  { %4836 = vrcp.f32 %v790_v19  ;;  %v6596_v19 = vld [vmem:[#allocation24_spill] sm:$0xff] }
 0x262   :  { %4838 = vrcp.f32 %v797_v63  ;;  %v6602_v63 = vld [vmem:[#allocation30_spill] sm:$0xff] }
 0x26a   :  { %v4835_v13 = vpop.eup %4834 }
 0x26b   :  { %v4837_v57 = vpop.eup %4836  ;;  %v801_v32 = vmul.f32 %v4835_v13, %v4833_v54  ;;  %v6598_v54 = vld [vmem:[#allocation26_spill] sm:$0xff]  ;;  %v6599_v13 = vld [vmem:[#allocation27_spill] sm:$0xff] }
 0x26c   :  { %v800_v56 = vmul.f32 %v4837_v57, %v5511_v39  ;;  %v4839_v53 = vpop.eup %4838  ;;  %v6587_v39 = vld [vmem:[#allocation17_spill] sm:$0xff]  ;;  %v6600_v57 = vld [vmem:[#allocation28_spill] sm:$0xff] }
 0x26e   :  { %v5631_v38 = vadd.f32 %v801_v32, %v800_v56  ;;  %v6601_v32 = vld [vmem:[#allocation29_spill] sm:$0xff]  ;;  %v6603_v56 = vld [vmem:[#allocation31_spill] sm:$0xff] }
 0x270   :  { %4840 = vtanh.f32 %v5631_v38 }
 0x27a   :  { %v4841_v16 = vpop.eup %4840 }
 0x27b   :  { %v804_v23 = vmul.f32 %v4841_v16, %v4839_v53  ;;  %v6604_v53 = vld [vmem:[#allocation32_spill] sm:$0xff]  ;;  %v6605_v16 = vld [vmem:[#allocation33_spill] sm:$0xff] }
 0x27d   :  { %870 = vmatmul.mubr.f32.vlgmr.msra.gmra.mrb[6].mxu0 %v804_v23  ;;  %941 = vmatmul.mubr.f32.vlgmr.msra.gmra.mrb[6].mxu1 %v804_v23 }
 0x27e   :  { %3613 = vmatpush1.bf16.msra.mxu0 %v5219_v8  ;;  %3645 = vmatpush1.bf16.msra.mxu1 %v5232_v25 }
 0x27f   :  { %3615 = vmatprep.subr.bf16.mxu0 %v5221_v9  ;;  %3647 = vmatprep.subr.bf16.mxu1 %v5242_v33 }
 0x280   :  { %1040 = vmatprep.mubr.f32.mxu0 %v6531_v4  ;;  %1111 = vmatprep.mubr.f32.mxu1 %v6531_v4 }
 0x282   :  { %3617 = vmatpush1.bf16.msra.mxu0 %v5225_v14  ;;  %3649 = vmatpush1.bf16.msra.mxu1 %v5244_v37 }
 0x283   :  { %3619 = vmatprep.subr.bf16.mxu0 %v5228_v17  ;;  %3651 = vmatprep.subr.bf16.mxu1 %v5250_v45 }
 0x286   :  { %3621 = vmatpush1.bf16.msra.mxu0 %v5235_v26  ;;  %3653 = vmatpush1.bf16.msra.mxu1 %v5256_v48 }
 0x287   :  { %3623 = vmatprep.subr.bf16.mxu0 %v5239_v30  ;;  %3655 = vmatprep.subr.bf16.mxu1 %v5259_v52 }
 0x28a   :  { %3625 = vmatpush1.bf16.msra.mxu0 %v5248_v42  ;;  %3657 = vmatpush1.bf16.msra.mxu1 %v5268_v62 }
 0x28b   :  { %3627 = vmatprep.subr.bf16.mxu0 %v5253_v46  ;;  %3659 = vmatprep.subr.bf16.mxu1 %v5271_v1 }
 0x28e   :  { %3629 = vmatpush1.bf16.msra.mxu0 %v5262_v55  ;;  %3661 = vmatpush1.bf16.msra.mxu1 %v5280_v15 }
 0x28f   :  { %3631 = vmatprep.subr.bf16.mxu0 %v5265_v58  ;;  %3663 = vmatprep.subr.bf16.mxu1 %v5283_v18 }
 0x292   :  { %3633 = vmatpush1.bf16.msra.mxu0 %v5274_v7  ;;  %3665 = vmatpush1.bf16.msra.mxu1 %v5292_v31 }
 0x293   :  { %3635 = vmatprep.subr.bf16.mxu0 %v5277_v10  ;;  %3667 = vmatprep.subr.bf16.mxu1 %v5295_v34 }
 0x296   :  { %3637 = vmatpush1.bf16.msra.mxu0 %v5286_v24  ;;  %3669 = vmatpush1.bf16.msra.mxu1 %v5302_v43 }
 0x297   :  { %3639 = vmatprep.subr.bf16.mxu0 %v5289_v27  ;;  %3671 = vmatprep.subr.bf16.mxu1 %v5307_v51 }
 0x29a   :  { %3641 = vmatpush1.bf16.msra.mxu0 %v5298_v41  ;;  %3673 = vmatpush1.bf16.msra.mxu1 %v5313_v61 }
 0x29b   :  { %3675 = vmatprep.subr.bf16.mxu0 %v5304_v47  ;;  %3739 = vmatprep.subr.bf16.mxu1 %v5319_v6 }
 0x29d   :  { %1041 = vmatmul.mubr.f32.vlgmr.msra.gmra.mrb[8].mxu0 %v804_v23  ;;  %1112 = vmatmul.mubr.f32.vlgmr.msra.gmra.mrb[8].mxu1 %v804_v23  ;;  %v6606_v23 = vld [vmem:[#allocation34_spill] sm:$0xff] }
 0x29e   :  { %3677 = vmatpush1.bf16.msra.mxu0 %v5310_v60  ;;  %3741 = vmatpush1.bf16.msra.mxu1 %v5327_v21 }
 0x29f   :  { %3679 = vmatprep.subr.bf16.mxu0 %v5316_v2  ;;  %3743 = vmatprep.subr.bf16.mxu1 %v5333_v35 }
 0x2a2   :  { %3681 = vmatpush1.bf16.msra.mxu0 %v5323_v20  ;;  %3745 = vmatpush1.bf16.msra.mxu1 %v5340_v50 }
 0x2a3   :  { %3683 = vmatprep.subr.bf16.mxu0 %v5330_v28  ;;  %3747 = vmatprep.subr.bf16.mxu1 %v5346_v59 }
 0x2a6   :  { %3685 = vmatpush1.bf16.msra.mxu0 %v5337_v49  ;;  %3749 = vmatpush1.bf16.msra.mxu1 %v6587_v39 }
 0x2a7   :  { %3687 = vmatprep.subr.bf16.mxu0 %v6588_v40  ;;  %3751 = vmatprep.subr.bf16.mxu1 %v6589_v12 }
 0x2aa   :  { %3689 = vmatpush1.bf16.msra.mxu0 %v6590_v5  ;;  %3753 = vmatpush1.bf16.msra.mxu1 %v6591_v3 }
 0x2ab   :  { %3691 = vmatprep.subr.bf16.mxu0 %v6592_v11  ;;  %3755 = vmatprep.subr.bf16.mxu1 %v6593_v0  ;;  %v6643_v0 = vld [vmem:[#allocation69_spill] sm:$0xff] }
 0x2ae   :  { %3693 = vmatpush1.bf16.msra.mxu0 %v6594_v44  ;;  %3757 = vmatpush1.bf16.msra.mxu1 %v6595_v22  ;;  %v6642_v22 = vld [vmem:[#allocation68_spill] sm:$0xff] }
 0x2af   :  { %3695 = vmatprep.subr.bf16.mxu0 %v6596_v19  ;;  %3759 = vmatprep.subr.bf16.mxu1 %v6597_v29  ;;  %v6607_v19 = vld [vmem:[#allocation35_spill] sm:$0xff]  ;;  %v6608_v29 = vld [vmem:[#allocation36_spill] sm:$0xff] }
 0x2b2   :  { %3697 = vmatpush1.bf16.msra.mxu0 %v6598_v54  ;;  %3761 = vmatpush1.bf16.msra.mxu1 %v6599_v13  ;;  %v6609_v54 = vld [vmem:[#allocation37_spill] sm:$0xff]  ;;  %v6610_v13 = vld [vmem:[#allocation38_spill] sm:$0xff] }
 0x2b3   :  { %3699 = vmatprep.subr.bf16.mxu0 %v6600_v57  ;;  %3763 = vmatprep.subr.bf16.mxu1 %v6601_v32  ;;  %v6611_v57 = vld [vmem:[#allocation39_spill] sm:$0xff]  ;;  %v6612_v32 = vld [vmem:[#allocation40_spill] sm:$0xff] }
 0x2b6   :  { %3701 = vmatpush1.bf16.msra.mxu0 %v6602_v63  ;;  %3765 = vmatpush1.bf16.msra.mxu1 %v6603_v56  ;;  %v6613_v63 = vld [vmem:[#allocation41_spill] sm:$0xff]  ;;  %v6614_v56 = vld [vmem:[#allocation42_spill] sm:$0xff] }
 0x2b7   :  { %3703 = vmatprep.subr.bf16.mxu0 %v6604_v53  ;;  %3767 = vmatprep.subr.bf16.mxu1 %v6605_v16  ;;  %v6615_v53 = vld [vmem:[#allocation43_spill] sm:$0xff]  ;;  %v6616_v16 = vld [vmem:[#allocation44_spill] sm:$0xff] }
 0x2ba   :  { %3705 = vmatpush1.bf16.msra.mxu0 %v6606_v23  ;;  %3769 = vmatpush1.bf16.msra.mxu1 %v6607_v19  ;;  %v6617_v23 = vld [vmem:[#allocation45_spill] sm:$0xff]  ;;  %v6618_v19 = vld [vmem:[#allocation46_spill] sm:$0xff] }
 0x2bb   :  { %3707 = vmatprep.subr.bf16.mxu0 %v6608_v29  ;;  %3771 = vmatprep.subr.bf16.mxu1 %v6609_v54  ;;  %v6619_v29 = vld [vmem:[#allocation47_spill] sm:$0xff]  ;;  %v6620_v54 = vld [vmem:[#allocation48_spill] sm:$0xff] }
 0x2be   :  { %3709 = vmatpush1.bf16.msra.mxu0 %v6610_v13  ;;  %3773 = vmatpush1.bf16.msra.mxu1 %v6611_v57  ;;  %v6621_v13 = vld [vmem:[#allocation49_spill] sm:$0xff]  ;;  %v6622_v57 = vld [vmem:[#allocation50_spill] sm:$0xff] }
 0x2bf   :  { %3711 = vmatprep.subr.bf16.mxu0 %v6612_v32  ;;  %3775 = vmatprep.subr.bf16.mxu1 %v6613_v63  ;;  %v6623_v32 = vld [vmem:[#allocation51_spill] sm:$0xff]  ;;  %v6624_v63 = vld [vmem:[#allocation52_spill] sm:$0xff] }
 0x2c2   :  { %3713 = vmatpush1.bf16.msra.mxu0 %v6614_v56  ;;  %3777 = vmatpush1.bf16.msra.mxu1 %v6615_v53  ;;  %v6625_v56 = vld [vmem:[#allocation53_spill] sm:$0xff]  ;;  %v6626_v53 = vld [vmem:[#allocation54_spill] sm:$0xff] }
 0x2c3   :  { %3715 = vmatprep.subr.bf16.mxu0 %v6616_v16  ;;  %3779 = vmatprep.subr.bf16.mxu1 %v6617_v23  ;;  %v6627_v16 = vld [vmem:[#allocation55_spill] sm:$0xff]  ;;  %v6628_v23 = vld [vmem:[#allocation56_spill] sm:$0xff] }
 0x2c6   :  { %3717 = vmatpush1.bf16.msra.mxu0 %v6618_v19  ;;  %3781 = vmatpush1.bf16.msra.mxu1 %v6619_v29  ;;  %v6629_v19 = vld [vmem:[#allocation57_spill] sm:$0xff]  ;;  %v6630_v29 = vld [vmem:[#allocation58_spill] sm:$0xff] }
 0x2c7   :  { %3719 = vmatprep.subr.bf16.mxu0 %v6620_v54  ;;  %3783 = vmatprep.subr.bf16.mxu1 %v6621_v13  ;;  %v6631_v54 = vld [vmem:[#allocation59_spill] sm:$0xff]  ;;  %v6632_v13 = vld [vmem:[#allocation60_spill] sm:$0xff] }
 0x2ca   :  { %3721 = vmatpush1.bf16.msra.mxu0 %v6622_v57  ;;  %3785 = vmatpush1.bf16.msra.mxu1 %v6623_v32  ;;  %v6633_v57 = vld [vmem:[#allocation61_spill] sm:$0xff]  ;;  %v6634_v32 = vld [vmem:[#allocation62_spill] sm:$0xff] }
 0x2cb   :  { %3723 = vmatprep.subr.bf16.mxu0 %v6624_v63  ;;  %3787 = vmatprep.subr.bf16.mxu1 %v6625_v56  ;;  %v6635_v63 = vld [vmem:[#allocation63_spill] sm:$0xff]  ;;  %v6636_v56 = vld [vmem:[#allocation64_spill] sm:$0xff] }
 0x2ce   :  { %3725 = vmatpush1.bf16.msra.mxu0 %v6626_v53  ;;  %3789 = vmatpush1.bf16.msra.mxu1 %v6627_v16  ;;  %v6637_v53 = vld [vmem:[#allocation65_spill] sm:$0xff]  ;;  %v6638_v16 = vld [vmem:[#allocation66_spill] sm:$0xff] }
 0x2cf   :  { %3727 = vmatprep.subr.bf16.mxu0 %v6628_v23  ;;  %3791 = vmatprep.subr.bf16.mxu1 %v6629_v19  ;;  %v6639_v23 = vld [vmem:[#allocation67_spill] sm:$0xff]  ;;  %v6640_v19 = vld [vmem:[#allocation13_spill] sm:$0xff] }
 0x2d2   :  { %3729 = vmatpush1.bf16.msra.mxu0 %v6630_v29  ;;  %3793 = vmatpush1.bf16.msra.mxu1 %v6631_v54  ;;  %v6641_v29 = vld [vmem:[#allocation14_spill] sm:$0xff] }
 0x2d3   :  { %3731 = vmatprep.subr.bf16.mxu0 %v6632_v13  ;;  %3795 = vmatprep.subr.bf16.mxu1 %v6633_v57 }
 0x2d6   :  { %3733 = vmatpush1.bf16.msra.mxu0 %v6634_v32  ;;  %3797 = vmatpush1.bf16.msra.mxu1 %v6635_v63 }
 0x2d7   :  { %3735 = vmatprep.subr.bf16.mxu0 %v6636_v56  ;;  %3799 = vmatprep.subr.bf16.mxu1 %v6637_v53  ;;  %v6644_v53 = vld [vmem:[#allocation70_spill] sm:$0xff] }
 0x2da   :  { %3737 = vmatpush1.bf16.msra.mxu0 %v6638_v16  ;;  %3801 = vmatpush1.bf16.msra.mxu1 %v6639_v23  ;;  %v6645_v23 = vld [vmem:[#allocation71_spill] sm:$0xff] }
 0x2db   :  { %3803 = vmatprep.subr.bf16.mxu0 %v6640_v19  ;;  %3835 = vmatprep.subr.bf16.mxu1 %v6641_v29 }
 0x350   :  { %v871_v54 = vpop.f32.mrb[6].mxu0  ;;  %v942_v13 = vpop.f32.mrb[6].mxu1 }
 0x351   :  { %v872_v57 = vadd.f32 %v871_v54, %v6642_v22  ;;  %v873_v44 = vpop.f32.mrb[7].mxu0  ;;  %v944_v32 = vpop.f32.mrb[7].mxu1  ;;  %v943_v5 = vadd.f32 %v942_v13, %v6645_v23 }
 0x352   :  { %v874_v63 = vadd.f32 %v873_v44, %v6643_v0  ;;  %v945_v16 = vadd.f32 %v944_v32, %v6644_v53  ;;  %v972_v32 = vld [vmem:[#allocation6 + $0x40] sm:$0xff] }
 0x353   :  { %v3134_v11 = vmul.f32 -1.442695, %v872_v57 }
 0x354   :  { %v3135_v56 = vmul.f32 -1.442695, %v874_v63  ;;  %v3136_v3 = vmul.f32 -1.442695, %v945_v16  ;;  %v973_v16 = vld [vmem:[#allocation6 + $0x48] sm:$0xff] }
 0x355   :  { %4842 = vpow2.f32 %v3134_v11 }
 0x356   :  { %4844 = vpow2.f32 %v3135_v56 }
 0x357   :  { %4846 = vpow2.f32 %v3136_v3 }
 0x358   :  { %4848 = vtanh.f32 %v943_v5 }
 0x35f   :  { %v4843_v19 = vpop.eup %4842 }
 0x360   :  { %v4845_v12 = vpop.eup %4844  ;;  %v950_v29 = vadd.f32 1.0, %v4843_v19 }
 0x361   :  { %v956_v40 = vadd.f32 1.0, %v4845_v12  ;;  %v4847_v54 = vpop.eup %4846 }
 0x362   :  { %4850 = vrcp.f32 %v950_v29  ;;  %v4849_v22 = vpop.eup %4848  ;;  %v963_v11 = vadd.f32 1.0, %v4847_v54 }
 0x363   :  { %4852 = vrcp.f32 %v956_v40 }
 0x364   :  { %4854 = vrcp.f32 %v963_v11 }
 0x36c   :  { %v4851_v44 = vpop.eup %4850 }
 0x36d   :  { %v4853_v57 = vpop.eup %4852  ;;  %v967_v63 = vmul.f32 %v4851_v44, %v4849_v22  ;;  %v975_v22 = vld [vmem:[#allocation6 + $0x58] sm:$0xff] }
 0x36e   :  { %v966_v56 = vmul.f32 %v4853_v57, %v5627_v36  ;;  %v974_v36 = vld [vmem:[#allocation6 + $0x50] sm:$0xff]  ;;  %v4855_v44 = vpop.eup %4854 }
 0x370   :  { %v1042_v53 = vpop.f32.mrb[8].mxu0  ;;  %v1113_v13 = vpop.f32.mrb[8].mxu1  ;;  %v5737_v23 = vadd.f32 %v967_v63, %v966_v56 }
 0x371   :  { %v1118_v3 = vadd.f32 %v1042_v53, %v972_v32  ;;  %v1044_v5 = vpop.f32.mrb[9].mxu0  ;;  %v1115_v12 = vpop.f32.mrb[9].mxu1  ;;  %v1120_v39 = vadd.f32 %v1113_v13, %v974_v36  ;;  %v6648_v36 = vld [vmem:[#allocation19_spill] sm:$0xff] }
 0x372   :  { %v1119_v19 = vadd.f32 %v1044_v5, %v973_v16  ;;  %4856 = vtanh.f32 %v5737_v23  ;;  %v1121_v54 = vadd.f32 %v1115_v12, %v975_v22 }
 0x373   :  { %v3137_v40 = vmul.f32 -1.442695, %v1118_v3 }
 0x374   :  { %v3138_v29 = vmul.f32 -1.442695, %v1119_v19  ;;  %v3139_v0 = vmul.f32 -1.442695, %v1121_v54 }
 0x375   :  { %4858 = vpow2.f32 %v3137_v40 }
 0x376   :  { %4860 = vpow2.f32 %v3138_v29 }
 0x377   :  { %4862 = vpow2.f32 %v3139_v0 }
 0x378   :  { %4864 = vtanh.f32 %v1120_v39  ;;  %v6647_v39 = vld [vmem:[#allocation15_spill] sm:$0xff] }
 0x37c   :  { %v4857_v57 = vpop.eup %4856 }
 0x37d   :  { %v970_v63 = vmul.f32 %v4857_v57, %v4855_v44  ;;  %v6649_v44 = vld [vmem:[#allocation16_spill] sm:$0xff]  ;;  %v6650_v57 = vld [vmem:[#allocation21_spill] sm:$0xff] }
 0x37f   :  { %v4859_v56 = vpop.eup %4858  ;;  %1210 = vmatprep.mubr.f32.mxu0 %v970_v63  ;;  %1281 = vmatprep.mubr.f32.mxu1 %v970_v63  ;;  %v6651_v63 = vld [vmem:[#allocation18_spill] sm:$0xff] }
 0x380   :  { %v4861_v53 = vpop.eup %4860  ;;  %v1125_v11 = vadd.f32 1.0, %v4859_v56  ;;  %v6652_v56 = vld [vmem:[#allocation22_spill] sm:$0xff] }
 0x381   :  { %v1131_v32 = vadd.f32 1.0, %v4861_v53  ;;  %v4863_v16 = vpop.eup %4862  ;;  %v6653_v53 = vld [vmem:[#allocation20_spill] sm:$0xff] }
 0x382   :  { %4866 = vrcp.f32 %v1125_v11  ;;  %v4865_v3 = vpop.eup %4864  ;;  %v1138_v40 = vadd.f32 1.0, %v4863_v16  ;;  %v6654_v11 = vld [vmem:[#allocation23_spill] sm:$0xff]  ;;  %v6656_v16 = vld [vmem:[#allocation25_spill] sm:$0xff] }
 0x383   :  { %4868 = vrcp.f32 %v1131_v32  ;;  %v6655_v32 = vld [vmem:[#allocation24_spill] sm:$0xff] }
 0x384   :  { %4870 = vrcp.f32 %v1138_v40  ;;  %v6661_v40 = vld [vmem:[#allocation30_spill] sm:$0xff] }
 0x38c   :  { %v4867_v5 = vpop.eup %4866 }
 0x38d   :  { %v4869_v12 = vpop.eup %4868  ;;  %v1142_v19 = vmul.f32 %v4867_v5, %v4865_v3  ;;  %v6657_v3 = vld [vmem:[#allocation26_spill] sm:$0xff]  ;;  %v6658_v5 = vld [vmem:[#allocation27_spill] sm:$0xff] }
 0x38e   :  { %v1141_v29 = vmul.f32 %v4869_v12, %v5631_v38  ;;  %v4871_v22 = vpop.eup %4870  ;;  %v6646_v38 = vld [vmem:[#allocation17_spill] sm:$0xff]  ;;  %v6659_v12 = vld [vmem:[#allocation28_spill] sm:$0xff] }
 0x390   :  { %v5741_v13 = vadd.f32 %v1142_v19, %v1141_v29  ;;  %v6660_v19 = vld [vmem:[#allocation29_spill] sm:$0xff]  ;;  %v6662_v29 = vld [vmem:[#allocation31_spill] sm:$0xff] }
 0x392   :  { %4872 = vtanh.f32 %v5741_v13 }
 0x39c   :  { %v4873_v54 = vpop.eup %4872 }
 0x39d   :  { %v1145_v0 = vmul.f32 %v4873_v54, %v4871_v22  ;;  %v6663_v22 = vld [vmem:[#allocation32_spill] sm:$0xff]  ;;  %v6664_v54 = vld [vmem:[#allocation33_spill] sm:$0xff] }
 0x39f   :  { %1211 = vmatmul.mubr.f32.vlgmr.msra.gmra.mrb[10].mxu0 %v1145_v0  ;;  %1282 = vmatmul.mubr.f32.vlgmr.msra.gmra.mrb[10].mxu1 %v1145_v0 }
 0x3a0   :  { %3805 = vmatpush1.bf16.msra.mxu0 %v5219_v8  ;;  %3837 = vmatpush1.bf16.msra.mxu1 %v5232_v25 }
 0x3a1   :  { %3807 = vmatprep.subr.bf16.mxu0 %v5221_v9  ;;  %3839 = vmatprep.subr.bf16.mxu1 %v5242_v33 }
 0x3a2   :  { %1381 = vmatprep.mubr.f32.mxu0 %v6531_v4  ;;  %1452 = vmatprep.mubr.f32.mxu1 %v6531_v4 }
 0x3a4   :  { %3809 = vmatpush1.bf16.msra.mxu0 %v5225_v14  ;;  %3841 = vmatpush1.bf16.msra.mxu1 %v5244_v37 }
 0x3a5   :  { %3811 = vmatprep.subr.bf16.mxu0 %v5228_v17  ;;  %3843 = vmatprep.subr.bf16.mxu1 %v5250_v45 }
 0x3a8   :  { %3813 = vmatpush1.bf16.msra.mxu0 %v5235_v26  ;;  %3845 = vmatpush1.bf16.msra.mxu1 %v5256_v48 }
 0x3a9   :  { %3815 = vmatprep.subr.bf16.mxu0 %v5239_v30  ;;  %3847 = vmatprep.subr.bf16.mxu1 %v5259_v52 }
 0x3ac   :  { %3817 = vmatpush1.bf16.msra.mxu0 %v5248_v42  ;;  %3849 = vmatpush1.bf16.msra.mxu1 %v5268_v62 }
 0x3ad   :  { %3819 = vmatprep.subr.bf16.mxu0 %v5253_v46  ;;  %3851 = vmatprep.subr.bf16.mxu1 %v5271_v1 }
 0x3b0   :  { %3821 = vmatpush1.bf16.msra.mxu0 %v5262_v55  ;;  %3853 = vmatpush1.bf16.msra.mxu1 %v5280_v15 }
 0x3b1   :  { %3823 = vmatprep.subr.bf16.mxu0 %v5265_v58  ;;  %3855 = vmatprep.subr.bf16.mxu1 %v5283_v18 }
 0x3b4   :  { %3825 = vmatpush1.bf16.msra.mxu0 %v5274_v7  ;;  %3857 = vmatpush1.bf16.msra.mxu1 %v5292_v31 }
 0x3b5   :  { %3827 = vmatprep.subr.bf16.mxu0 %v5277_v10  ;;  %3859 = vmatprep.subr.bf16.mxu1 %v5295_v34 }
 0x3b8   :  { %3829 = vmatpush1.bf16.msra.mxu0 %v5286_v24  ;;  %3861 = vmatpush1.bf16.msra.mxu1 %v5302_v43 }
 0x3b9   :  { %3831 = vmatprep.subr.bf16.mxu0 %v5289_v27  ;;  %3863 = vmatprep.subr.bf16.mxu1 %v5307_v51 }
 0x3bc   :  { %3833 = vmatpush1.bf16.msra.mxu0 %v5298_v41  ;;  %3865 = vmatpush1.bf16.msra.mxu1 %v5313_v61 }
 0x3bd   :  { %3867 = vmatprep.subr.bf16.mxu0 %v5304_v47  ;;  %3931 = vmatprep.subr.bf16.mxu1 %v5319_v6 }
 0x3bf   :  { %1382 = vmatmul.mubr.f32.vlgmr.msra.gmra.mrb[12].mxu0 %v1145_v0  ;;  %1453 = vmatmul.mubr.f32.vlgmr.msra.gmra.mrb[12].mxu1 %v1145_v0  ;;  %v6665_v0 = vld [vmem:[#allocation34_spill] sm:$0xff] }
 0x3c0   :  { %3869 = vmatpush1.bf16.msra.mxu0 %v5310_v60  ;;  %3933 = vmatpush1.bf16.msra.mxu1 %v5327_v21 }
 0x3c1   :  { %3871 = vmatprep.subr.bf16.mxu0 %v5316_v2  ;;  %3935 = vmatprep.subr.bf16.mxu1 %v5333_v35 }
 0x3c4   :  { %3873 = vmatpush1.bf16.msra.mxu0 %v5323_v20  ;;  %3937 = vmatpush1.bf16.msra.mxu1 %v5340_v50 }
 0x3c5   :  { %3875 = vmatprep.subr.bf16.mxu0 %v5330_v28  ;;  %3939 = vmatprep.subr.bf16.mxu1 %v5346_v59 }
 0x3c8   :  { %3877 = vmatpush1.bf16.msra.mxu0 %v5337_v49  ;;  %3941 = vmatpush1.bf16.msra.mxu1 %v6646_v38 }
 0x3c9   :  { %3879 = vmatprep.subr.bf16.mxu0 %v6647_v39  ;;  %3943 = vmatprep.subr.bf16.mxu1 %v6648_v36 }
 0x3cc   :  { %3881 = vmatpush1.bf16.msra.mxu0 %v6649_v44  ;;  %3945 = vmatpush1.bf16.msra.mxu1 %v6650_v57 }
 0x3cd   :  { %3883 = vmatprep.subr.bf16.mxu0 %v6651_v63  ;;  %3947 = vmatprep.subr.bf16.mxu1 %v6652_v56  ;;  %v6702_v56 = vld [vmem:[#allocation69_spill] sm:$0xff] }
 0x3d0   :  { %3885 = vmatpush1.bf16.msra.mxu0 %v6653_v53  ;;  %3949 = vmatpush1.bf16.msra.mxu1 %v6654_v11  ;;  %v6701_v11 = vld [vmem:[#allocation68_spill] sm:$0xff] }
 0x3d1   :  { %3887 = vmatprep.subr.bf16.mxu0 %v6655_v32  ;;  %3951 = vmatprep.subr.bf16.mxu1 %v6656_v16  ;;  %v6666_v32 = vld [vmem:[#allocation35_spill] sm:$0xff]  ;;  %v6667_v16 = vld [vmem:[#allocation36_spill] sm:$0xff] }
 0x3d4   :  { %3889 = vmatpush1.bf16.msra.mxu0 %v6657_v3  ;;  %3953 = vmatpush1.bf16.msra.mxu1 %v6658_v5  ;;  %v6668_v3 = vld [vmem:[#allocation37_spill] sm:$0xff]  ;;  %v6669_v5 = vld [vmem:[#allocation38_spill] sm:$0xff] }
 0x3d5   :  { %3891 = vmatprep.subr.bf16.mxu0 %v6659_v12  ;;  %3955 = vmatprep.subr.bf16.mxu1 %v6660_v19  ;;  %v6670_v12 = vld [vmem:[#allocation39_spill] sm:$0xff]  ;;  %v6671_v19 = vld [vmem:[#allocation40_spill] sm:$0xff] }
 0x3d8   :  { %3893 = vmatpush1.bf16.msra.mxu0 %v6661_v40  ;;  %3957 = vmatpush1.bf16.msra.mxu1 %v6662_v29  ;;  %v6672_v40 = vld [vmem:[#allocation41_spill] sm:$0xff]  ;;  %v6673_v29 = vld [vmem:[#allocation42_spill] sm:$0xff] }
 0x3d9   :  { %3895 = vmatprep.subr.bf16.mxu0 %v6663_v22  ;;  %3959 = vmatprep.subr.bf16.mxu1 %v6664_v54  ;;  %v6674_v22 = vld [vmem:[#allocation43_spill] sm:$0xff]  ;;  %v6675_v54 = vld [vmem:[#allocation44_spill] sm:$0xff] }
 0x3dc   :  { %3897 = vmatpush1.bf16.msra.mxu0 %v6665_v0  ;;  %3961 = vmatpush1.bf16.msra.mxu1 %v6666_v32  ;;  %v6676_v0 = vld [vmem:[#allocation45_spill] sm:$0xff]  ;;  %v6677_v32 = vld [vmem:[#allocation46_spill] sm:$0xff] }
 0x3dd   :  { %3899 = vmatprep.subr.bf16.mxu0 %v6667_v16  ;;  %3963 = vmatprep.subr.bf16.mxu1 %v6668_v3  ;;  %v6678_v16 = vld [vmem:[#allocation47_spill] sm:$0xff]  ;;  %v6679_v3 = vld [vmem:[#allocation48_spill] sm:$0xff] }
 0x3e0   :  { %3901 = vmatpush1.bf16.msra.mxu0 %v6669_v5  ;;  %3965 = vmatpush1.bf16.msra.mxu1 %v6670_v12  ;;  %v6680_v5 = vld [vmem:[#allocation49_spill] sm:$0xff]  ;;  %v6681_v12 = vld [vmem:[#allocation50_spill] sm:$0xff] }
 0x3e1   :  { %3903 = vmatprep.subr.bf16.mxu0 %v6671_v19  ;;  %3967 = vmatprep.subr.bf16.mxu1 %v6672_v40  ;;  %v6682_v19 = vld [vmem:[#allocation51_spill] sm:$0xff]  ;;  %v6683_v40 = vld [vmem:[#allocation52_spill] sm:$0xff] }
 0x3e4   :  { %3905 = vmatpush1.bf16.msra.mxu0 %v6673_v29  ;;  %3969 = vmatpush1.bf16.msra.mxu1 %v6674_v22  ;;  %v6684_v29 = vld [vmem:[#allocation53_spill] sm:$0xff]  ;;  %v6685_v22 = vld [vmem:[#allocation54_spill] sm:$0xff] }
 0x3e5   :  { %3907 = vmatprep.subr.bf16.mxu0 %v6675_v54  ;;  %3971 = vmatprep.subr.bf16.mxu1 %v6676_v0  ;;  %v6686_v54 = vld [vmem:[#allocation55_spill] sm:$0xff]  ;;  %v6687_v0 = vld [vmem:[#allocation56_spill] sm:$0xff] }
 0x3e8   :  { %3909 = vmatpush1.bf16.msra.mxu0 %v6677_v32  ;;  %3973 = vmatpush1.bf16.msra.mxu1 %v6678_v16  ;;  %v6688_v32 = vld [vmem:[#allocation57_spill] sm:$0xff]  ;;  %v6689_v16 = vld [vmem:[#allocation58_spill] sm:$0xff] }
 0x3e9   :  { %3911 = vmatprep.subr.bf16.mxu0 %v6679_v3  ;;  %3975 = vmatprep.subr.bf16.mxu1 %v6680_v5  ;;  %v6690_v3 = vld [vmem:[#allocation59_spill] sm:$0xff]  ;;  %v6691_v5 = vld [vmem:[#allocation60_spill] sm:$0xff] }
 0x3ec   :  { %3913 = vmatpush1.bf16.msra.mxu0 %v6681_v12  ;;  %3977 = vmatpush1.bf16.msra.mxu1 %v6682_v19  ;;  %v6692_v12 = vld [vmem:[#allocation61_spill] sm:$0xff]  ;;  %v6693_v19 = vld [vmem:[#allocation62_spill] sm:$0xff] }
 0x3ed   :  { %3915 = vmatprep.subr.bf16.mxu0 %v6683_v40  ;;  %3979 = vmatprep.subr.bf16.mxu1 %v6684_v29  ;;  %v6694_v40 = vld [vmem:[#allocation63_spill] sm:$0xff]  ;;  %v6695_v29 = vld [vmem:[#allocation64_spill] sm:$0xff] }
 0x3f0   :  { %3917 = vmatpush1.bf16.msra.mxu0 %v6685_v22  ;;  %3981 = vmatpush1.bf16.msra.mxu1 %v6686_v54  ;;  %v6696_v22 = vld [vmem:[#allocation65_spill] sm:$0xff]  ;;  %v6697_v54 = vld [vmem:[#allocation66_spill] sm:$0xff] }
 0x3f1   :  { %3919 = vmatprep.subr.bf16.mxu0 %v6687_v0  ;;  %3983 = vmatprep.subr.bf16.mxu1 %v6688_v32  ;;  %v6698_v0 = vld [vmem:[#allocation67_spill] sm:$0xff]  ;;  %v6699_v32 = vld [vmem:[#allocation13_spill] sm:$0xff] }
 0x3f4   :  { %3921 = vmatpush1.bf16.msra.mxu0 %v6689_v16  ;;  %3985 = vmatpush1.bf16.msra.mxu1 %v6690_v3  ;;  %v6700_v16 = vld [vmem:[#allocation14_spill] sm:$0xff] }
 0x3f5   :  { %3923 = vmatprep.subr.bf16.mxu0 %v6691_v5  ;;  %3987 = vmatprep.subr.bf16.mxu1 %v6692_v12 }
 0x3f8   :  { %3925 = vmatpush1.bf16.msra.mxu0 %v6693_v19  ;;  %3989 = vmatpush1.bf16.msra.mxu1 %v6694_v40 }
 0x3f9   :  { %3927 = vmatprep.subr.bf16.mxu0 %v6695_v29  ;;  %3991 = vmatprep.subr.bf16.mxu1 %v6696_v22  ;;  %v6703_v22 = vld [vmem:[#allocation70_spill] sm:$0xff] }
 0x3fc   :  { %3929 = vmatpush1.bf16.msra.mxu0 %v6697_v54  ;;  %3993 = vmatpush1.bf16.msra.mxu1 %v6698_v0  ;;  %v6704_v0 = vld [vmem:[#allocation71_spill] sm:$0xff] }
 0x3fd   :  { %3995 = vmatprep.subr.bf16.mxu0 %v6699_v32  ;;  %4027 = vmatprep.subr.bf16.mxu1 %v6700_v16 }
 0x472   :  { %v1212_v3 = vpop.f32.mrb[10].mxu0  ;;  %v1283_v5 = vpop.f32.mrb[10].mxu1 }
 0x473   :  { %v1213_v12 = vadd.f32 %v1212_v3, %v6701_v11  ;;  %v1214_v53 = vpop.f32.mrb[11].mxu0  ;;  %v1285_v19 = vpop.f32.mrb[11].mxu1  ;;  %v1284_v44 = vadd.f32 %v1283_v5, %v6704_v0 }
 0x474   :  { %v1215_v40 = vadd.f32 %v1214_v53, %v6702_v56  ;;  %v1286_v54 = vadd.f32 %v1285_v19, %v6703_v22  ;;  %v1313_v19 = vld [vmem:[#allocation6 + $0x60] sm:$0xff] }
 0x475   :  { %v3140_v63 = vmul.f32 -1.442695, %v1213_v12 }
 0x476   :  { %v3141_v29 = vmul.f32 -1.442695, %v1215_v40  ;;  %v3142_v57 = vmul.f32 -1.442695, %v1286_v54  ;;  %v1314_v54 = vld [vmem:[#allocation6 + $0x68] sm:$0xff] }
 0x477   :  { %4874 = vpow2.f32 %v3140_v63 }
 0x478   :  { %4876 = vpow2.f32 %v3141_v29 }
 0x479   :  { %4878 = vpow2.f32 %v3142_v57 }
 0x47a   :  { %4880 = vtanh.f32 %v1284_v44 }
 0x481   :  { %v4875_v32 = vpop.eup %4874 }
 0x482   :  { %v4877_v36 = vpop.eup %4876  ;;  %v1291_v16 = vadd.f32 1.0, %v4875_v32 }
 0x483   :  { %v1297_v39 = vadd.f32 1.0, %v4877_v36  ;;  %v4879_v3 = vpop.eup %4878 }
 0x484   :  { %4882 = vrcp.f32 %v1291_v16  ;;  %v4881_v11 = vpop.eup %4880  ;;  %v1304_v63 = vadd.f32 1.0, %v4879_v3 }
 0x485   :  { %4884 = vrcp.f32 %v1297_v39 }
 0x486   :  { %4886 = vrcp.f32 %v1304_v63 }
 0x48e   :  { %v4883_v53 = vpop.eup %4882 }
 0x48f   :  { %v4885_v12 = vpop.eup %4884  ;;  %v1308_v40 = vmul.f32 %v4883_v53, %v4881_v11  ;;  %v1316_v11 = vld [vmem:[#allocation6 + $0x78] sm:$0xff] }
 0x490   :  { %v1307_v29 = vmul.f32 %v4885_v12, %v5737_v23  ;;  %v1315_v23 = vld [vmem:[#allocation6 + $0x70] sm:$0xff]  ;;  %v4887_v53 = vpop.eup %4886 }
 0x492   :  { %v1383_v22 = vpop.f32.mrb[12].mxu0  ;;  %v1454_v5 = vpop.f32.mrb[12].mxu1  ;;  %v5847_v0 = vadd.f32 %v1308_v40, %v1307_v29 }
 0x493   :  { %v1459_v57 = vadd.f32 %v1383_v22, %v1313_v19  ;;  %v1385_v44 = vpop.f32.mrb[13].mxu0  ;;  %v1456_v36 = vpop.f32.mrb[13].mxu1  ;;  %v1461_v38 = vadd.f32 %v1454_v5, %v1315_v23  ;;  %v6707_v23 = vld [vmem:[#allocation19_spill] sm:$0xff] }
 0x494   :  { %v1460_v32 = vadd.f32 %v1385_v44, %v1314_v54  ;;  %4888 = vtanh.f32 %v5847_v0  ;;  %v1462_v3 = vadd.f32 %v1456_v36, %v1316_v11 }
 0x495   :  { %v3143_v39 = vmul.f32 -1.442695, %v1459_v57 }
 0x496   :  { %v3144_v16 = vmul.f32 -1.442695, %v1460_v32  ;;  %v3145_v56 = vmul.f32 -1.442695, %v1462_v3 }
 0x497   :  { %4890 = vpow2.f32 %v3143_v39 }
 0x498   :  { %4892 = vpow2.f32 %v3144_v16 }
 0x499   :  { %4894 = vpow2.f32 %v3145_v56 }
 0x49a   :  { %4896 = vtanh.f32 %v1461_v38  ;;  %v6706_v38 = vld [vmem:[#allocation15_spill] sm:$0xff] }
 0x49e   :  { %v4889_v12 = vpop.eup %4888 }
 0x49f   :  { %v1311_v40 = vmul.f32 %v4889_v12, %v4887_v53  ;;  %v6708_v53 = vld [vmem:[#allocation16_spill] sm:$0xff]  ;;  %v6709_v12 = vld [vmem:[#allocation21_spill] sm:$0xff] }
 0x4a1   :  { %v4891_v29 = vpop.eup %4890  ;;  %1551 = vmatprep.mubr.f32.mxu0 %v1311_v40  ;;  %1622 = vmatprep.mubr.f32.mxu1 %v1311_v40  ;;  %v6710_v40 = vld [vmem:[#allocation18_spill] sm:$0xff] }
 0x4a2   :  { %v4893_v22 = vpop.eup %4892  ;;  %v1466_v63 = vadd.f32 1.0, %v4891_v29  ;;  %v6711_v29 = vld [vmem:[#allocation22_spill] sm:$0xff] }
 0x4a3   :  { %v1472_v19 = vadd.f32 1.0, %v4893_v22  ;;  %v4895_v54 = vpop.eup %4894  ;;  %v6712_v22 = vld [vmem:[#allocation20_spill] sm:$0xff] }
 0x4a4   :  { %4898 = vrcp.f32 %v1466_v63  ;;  %v4897_v57 = vpop.eup %4896  ;;  %v1479_v39 = vadd.f32 1.0, %v4895_v54  ;;  %v6713_v63 = vld [vmem:[#allocation23_spill] sm:$0xff]  ;;  %v6715_v54 = vld [vmem:[#allocation25_spill] sm:$0xff] }
 0x4a5   :  { %4900 = vrcp.f32 %v1472_v19  ;;  %v6714_v19 = vld [vmem:[#allocation24_spill] sm:$0xff] }
 0x4a6   :  { %4902 = vrcp.f32 %v1479_v39  ;;  %v6720_v39 = vld [vmem:[#allocation30_spill] sm:$0xff] }
 0x4ae   :  { %v4899_v44 = vpop.eup %4898 }
 0x4af   :  { %v4901_v36 = vpop.eup %4900  ;;  %v1483_v32 = vmul.f32 %v4899_v44, %v4897_v57  ;;  %v6716_v57 = vld [vmem:[#allocation26_spill] sm:$0xff]  ;;  %v6717_v44 = vld [vmem:[#allocation27_spill] sm:$0xff] }
 0x4b0   :  { %v1482_v16 = vmul.f32 %v4901_v36, %v5741_v13  ;;  %v4903_v11 = vpop.eup %4902  ;;  %v6705_v13 = vld [vmem:[#allocation17_spill] sm:$0xff]  ;;  %v6718_v36 = vld [vmem:[#allocation28_spill] sm:$0xff] }
 0x4b2   :  { %v5851_v5 = vadd.f32 %v1483_v32, %v1482_v16  ;;  %v6719_v32 = vld [vmem:[#allocation29_spill] sm:$0xff]  ;;  %v6721_v16 = vld [vmem:[#allocation31_spill] sm:$0xff] }
 0x4b4   :  { %4904 = vtanh.f32 %v5851_v5 }
 0x4be   :  { %v4905_v3 = vpop.eup %4904 }
 0x4bf   :  { %v1486_v56 = vmul.f32 %v4905_v3, %v4903_v11  ;;  %v6722_v11 = vld [vmem:[#allocation32_spill] sm:$0xff]  ;;  %v6723_v3 = vld [vmem:[#allocation33_spill] sm:$0xff] }
 0x4c1   :  { %1552 = vmatmul.mubr.f32.vlgmr.msra.gmra.mrb[14].mxu0 %v1486_v56  ;;  %1623 = vmatmul.mubr.f32.vlgmr.msra.gmra.mrb[14].mxu1 %v1486_v56 }
 0x4c2   :  { %3997 = vmatpush1.bf16.msra.mxu0 %v5219_v8  ;;  %4029 = vmatpush1.bf16.msra.mxu1 %v5232_v25 }
 0x4c3   :  { %3999 = vmatprep.subr.bf16.mxu0 %v5221_v9  ;;  %4031 = vmatprep.subr.bf16.mxu1 %v5242_v33 }
 0x4c4   :  { %1722 = vmatprep.mubr.f32.mxu0 %v6531_v4  ;;  %1793 = vmatprep.mubr.f32.mxu1 %v6531_v4 }
 0x4c6   :  { %4001 = vmatpush1.bf16.msra.mxu0 %v5225_v14  ;;  %4033 = vmatpush1.bf16.msra.mxu1 %v5244_v37 }
 0x4c7   :  { %4003 = vmatprep.subr.bf16.mxu0 %v5228_v17  ;;  %4035 = vmatprep.subr.bf16.mxu1 %v5250_v45 }
 0x4ca   :  { %4005 = vmatpush1.bf16.msra.mxu0 %v5235_v26  ;;  %4037 = vmatpush1.bf16.msra.mxu1 %v5256_v48 }
 0x4cb   :  { %4007 = vmatprep.subr.bf16.mxu0 %v5239_v30  ;;  %4039 = vmatprep.subr.bf16.mxu1 %v5259_v52 }
 0x4ce   :  { %4009 = vmatpush1.bf16.msra.mxu0 %v5248_v42  ;;  %4041 = vmatpush1.bf16.msra.mxu1 %v5268_v62 }
 0x4cf   :  { %4011 = vmatprep.subr.bf16.mxu0 %v5253_v46  ;;  %4043 = vmatprep.subr.bf16.mxu1 %v5271_v1 }
 0x4d2   :  { %4013 = vmatpush1.bf16.msra.mxu0 %v5262_v55  ;;  %4045 = vmatpush1.bf16.msra.mxu1 %v5280_v15 }
 0x4d3   :  { %4015 = vmatprep.subr.bf16.mxu0 %v5265_v58  ;;  %4047 = vmatprep.subr.bf16.mxu1 %v5283_v18 }
 0x4d6   :  { %4017 = vmatpush1.bf16.msra.mxu0 %v5274_v7  ;;  %4049 = vmatpush1.bf16.msra.mxu1 %v5292_v31 }
 0x4d7   :  { %4019 = vmatprep.subr.bf16.mxu0 %v5277_v10  ;;  %4051 = vmatprep.subr.bf16.mxu1 %v5295_v34 }
 0x4da   :  { %4021 = vmatpush1.bf16.msra.mxu0 %v5286_v24  ;;  %4053 = vmatpush1.bf16.msra.mxu1 %v5302_v43 }
 0x4db   :  { %4023 = vmatprep.subr.bf16.mxu0 %v5289_v27  ;;  %4055 = vmatprep.subr.bf16.mxu1 %v5307_v51 }
 0x4de   :  { %4025 = vmatpush1.bf16.msra.mxu0 %v5298_v41  ;;  %4057 = vmatpush1.bf16.msra.mxu1 %v5313_v61 }
 0x4df   :  { %4059 = vmatprep.subr.bf16.mxu0 %v5304_v47  ;;  %4123 = vmatprep.subr.bf16.mxu1 %v5319_v6 }
 0x4e1   :  { %1723 = vmatmul.mubr.f32.vlgmr.msra.gmra.mrb[16].mxu0 %v1486_v56  ;;  %1794 = vmatmul.mubr.f32.vlgmr.msra.gmra.mrb[16].mxu1 %v1486_v56  ;;  %v6724_v56 = vld [vmem:[#allocation34_spill] sm:$0xff] }
 0x4e2   :  { %4061 = vmatpush1.bf16.msra.mxu0 %v5310_v60  ;;  %4125 = vmatpush1.bf16.msra.mxu1 %v5327_v21 }
 0x4e3   :  { %4063 = vmatprep.subr.bf16.mxu0 %v5316_v2  ;;  %4127 = vmatprep.subr.bf16.mxu1 %v5333_v35 }
 0x4e6   :  { %4065 = vmatpush1.bf16.msra.mxu0 %v5323_v20  ;;  %4129 = vmatpush1.bf16.msra.mxu1 %v5340_v50 }
 0x4e7   :  { %4067 = vmatprep.subr.bf16.mxu0 %v5330_v28  ;;  %4131 = vmatprep.subr.bf16.mxu1 %v5346_v59 }
 0x4ea   :  { %4069 = vmatpush1.bf16.msra.mxu0 %v5337_v49  ;;  %4133 = vmatpush1.bf16.msra.mxu1 %v6705_v13 }
 0x4eb   :  { %4071 = vmatprep.subr.bf16.mxu0 %v6706_v38  ;;  %4135 = vmatprep.subr.bf16.mxu1 %v6707_v23 }
 0x4ee   :  { %4073 = vmatpush1.bf16.msra.mxu0 %v6708_v53  ;;  %4137 = vmatpush1.bf16.msra.mxu1 %v6709_v12 }
 0x4ef   :  { %4075 = vmatprep.subr.bf16.mxu0 %v6710_v40  ;;  %4139 = vmatprep.subr.bf16.mxu1 %v6711_v29  ;;  %v6761_v29 = vld [vmem:[#allocation69_spill] sm:$0xff] }
 0x4f2   :  { %4077 = vmatpush1.bf16.msra.mxu0 %v6712_v22  ;;  %4141 = vmatpush1.bf16.msra.mxu1 %v6713_v63  ;;  %v6760_v63 = vld [vmem:[#allocation68_spill] sm:$0xff] }
 0x4f3   :  { %4079 = vmatprep.subr.bf16.mxu0 %v6714_v19  ;;  %4143 = vmatprep.subr.bf16.mxu1 %v6715_v54  ;;  %v6725_v19 = vld [vmem:[#allocation35_spill] sm:$0xff]  ;;  %v6726_v54 = vld [vmem:[#allocation36_spill] sm:$0xff] }
 0x4f6   :  { %4081 = vmatpush1.bf16.msra.mxu0 %v6716_v57  ;;  %4145 = vmatpush1.bf16.msra.mxu1 %v6717_v44  ;;  %v6727_v57 = vld [vmem:[#allocation37_spill] sm:$0xff]  ;;  %v6728_v44 = vld [vmem:[#allocation38_spill] sm:$0xff] }
 0x4f7   :  { %4083 = vmatprep.subr.bf16.mxu0 %v6718_v36  ;;  %4147 = vmatprep.subr.bf16.mxu1 %v6719_v32  ;;  %v6729_v36 = vld [vmem:[#allocation39_spill] sm:$0xff]  ;;  %v6730_v32 = vld [vmem:[#allocation40_spill] sm:$0xff] }
 0x4fa   :  { %4085 = vmatpush1.bf16.msra.mxu0 %v6720_v39  ;;  %4149 = vmatpush1.bf16.msra.mxu1 %v6721_v16  ;;  %v6731_v39 = vld [vmem:[#allocation41_spill] sm:$0xff]  ;;  %v6732_v16 = vld [vmem:[#allocation42_spill] sm:$0xff] }
 0x4fb   :  { %4087 = vmatprep.subr.bf16.mxu0 %v6722_v11  ;;  %4151 = vmatprep.subr.bf16.mxu1 %v6723_v3  ;;  %v6733_v11 = vld [vmem:[#allocation43_spill] sm:$0xff]  ;;  %v6734_v3 = vld [vmem:[#allocation44_spill] sm:$0xff] }
 0x4fe   :  { %4089 = vmatpush1.bf16.msra.mxu0 %v6724_v56  ;;  %4153 = vmatpush1.bf16.msra.mxu1 %v6725_v19  ;;  %v6735_v56 = vld [vmem:[#allocation45_spill] sm:$0xff]  ;;  %v6736_v19 = vld [vmem:[#allocation46_spill] sm:$0xff] }
 0x4ff   :  { %4091 = vmatprep.subr.bf16.mxu0 %v6726_v54  ;;  %4155 = vmatprep.subr.bf16.mxu1 %v6727_v57  ;;  %v6737_v54 = vld [vmem:[#allocation47_spill] sm:$0xff]  ;;  %v6738_v57 = vld [vmem:[#allocation48_spill] sm:$0xff] }
 0x502   :  { %4093 = vmatpush1.bf16.msra.mxu0 %v6728_v44  ;;  %4157 = vmatpush1.bf16.msra.mxu1 %v6729_v36  ;;  %v6739_v44 = vld [vmem:[#allocation49_spill] sm:$0xff]  ;;  %v6740_v36 = vld [vmem:[#allocation50_spill] sm:$0xff] }
 0x503   :  { %4095 = vmatprep.subr.bf16.mxu0 %v6730_v32  ;;  %4159 = vmatprep.subr.bf16.mxu1 %v6731_v39  ;;  %v6741_v32 = vld [vmem:[#allocation51_spill] sm:$0xff]  ;;  %v6742_v39 = vld [vmem:[#allocation52_spill] sm:$0xff] }
 0x506   :  { %4097 = vmatpush1.bf16.msra.mxu0 %v6732_v16  ;;  %4161 = vmatpush1.bf16.msra.mxu1 %v6733_v11  ;;  %v6743_v16 = vld [vmem:[#allocation53_spill] sm:$0xff]  ;;  %v6744_v11 = vld [vmem:[#allocation54_spill] sm:$0xff] }
 0x507   :  { %4099 = vmatprep.subr.bf16.mxu0 %v6734_v3  ;;  %4163 = vmatprep.subr.bf16.mxu1 %v6735_v56  ;;  %v6745_v3 = vld [vmem:[#allocation55_spill] sm:$0xff]  ;;  %v6746_v56 = vld [vmem:[#allocation56_spill] sm:$0xff] }
 0x50a   :  { %4101 = vmatpush1.bf16.msra.mxu0 %v6736_v19  ;;  %4165 = vmatpush1.bf16.msra.mxu1 %v6737_v54  ;;  %v6747_v19 = vld [vmem:[#allocation57_spill] sm:$0xff]  ;;  %v6748_v54 = vld [vmem:[#allocation58_spill] sm:$0xff] }
 0x50b   :  { %4103 = vmatprep.subr.bf16.mxu0 %v6738_v57  ;;  %4167 = vmatprep.subr.bf16.mxu1 %v6739_v44  ;;  %v6749_v57 = vld [vmem:[#allocation59_spill] sm:$0xff]  ;;  %v6750_v44 = vld [vmem:[#allocation60_spill] sm:$0xff] }
 0x50e   :  { %4105 = vmatpush1.bf16.msra.mxu0 %v6740_v36  ;;  %4169 = vmatpush1.bf16.msra.mxu1 %v6741_v32  ;;  %v6751_v36 = vld [vmem:[#allocation61_spill] sm:$0xff]  ;;  %v6752_v32 = vld [vmem:[#allocation62_spill] sm:$0xff] }
 0x50f   :  { %4107 = vmatprep.subr.bf16.mxu0 %v6742_v39  ;;  %4171 = vmatprep.subr.bf16.mxu1 %v6743_v16  ;;  %v6753_v39 = vld [vmem:[#allocation63_spill] sm:$0xff]  ;;  %v6754_v16 = vld [vmem:[#allocation64_spill] sm:$0xff] }
 0x512   :  { %4109 = vmatpush1.bf16.msra.mxu0 %v6744_v11  ;;  %4173 = vmatpush1.bf16.msra.mxu1 %v6745_v3  ;;  %v6755_v11 = vld [vmem:[#allocation65_spill] sm:$0xff]  ;;  %v6756_v3 = vld [vmem:[#allocation66_spill] sm:$0xff] }
 0x513   :  { %4111 = vmatprep.subr.bf16.mxu0 %v6746_v56  ;;  %4175 = vmatprep.subr.bf16.mxu1 %v6747_v19  ;;  %v6757_v56 = vld [vmem:[#allocation67_spill] sm:$0xff]  ;;  %v6758_v19 = vld [vmem:[#allocation13_spill] sm:$0xff] }
 0x516   :  { %4113 = vmatpush1.bf16.msra.mxu0 %v6748_v54  ;;  %4177 = vmatpush1.bf16.msra.mxu1 %v6749_v57  ;;  %v6759_v54 = vld [vmem:[#allocation14_spill] sm:$0xff] }
 0x517   :  { %4115 = vmatprep.subr.bf16.mxu0 %v6750_v44  ;;  %4179 = vmatprep.subr.bf16.mxu1 %v6751_v36 }
 0x51a   :  { %4117 = vmatpush1.bf16.msra.mxu0 %v6752_v32  ;;  %4181 = vmatpush1.bf16.msra.mxu1 %v6753_v39 }
 0x51b   :  { %4119 = vmatprep.subr.bf16.mxu0 %v6754_v16  ;;  %4183 = vmatprep.subr.bf16.mxu1 %v6755_v11  ;;  %v6762_v11 = vld [vmem:[#allocation70_spill] sm:$0xff] }
 0x51e   :  { %4121 = vmatpush1.bf16.msra.mxu0 %v6756_v3  ;;  %4185 = vmatpush1.bf16.msra.mxu1 %v6757_v56  ;;  %v6763_v56 = vld [vmem:[#allocation71_spill] sm:$0xff] }
 0x51f   :  { %4187 = vmatprep.subr.bf16.mxu0 %v6758_v19  ;;  %4219 = vmatprep.subr.bf16.mxu1 %v6759_v54 }
 0x594   :  { %v1553_v57 = vpop.f32.mrb[14].mxu0  ;;  %v1624_v44 = vpop.f32.mrb[14].mxu1 }
 0x595   :  { %v1554_v36 = vadd.f32 %v1553_v57, %v6760_v63  ;;  %v1555_v22 = vpop.f32.mrb[15].mxu0  ;;  %v1626_v32 = vpop.f32.mrb[15].mxu1  ;;  %v1625_v53 = vadd.f32 %v1624_v44, %v6763_v56 }
 0x596   :  { %v1556_v39 = vadd.f32 %v1555_v22, %v6761_v29  ;;  %v1627_v3 = vadd.f32 %v1626_v32, %v6762_v11  ;;  %v1654_v32 = vld [vmem:[#allocation6 + $0x80] sm:$0xff] }
 0x597   :  { %v3146_v40 = vmul.f32 -1.442695, %v1554_v36 }
 0x598   :  { %v3147_v16 = vmul.f32 -1.442695, %v1556_v39  ;;  %v3148_v12 = vmul.f32 -1.442695, %v1627_v3  ;;  %v1655_v3 = vld [vmem:[#allocation6 + $0x88] sm:$0xff] }
 0x599   :  { %4906 = vpow2.f32 %v3146_v40 }
 0x59a   :  { %4908 = vpow2.f32 %v3147_v16 }
 0x59b   :  { %4910 = vpow2.f32 %v3148_v12 }
 0x59c   :  { %4912 = vtanh.f32 %v1625_v53 }
 0x5a3   :  { %v4907_v19 = vpop.eup %4906 }
 0x5a4   :  { %v4909_v23 = vpop.eup %4908  ;;  %v1632_v54 = vadd.f32 1.0, %v4907_v19 }
 0x5a5   :  { %v1638_v38 = vadd.f32 1.0, %v4909_v23  ;;  %v4911_v57 = vpop.eup %4910 }
 0x5a6   :  { %4914 = vrcp.f32 %v1632_v54  ;;  %v4913_v63 = vpop.eup %4912  ;;  %v1645_v40 = vadd.f32 1.0, %v4911_v57 }
 0x5a7   :  { %4916 = vrcp.f32 %v1638_v38 }
 0x5a8   :  { %4918 = vrcp.f32 %v1645_v40 }
 0x5b0   :  { %v4915_v22 = vpop.eup %4914 }
 0x5b1   :  { %v4917_v36 = vpop.eup %4916  ;;  %v1649_v39 = vmul.f32 %v4915_v22, %v4913_v63  ;;  %v1657_v63 = vld [vmem:[#allocation6 + $0x98] sm:$0xff] }
 0x5b2   :  { %v1648_v16 = vmul.f32 %v4917_v36, %v5847_v0  ;;  %v1656_v0 = vld [vmem:[#allocation6 + $0x90] sm:$0xff]  ;;  %v4919_v22 = vpop.eup %4918 }
 0x5b4   :  { %v1724_v11 = vpop.f32.mrb[16].mxu0  ;;  %v1795_v44 = vpop.f32.mrb[16].mxu1  ;;  %v5957_v56 = vadd.f32 %v1649_v39, %v1648_v16 }
 0x5b5   :  { %v1800_v12 = vadd.f32 %v1724_v11, %v1654_v32  ;;  %v1726_v53 = vpop.f32.mrb[17].mxu0  ;;  %v1797_v23 = vpop.f32.mrb[17].mxu1  ;;  %v1802_v13 = vadd.f32 %v1795_v44, %v1656_v0  ;;  %v6766_v0 = vld [vmem:[#allocation19_spill] sm:$0xff] }
 0x5b6   :  { %v1801_v19 = vadd.f32 %v1726_v53, %v1655_v3  ;;  %4920 = vtanh.f32 %v5957_v56  ;;  %v1803_v57 = vadd.f32 %v1797_v23, %v1657_v63 }
 0x5b7   :  { %v3149_v38 = vmul.f32 -1.442695, %v1800_v12 }
 0x5b8   :  { %v3150_v54 = vmul.f32 -1.442695, %v1801_v19  ;;  %v3151_v29 = vmul.f32 -1.442695, %v1803_v57 }
 0x5b9   :  { %4922 = vpow2.f32 %v3149_v38 }
 0x5ba   :  { %4924 = vpow2.f32 %v3150_v54 }
 0x5bb   :  { %4926 = vpow2.f32 %v3151_v29 }
 0x5bc   :  { %4928 = vtanh.f32 %v1802_v13  ;;  %v6765_v13 = vld [vmem:[#allocation15_spill] sm:$0xff] }
 0x5c0   :  { %v4921_v36 = vpop.eup %4920 }
 0x5c1   :  { %v1652_v39 = vmul.f32 %v4921_v36, %v4919_v22  ;;  %v6767_v22 = vld [vmem:[#allocation16_spill] sm:$0xff]  ;;  %v6768_v36 = vld [vmem:[#allocation21_spill] sm:$0xff] }
 0x5c3   :  { %v4923_v16 = vpop.eup %4922  ;;  %1892 = vmatprep.mubr.f32.mxu0 %v1652_v39  ;;  %1963 = vmatprep.mubr.f32.mxu1 %v1652_v39  ;;  %v6769_v39 = vld [vmem:[#allocation18_spill] sm:$0xff] }
 0x5c4   :  { %v4925_v11 = vpop.eup %4924  ;;  %v1807_v40 = vadd.f32 1.0, %v4923_v16  ;;  %v6770_v16 = vld [vmem:[#allocation22_spill] sm:$0xff] }
 0x5c5   :  { %v1813_v32 = vadd.f32 1.0, %v4925_v11  ;;  %v4927_v3 = vpop.eup %4926  ;;  %v6771_v11 = vld [vmem:[#allocation20_spill] sm:$0xff] }
 0x5c6   :  { %4930 = vrcp.f32 %v1807_v40  ;;  %v4929_v12 = vpop.eup %4928  ;;  %v1820_v38 = vadd.f32 1.0, %v4927_v3  ;;  %v6772_v40 = vld [vmem:[#allocation23_spill] sm:$0xff]  ;;  %v6774_v3 = vld [vmem:[#allocation25_spill] sm:$0xff] }
 0x5c7   :  { %4932 = vrcp.f32 %v1813_v32  ;;  %v6773_v32 = vld [vmem:[#allocation24_spill] sm:$0xff] }
 0x5c8   :  { %4934 = vrcp.f32 %v1820_v38  ;;  %v6779_v38 = vld [vmem:[#allocation30_spill] sm:$0xff] }
 0x5d0   :  { %v4931_v53 = vpop.eup %4930 }
 0x5d1   :  { %v4933_v23 = vpop.eup %4932  ;;  %v1824_v19 = vmul.f32 %v4931_v53, %v4929_v12  ;;  %v6775_v12 = vld [vmem:[#allocation26_spill] sm:$0xff]  ;;  %v6776_v53 = vld [vmem:[#allocation27_spill] sm:$0xff] }
 0x5d2   :  { %v1823_v54 = vmul.f32 %v4933_v23, %v5851_v5  ;;  %v4935_v63 = vpop.eup %4934  ;;  %v6764_v5 = vld [vmem:[#allocation17_spill] sm:$0xff]  ;;  %v6777_v23 = vld [vmem:[#allocation28_spill] sm:$0xff] }
 0x5d4   :  { %v5961_v44 = vadd.f32 %v1824_v19, %v1823_v54  ;;  %v6778_v19 = vld [vmem:[#allocation29_spill] sm:$0xff]  ;;  %v6780_v54 = vld [vmem:[#allocation31_spill] sm:$0xff] }
 0x5d6   :  { %4936 = vtanh.f32 %v5961_v44 }
 0x5e0   :  { %v4937_v57 = vpop.eup %4936 }
 0x5e1   :  { %v1827_v29 = vmul.f32 %v4937_v57, %v4935_v63  ;;  %v6781_v63 = vld [vmem:[#allocation32_spill] sm:$0xff]  ;;  %v6782_v57 = vld [vmem:[#allocation33_spill] sm:$0xff] }
 0x5e3   :  { %1893 = vmatmul.mubr.f32.vlgmr.msra.gmra.mrb[18].mxu0 %v1827_v29  ;;  %1964 = vmatmul.mubr.f32.vlgmr.msra.gmra.mrb[18].mxu1 %v1827_v29 }
 0x5e4   :  { %4189 = vmatpush1.bf16.msra.mxu0 %v5219_v8  ;;  %4221 = vmatpush1.bf16.msra.mxu1 %v5232_v25 }
 0x5e5   :  { %4191 = vmatprep.subr.bf16.mxu0 %v5221_v9  ;;  %4223 = vmatprep.subr.bf16.mxu1 %v5242_v33 }
 0x5e6   :  { %2063 = vmatprep.mubr.f32.mxu0 %v6531_v4  ;;  %2134 = vmatprep.mubr.f32.mxu1 %v6531_v4 }
 0x5e8   :  { %4193 = vmatpush1.bf16.msra.mxu0 %v5225_v14  ;;  %4225 = vmatpush1.bf16.msra.mxu1 %v5244_v37 }
 0x5e9   :  { %4195 = vmatprep.subr.bf16.mxu0 %v5228_v17  ;;  %4227 = vmatprep.subr.bf16.mxu1 %v5250_v45 }
 0x5ec   :  { %4197 = vmatpush1.bf16.msra.mxu0 %v5235_v26  ;;  %4229 = vmatpush1.bf16.msra.mxu1 %v5256_v48 }
 0x5ed   :  { %4199 = vmatprep.subr.bf16.mxu0 %v5239_v30  ;;  %4231 = vmatprep.subr.bf16.mxu1 %v5259_v52 }
 0x5f0   :  { %4201 = vmatpush1.bf16.msra.mxu0 %v5248_v42  ;;  %4233 = vmatpush1.bf16.msra.mxu1 %v5268_v62 }
 0x5f1   :  { %4203 = vmatprep.subr.bf16.mxu0 %v5253_v46  ;;  %4235 = vmatprep.subr.bf16.mxu1 %v5271_v1 }
 0x5f4   :  { %4205 = vmatpush1.bf16.msra.mxu0 %v5262_v55  ;;  %4237 = vmatpush1.bf16.msra.mxu1 %v5280_v15 }
 0x5f5   :  { %4207 = vmatprep.subr.bf16.mxu0 %v5265_v58  ;;  %4239 = vmatprep.subr.bf16.mxu1 %v5283_v18 }
 0x5f8   :  { %4209 = vmatpush1.bf16.msra.mxu0 %v5274_v7  ;;  %4241 = vmatpush1.bf16.msra.mxu1 %v5292_v31 }
 0x5f9   :  { %4211 = vmatprep.subr.bf16.mxu0 %v5277_v10  ;;  %4243 = vmatprep.subr.bf16.mxu1 %v5295_v34 }
 0x5fc   :  { %4213 = vmatpush1.bf16.msra.mxu0 %v5286_v24  ;;  %4245 = vmatpush1.bf16.msra.mxu1 %v5302_v43 }
 0x5fd   :  { %4215 = vmatprep.subr.bf16.mxu0 %v5289_v27  ;;  %4247 = vmatprep.subr.bf16.mxu1 %v5307_v51 }
 0x600   :  { %4217 = vmatpush1.bf16.msra.mxu0 %v5298_v41  ;;  %4249 = vmatpush1.bf16.msra.mxu1 %v5313_v61 }
 0x601   :  { %4251 = vmatprep.subr.bf16.mxu0 %v5304_v47  ;;  %4315 = vmatprep.subr.bf16.mxu1 %v5319_v6 }
 0x603   :  { %2064 = vmatmul.mubr.f32.vlgmr.msra.gmra.mrb[20].mxu0 %v1827_v29  ;;  %2135 = vmatmul.mubr.f32.vlgmr.msra.gmra.mrb[20].mxu1 %v1827_v29  ;;  %v6783_v29 = vld [vmem:[#allocation34_spill] sm:$0xff] }
 0x604   :  { %4253 = vmatpush1.bf16.msra.mxu0 %v5310_v60  ;;  %4317 = vmatpush1.bf16.msra.mxu1 %v5327_v21 }
 0x605   :  { %4255 = vmatprep.subr.bf16.mxu0 %v5316_v2  ;;  %4319 = vmatprep.subr.bf16.mxu1 %v5333_v35 }
 0x608   :  { %4257 = vmatpush1.bf16.msra.mxu0 %v5323_v20  ;;  %4321 = vmatpush1.bf16.msra.mxu1 %v5340_v50 }
 0x609   :  { %4259 = vmatprep.subr.bf16.mxu0 %v5330_v28  ;;  %4323 = vmatprep.subr.bf16.mxu1 %v5346_v59 }
 0x60c   :  { %4261 = vmatpush1.bf16.msra.mxu0 %v5337_v49  ;;  %4325 = vmatpush1.bf16.msra.mxu1 %v6764_v5 }
 0x60d   :  { %4263 = vmatprep.subr.bf16.mxu0 %v6765_v13  ;;  %4327 = vmatprep.subr.bf16.mxu1 %v6766_v0 }
 0x610   :  { %4265 = vmatpush1.bf16.msra.mxu0 %v6767_v22  ;;  %4329 = vmatpush1.bf16.msra.mxu1 %v6768_v36 }
 0x611   :  { %4267 = vmatprep.subr.bf16.mxu0 %v6769_v39  ;;  %4331 = vmatprep.subr.bf16.mxu1 %v6770_v16  ;;  %v6820_v16 = vld [vmem:[#allocation69_spill] sm:$0xff] }
 0x614   :  { %4269 = vmatpush1.bf16.msra.mxu0 %v6771_v11  ;;  %4333 = vmatpush1.bf16.msra.mxu1 %v6772_v40  ;;  %v6819_v40 = vld [vmem:[#allocation68_spill] sm:$0xff] }
 0x615   :  { %4271 = vmatprep.subr.bf16.mxu0 %v6773_v32  ;;  %4335 = vmatprep.subr.bf16.mxu1 %v6774_v3  ;;  %v6784_v32 = vld [vmem:[#allocation35_spill] sm:$0xff]  ;;  %v6785_v3 = vld [vmem:[#allocation36_spill] sm:$0xff] }
 0x618   :  { %4273 = vmatpush1.bf16.msra.mxu0 %v6775_v12  ;;  %4337 = vmatpush1.bf16.msra.mxu1 %v6776_v53  ;;  %v6786_v12 = vld [vmem:[#allocation37_spill] sm:$0xff]  ;;  %v6787_v53 = vld [vmem:[#allocation38_spill] sm:$0xff] }
 0x619   :  { %4275 = vmatprep.subr.bf16.mxu0 %v6777_v23  ;;  %4339 = vmatprep.subr.bf16.mxu1 %v6778_v19  ;;  %v6788_v23 = vld [vmem:[#allocation39_spill] sm:$0xff]  ;;  %v6789_v19 = vld [vmem:[#allocation40_spill] sm:$0xff] }
 0x61c   :  { %4277 = vmatpush1.bf16.msra.mxu0 %v6779_v38  ;;  %4341 = vmatpush1.bf16.msra.mxu1 %v6780_v54  ;;  %v6790_v38 = vld [vmem:[#allocation41_spill] sm:$0xff]  ;;  %v6791_v54 = vld [vmem:[#allocation42_spill] sm:$0xff] }
 0x61d   :  { %4279 = vmatprep.subr.bf16.mxu0 %v6781_v63  ;;  %4343 = vmatprep.subr.bf16.mxu1 %v6782_v57  ;;  %v6792_v63 = vld [vmem:[#allocation43_spill] sm:$0xff]  ;;  %v6793_v57 = vld [vmem:[#allocation44_spill] sm:$0xff] }
 0x620   :  { %4281 = vmatpush1.bf16.msra.mxu0 %v6783_v29  ;;  %4345 = vmatpush1.bf16.msra.mxu1 %v6784_v32  ;;  %v6794_v29 = vld [vmem:[#allocation45_spill] sm:$0xff]  ;;  %v6795_v32 = vld [vmem:[#allocation46_spill] sm:$0xff] }
 0x621   :  { %4283 = vmatprep.subr.bf16.mxu0 %v6785_v3  ;;  %4347 = vmatprep.subr.bf16.mxu1 %v6786_v12  ;;  %v6796_v3 = vld [vmem:[#allocation47_spill] sm:$0xff]  ;;  %v6797_v12 = vld [vmem:[#allocation48_spill] sm:$0xff] }
 0x624   :  { %4285 = vmatpush1.bf16.msra.mxu0 %v6787_v53  ;;  %4349 = vmatpush1.bf16.msra.mxu1 %v6788_v23  ;;  %v6798_v53 = vld [vmem:[#allocation49_spill] sm:$0xff]  ;;  %v6799_v23 = vld [vmem:[#allocation50_spill] sm:$0xff] }
 0x625   :  { %4287 = vmatprep.subr.bf16.mxu0 %v6789_v19  ;;  %4351 = vmatprep.subr.bf16.mxu1 %v6790_v38  ;;  %v6800_v19 = vld [vmem:[#allocation51_spill] sm:$0xff]  ;;  %v6801_v38 = vld [vmem:[#allocation52_spill] sm:$0xff] }
 0x628   :  { %4289 = vmatpush1.bf16.msra.mxu0 %v6791_v54  ;;  %4353 = vmatpush1.bf16.msra.mxu1 %v6792_v63  ;;  %v6802_v54 = vld [vmem:[#allocation53_spill] sm:$0xff]  ;;  %v6803_v63 = vld [vmem:[#allocation54_spill] sm:$0xff] }
 0x629   :  { %4291 = vmatprep.subr.bf16.mxu0 %v6793_v57  ;;  %4355 = vmatprep.subr.bf16.mxu1 %v6794_v29  ;;  %v6804_v57 = vld [vmem:[#allocation55_spill] sm:$0xff]  ;;  %v6805_v29 = vld [vmem:[#allocation56_spill] sm:$0xff] }
 0x62c   :  { %4293 = vmatpush1.bf16.msra.mxu0 %v6795_v32  ;;  %4357 = vmatpush1.bf16.msra.mxu1 %v6796_v3  ;;  %v6806_v32 = vld [vmem:[#allocation57_spill] sm:$0xff]  ;;  %v6807_v3 = vld [vmem:[#allocation58_spill] sm:$0xff] }
 0x62d   :  { %4295 = vmatprep.subr.bf16.mxu0 %v6797_v12  ;;  %4359 = vmatprep.subr.bf16.mxu1 %v6798_v53  ;;  %v6808_v12 = vld [vmem:[#allocation59_spill] sm:$0xff]  ;;  %v6809_v53 = vld [vmem:[#allocation60_spill] sm:$0xff] }
 0x630   :  { %4297 = vmatpush1.bf16.msra.mxu0 %v6799_v23  ;;  %4361 = vmatpush1.bf16.msra.mxu1 %v6800_v19  ;;  %v6810_v23 = vld [vmem:[#allocation61_spill] sm:$0xff]  ;;  %v6811_v19 = vld [vmem:[#allocation62_spill] sm:$0xff] }
 0x631   :  { %4299 = vmatprep.subr.bf16.mxu0 %v6801_v38  ;;  %4363 = vmatprep.subr.bf16.mxu1 %v6802_v54  ;;  %v6812_v38 = vld [vmem:[#allocation63_spill] sm:$0xff]  ;;  %v6813_v54 = vld [vmem:[#allocation64_spill] sm:$0xff] }
 0x634   :  { %4301 = vmatpush1.bf16.msra.mxu0 %v6803_v63  ;;  %4365 = vmatpush1.bf16.msra.mxu1 %v6804_v57  ;;  %v6814_v63 = vld [vmem:[#allocation65_spill] sm:$0xff]  ;;  %v6815_v57 = vld [vmem:[#allocation66_spill] sm:$0xff] }
 0x635   :  { %4303 = vmatprep.subr.bf16.mxu0 %v6805_v29  ;;  %4367 = vmatprep.subr.bf16.mxu1 %v6806_v32  ;;  %v6816_v29 = vld [vmem:[#allocation67_spill] sm:$0xff]  ;;  %v6817_v32 = vld [vmem:[#allocation13_spill] sm:$0xff] }
 0x638   :  { %4305 = vmatpush1.bf16.msra.mxu0 %v6807_v3  ;;  %4369 = vmatpush1.bf16.msra.mxu1 %v6808_v12  ;;  %v6818_v3 = vld [vmem:[#allocation14_spill] sm:$0xff] }
 0x639   :  { %4307 = vmatprep.subr.bf16.mxu0 %v6809_v53  ;;  %4371 = vmatprep.subr.bf16.mxu1 %v6810_v23 }
 0x63c   :  { %4309 = vmatpush1.bf16.msra.mxu0 %v6811_v19  ;;  %4373 = vmatpush1.bf16.msra.mxu1 %v6812_v38 }
 0x63d   :  { %4311 = vmatprep.subr.bf16.mxu0 %v6813_v54  ;;  %4375 = vmatprep.subr.bf16.mxu1 %v6814_v63  ;;  %v6821_v63 = vld [vmem:[#allocation70_spill] sm:$0xff] }
 0x640   :  { %4313 = vmatpush1.bf16.msra.mxu0 %v6815_v57  ;;  %4377 = vmatpush1.bf16.msra.mxu1 %v6816_v29  ;;  %v6822_v29 = vld [vmem:[#allocation71_spill] sm:$0xff] }
 0x641   :  { %4379 = vmatprep.subr.bf16.mxu0 %v6817_v32  ;;  %4411 = vmatprep.subr.bf16.mxu1 %v6818_v3 }
 0x6b6   :  { %v1894_v12 = vpop.f32.mrb[18].mxu0  ;;  %v1965_v53 = vpop.f32.mrb[18].mxu1 }
 0x6b7   :  { %v1895_v23 = vadd.f32 %v1894_v12, %v6819_v40  ;;  %v1896_v11 = vpop.f32.mrb[19].mxu0  ;;  %v1967_v19 = vpop.f32.mrb[19].mxu1  ;;  %v1966_v22 = vadd.f32 %v1965_v53, %v6822_v29 }
 0x6b8   :  { %v1897_v38 = vadd.f32 %v1896_v11, %v6820_v16  ;;  %v1968_v57 = vadd.f32 %v1967_v19, %v6821_v63  ;;  %v1995_v19 = vld [vmem:[#allocation6 + $0xa0] sm:$0xff] }
 0x6b9   :  { %v3152_v39 = vmul.f32 -1.442695, %v1895_v23 }
 0x6ba   :  { %v3153_v54 = vmul.f32 -1.442695, %v1897_v38  ;;  %v3154_v36 = vmul.f32 -1.442695, %v1968_v57  ;;  %v1996_v57 = vld [vmem:[#allocation6 + $0xa8] sm:$0xff] }
 0x6bb   :  { %4938 = vpow2.f32 %v3152_v39 }
 0x6bc   :  { %4940 = vpow2.f32 %v3153_v54 }
 0x6bd   :  { %4942 = vpow2.f32 %v3154_v36 }
 0x6be   :  { %4944 = vtanh.f32 %v1966_v22 }
 0x6c5   :  { %v4939_v32 = vpop.eup %4938 }
 0x6c6   :  { %v4941_v0 = vpop.eup %4940  ;;  %v1973_v3 = vadd.f32 1.0, %v4939_v32 }
 0x6c7   :  { %v1979_v13 = vadd.f32 1.0, %v4941_v0  ;;  %v4943_v12 = vpop.eup %4942 }
 0x6c8   :  { %4946 = vrcp.f32 %v1973_v3  ;;  %v4945_v40 = vpop.eup %4944  ;;  %v1986_v39 = vadd.f32 1.0, %v4943_v12 }
 0x6c9   :  { %4948 = vrcp.f32 %v1979_v13 }
 0x6ca   :  { %4950 = vrcp.f32 %v1986_v39 }
 0x6d2   :  { %v4947_v11 = vpop.eup %4946 }
 0x6d3   :  { %v4949_v23 = vpop.eup %4948  ;;  %v1990_v38 = vmul.f32 %v4947_v11, %v4945_v40  ;;  %v1998_v40 = vld [vmem:[#allocation6 + $0xb8] sm:$0xff] }
 0x6d4   :  { %v1989_v54 = vmul.f32 %v4949_v23, %v5957_v56  ;;  %v1997_v56 = vld [vmem:[#allocation6 + $0xb0] sm:$0xff]  ;;  %v4951_v11 = vpop.eup %4950 }
 0x6d6   :  { %v2065_v63 = vpop.f32.mrb[20].mxu0  ;;  %v2136_v53 = vpop.f32.mrb[20].mxu1  ;;  %v6067_v29 = vadd.f32 %v1990_v38, %v1989_v54 }
 0x6d7   :  { %v2141_v36 = vadd.f32 %v2065_v63, %v1995_v19  ;;  %v2067_v22 = vpop.f32.mrb[21].mxu0  ;;  %v2138_v0 = vpop.f32.mrb[21].mxu1  ;;  %v2143_v5 = vadd.f32 %v2136_v53, %v1997_v56  ;;  %v6825_v56 = vld [vmem:[#allocation19_spill] sm:$0xff] }
 0x6d8   :  { %v2142_v32 = vadd.f32 %v2067_v22, %v1996_v57  ;;  %4952 = vtanh.f32 %v6067_v29  ;;  %v2144_v12 = vadd.f32 %v2138_v0, %v1998_v40 }
 0x6d9   :  { %v3155_v13 = vmul.f32 -1.442695, %v2141_v36 }
 0x6da   :  { %v3156_v3 = vmul.f32 -1.442695, %v2142_v32  ;;  %v3157_v16 = vmul.f32 -1.442695, %v2144_v12 }
 0x6db   :  { %4954 = vpow2.f32 %v3155_v13 }
 0x6dc   :  { %4956 = vpow2.f32 %v3156_v3 }
 0x6dd   :  { %4958 = vpow2.f32 %v3157_v16 }
 0x6de   :  { %4960 = vtanh.f32 %v2143_v5  ;;  %v6824_v5 = vld [vmem:[#allocation15_spill] sm:$0xff] }
 0x6e2   :  { %v4953_v23 = vpop.eup %4952 }
 0x6e3   :  { %v1993_v38 = vmul.f32 %v4953_v23, %v4951_v11  ;;  %v6826_v11 = vld [vmem:[#allocation16_spill] sm:$0xff]  ;;  %v6827_v23 = vld [vmem:[#allocation21_spill] sm:$0xff] }
 0x6e5   :  { %v4955_v54 = vpop.eup %4954  ;;  %2233 = vmatprep.mubr.f32.mxu0 %v1993_v38  ;;  %2304 = vmatprep.mubr.f32.mxu1 %v1993_v38  ;;  %v6828_v38 = vld [vmem:[#allocation18_spill] sm:$0xff] }
 0x6e6   :  { %v4957_v63 = vpop.eup %4956  ;;  %v2148_v39 = vadd.f32 1.0, %v4955_v54  ;;  %v6829_v54 = vld [vmem:[#allocation22_spill] sm:$0xff] }
 0x6e7   :  { %v2154_v19 = vadd.f32 1.0, %v4957_v63  ;;  %v4959_v57 = vpop.eup %4958  ;;  %v6830_v63 = vld [vmem:[#allocation20_spill] sm:$0xff] }
 0x6e8   :  { %4962 = vrcp.f32 %v2148_v39  ;;  %v4961_v36 = vpop.eup %4960  ;;  %v2161_v13 = vadd.f32 1.0, %v4959_v57  ;;  %v6831_v39 = vld [vmem:[#allocation23_spill] sm:$0xff]  ;;  %v6833_v57 = vld [vmem:[#allocation25_spill] sm:$0xff] }
 0x6e9   :  { %4964 = vrcp.f32 %v2154_v19  ;;  %v6832_v19 = vld [vmem:[#allocation24_spill] sm:$0xff] }
 0x6ea   :  { %4966 = vrcp.f32 %v2161_v13  ;;  %v6838_v13 = vld [vmem:[#allocation30_spill] sm:$0xff] }
 0x6f2   :  { %v4963_v22 = vpop.eup %4962 }
 0x6f3   :  { %v4965_v0 = vpop.eup %4964  ;;  %v2165_v32 = vmul.f32 %v4963_v22, %v4961_v36  ;;  %v6834_v36 = vld [vmem:[#allocation26_spill] sm:$0xff]  ;;  %v6835_v22 = vld [vmem:[#allocation27_spill] sm:$0xff] }
 0x6f4   :  { %v2164_v3 = vmul.f32 %v4965_v0, %v5961_v44  ;;  %v4967_v40 = vpop.eup %4966  ;;  %v6823_v44 = vld [vmem:[#allocation17_spill] sm:$0xff]  ;;  %v6836_v0 = vld [vmem:[#allocation28_spill] sm:$0xff] }
 0x6f6   :  { %v6071_v53 = vadd.f32 %v2165_v32, %v2164_v3  ;;  %v6837_v32 = vld [vmem:[#allocation29_spill] sm:$0xff]  ;;  %v6839_v3 = vld [vmem:[#allocation31_spill] sm:$0xff] }
 0x6f8   :  { %4968 = vtanh.f32 %v6071_v53 }
 0x702   :  { %v4969_v12 = vpop.eup %4968 }
 0x703   :  { %v2168_v16 = vmul.f32 %v4969_v12, %v4967_v40  ;;  %v6840_v40 = vld [vmem:[#allocation32_spill] sm:$0xff]  ;;  %v6841_v12 = vld [vmem:[#allocation33_spill] sm:$0xff] }
 0x705   :  { %2234 = vmatmul.mubr.f32.vlgmr.msra.gmra.mrb[22].mxu0 %v2168_v16  ;;  %2305 = vmatmul.mubr.f32.vlgmr.msra.gmra.mrb[22].mxu1 %v2168_v16 }
 0x706   :  { %4381 = vmatpush1.bf16.msra.mxu0 %v5219_v8  ;;  %4413 = vmatpush1.bf16.msra.mxu1 %v5232_v25 }
 0x707   :  { %4383 = vmatprep.subr.bf16.mxu0 %v5221_v9  ;;  %4415 = vmatprep.subr.bf16.mxu1 %v5242_v33 }
 0x708   :  { %2404 = vmatprep.mubr.f32.mxu0 %v6531_v4  ;;  %2475 = vmatprep.mubr.f32.mxu1 %v6531_v4 }
 0x70a   :  { %4385 = vmatpush1.bf16.msra.mxu0 %v5225_v14  ;;  %4417 = vmatpush1.bf16.msra.mxu1 %v5244_v37 }
 0x70b   :  { %4387 = vmatprep.subr.bf16.mxu0 %v5228_v17  ;;  %4419 = vmatprep.subr.bf16.mxu1 %v5250_v45 }
 0x70e   :  { %4389 = vmatpush1.bf16.msra.mxu0 %v5235_v26  ;;  %4421 = vmatpush1.bf16.msra.mxu1 %v5256_v48 }
 0x70f   :  { %4391 = vmatprep.subr.bf16.mxu0 %v5239_v30  ;;  %4423 = vmatprep.subr.bf16.mxu1 %v5259_v52 }
 0x712   :  { %4393 = vmatpush1.bf16.msra.mxu0 %v5248_v42  ;;  %4425 = vmatpush1.bf16.msra.mxu1 %v5268_v62 }
 0x713   :  { %4395 = vmatprep.subr.bf16.mxu0 %v5253_v46  ;;  %4427 = vmatprep.subr.bf16.mxu1 %v5271_v1 }
 0x716   :  { %4397 = vmatpush1.bf16.msra.mxu0 %v5262_v55  ;;  %4429 = vmatpush1.bf16.msra.mxu1 %v5280_v15 }
 0x717   :  { %4399 = vmatprep.subr.bf16.mxu0 %v5265_v58  ;;  %4431 = vmatprep.subr.bf16.mxu1 %v5283_v18 }
 0x71a   :  { %4401 = vmatpush1.bf16.msra.mxu0 %v5274_v7  ;;  %4433 = vmatpush1.bf16.msra.mxu1 %v5292_v31 }
 0x71b   :  { %4403 = vmatprep.subr.bf16.mxu0 %v5277_v10  ;;  %4435 = vmatprep.subr.bf16.mxu1 %v5295_v34 }
 0x71e   :  { %4405 = vmatpush1.bf16.msra.mxu0 %v5286_v24  ;;  %4437 = vmatpush1.bf16.msra.mxu1 %v5302_v43 }
 0x71f   :  { %4407 = vmatprep.subr.bf16.mxu0 %v5289_v27  ;;  %4439 = vmatprep.subr.bf16.mxu1 %v5307_v51 }
 0x722   :  { %4409 = vmatpush1.bf16.msra.mxu0 %v5298_v41  ;;  %4441 = vmatpush1.bf16.msra.mxu1 %v5313_v61 }
 0x723   :  { %4443 = vmatprep.subr.bf16.mxu0 %v5304_v47  ;;  %4507 = vmatprep.subr.bf16.mxu1 %v5319_v6 }
 0x725   :  { %2405 = vmatmul.mubr.f32.vlgmr.msra.gmra.mrb[24].mxu0 %v2168_v16  ;;  %2476 = vmatmul.mubr.f32.vlgmr.msra.gmra.mrb[24].mxu1 %v2168_v16  ;;  %v6842_v16 = vld [vmem:[#allocation34_spill] sm:$0xff] }
 0x726   :  { %4445 = vmatpush1.bf16.msra.mxu0 %v5310_v60  ;;  %4509 = vmatpush1.bf16.msra.mxu1 %v5327_v21 }
 0x727   :  { %4447 = vmatprep.subr.bf16.mxu0 %v5316_v2  ;;  %4511 = vmatprep.subr.bf16.mxu1 %v5333_v35 }
 0x72a   :  { %4449 = vmatpush1.bf16.msra.mxu0 %v5323_v20  ;;  %4513 = vmatpush1.bf16.msra.mxu1 %v5340_v50 }
 0x72b   :  { %4451 = vmatprep.subr.bf16.mxu0 %v5330_v28  ;;  %4515 = vmatprep.subr.bf16.mxu1 %v5346_v59 }
 0x72e   :  { %4453 = vmatpush1.bf16.msra.mxu0 %v5337_v49  ;;  %4517 = vmatpush1.bf16.msra.mxu1 %v6823_v44 }
 0x72f   :  { %4455 = vmatprep.subr.bf16.mxu0 %v6824_v5  ;;  %4519 = vmatprep.subr.bf16.mxu1 %v6825_v56 }
 0x732   :  { %4457 = vmatpush1.bf16.msra.mxu0 %v6826_v11  ;;  %4521 = vmatpush1.bf16.msra.mxu1 %v6827_v23 }
 0x733   :  { %4459 = vmatprep.subr.bf16.mxu0 %v6828_v38  ;;  %4523 = vmatprep.subr.bf16.mxu1 %v6829_v54  ;;  %v6879_v54 = vld [vmem:[#allocation69_spill] sm:$0xff] }
 0x736   :  { %4461 = vmatpush1.bf16.msra.mxu0 %v6830_v63  ;;  %4525 = vmatpush1.bf16.msra.mxu1 %v6831_v39  ;;  %v6878_v39 = vld [vmem:[#allocation68_spill] sm:$0xff] }
 0x737   :  { %4463 = vmatprep.subr.bf16.mxu0 %v6832_v19  ;;  %4527 = vmatprep.subr.bf16.mxu1 %v6833_v57  ;;  %v6843_v19 = vld [vmem:[#allocation35_spill] sm:$0xff]  ;;  %v6844_v57 = vld [vmem:[#allocation36_spill] sm:$0xff] }
 0x73a   :  { %4465 = vmatpush1.bf16.msra.mxu0 %v6834_v36  ;;  %4529 = vmatpush1.bf16.msra.mxu1 %v6835_v22  ;;  %v6845_v36 = vld [vmem:[#allocation37_spill] sm:$0xff]  ;;  %v6846_v22 = vld [vmem:[#allocation38_spill] sm:$0xff] }
 0x73b   :  { %4467 = vmatprep.subr.bf16.mxu0 %v6836_v0  ;;  %4531 = vmatprep.subr.bf16.mxu1 %v6837_v32  ;;  %v6847_v0 = vld [vmem:[#allocation39_spill] sm:$0xff]  ;;  %v6848_v32 = vld [vmem:[#allocation40_spill] sm:$0xff] }
 0x73e   :  { %4469 = vmatpush1.bf16.msra.mxu0 %v6838_v13  ;;  %4533 = vmatpush1.bf16.msra.mxu1 %v6839_v3  ;;  %v6849_v13 = vld [vmem:[#allocation41_spill] sm:$0xff]  ;;  %v6850_v3 = vld [vmem:[#allocation42_spill] sm:$0xff] }
 0x73f   :  { %4471 = vmatprep.subr.bf16.mxu0 %v6840_v40  ;;  %4535 = vmatprep.subr.bf16.mxu1 %v6841_v12  ;;  %v6851_v40 = vld [vmem:[#allocation43_spill] sm:$0xff]  ;;  %v6852_v12 = vld [vmem:[#allocation44_spill] sm:$0xff] }
 0x742   :  { %4473 = vmatpush1.bf16.msra.mxu0 %v6842_v16  ;;  %4537 = vmatpush1.bf16.msra.mxu1 %v6843_v19  ;;  %v6853_v16 = vld [vmem:[#allocation45_spill] sm:$0xff]  ;;  %v6854_v19 = vld [vmem:[#allocation46_spill] sm:$0xff] }
 0x743   :  { %4475 = vmatprep.subr.bf16.mxu0 %v6844_v57  ;;  %4539 = vmatprep.subr.bf16.mxu1 %v6845_v36  ;;  %v6855_v57 = vld [vmem:[#allocation47_spill] sm:$0xff]  ;;  %v6856_v36 = vld [vmem:[#allocation48_spill] sm:$0xff] }
 0x746   :  { %4477 = vmatpush1.bf16.msra.mxu0 %v6846_v22  ;;  %4541 = vmatpush1.bf16.msra.mxu1 %v6847_v0  ;;  %v6857_v22 = vld [vmem:[#allocation49_spill] sm:$0xff]  ;;  %v6858_v0 = vld [vmem:[#allocation50_spill] sm:$0xff] }
 0x747   :  { %4479 = vmatprep.subr.bf16.mxu0 %v6848_v32  ;;  %4543 = vmatprep.subr.bf16.mxu1 %v6849_v13  ;;  %v6859_v32 = vld [vmem:[#allocation51_spill] sm:$0xff]  ;;  %v6860_v13 = vld [vmem:[#allocation52_spill] sm:$0xff] }
 0x74a   :  { %4481 = vmatpush1.bf16.msra.mxu0 %v6850_v3  ;;  %4545 = vmatpush1.bf16.msra.mxu1 %v6851_v40  ;;  %v6861_v3 = vld [vmem:[#allocation53_spill] sm:$0xff]  ;;  %v6862_v40 = vld [vmem:[#allocation54_spill] sm:$0xff] }
 0x74b   :  { %4483 = vmatprep.subr.bf16.mxu0 %v6852_v12  ;;  %4547 = vmatprep.subr.bf16.mxu1 %v6853_v16  ;;  %v6863_v12 = vld [vmem:[#allocation55_spill] sm:$0xff]  ;;  %v6864_v16 = vld [vmem:[#allocation56_spill] sm:$0xff] }
 0x74e   :  { %4485 = vmatpush1.bf16.msra.mxu0 %v6854_v19  ;;  %4549 = vmatpush1.bf16.msra.mxu1 %v6855_v57  ;;  %v6865_v19 = vld [vmem:[#allocation57_spill] sm:$0xff]  ;;  %v6866_v57 = vld [vmem:[#allocation58_spill] sm:$0xff] }
 0x74f   :  { %4487 = vmatprep.subr.bf16.mxu0 %v6856_v36  ;;  %4551 = vmatprep.subr.bf16.mxu1 %v6857_v22  ;;  %v6867_v36 = vld [vmem:[#allocation59_spill] sm:$0xff]  ;;  %v6868_v22 = vld [vmem:[#allocation60_spill] sm:$0xff] }
 0x752   :  { %4489 = vmatpush1.bf16.msra.mxu0 %v6858_v0  ;;  %4553 = vmatpush1.bf16.msra.mxu1 %v6859_v32  ;;  %v6869_v0 = vld [vmem:[#allocation61_spill] sm:$0xff]  ;;  %v6870_v32 = vld [vmem:[#allocation62_spill] sm:$0xff] }
 0x753   :  { %4491 = vmatprep.subr.bf16.mxu0 %v6860_v13  ;;  %4555 = vmatprep.subr.bf16.mxu1 %v6861_v3  ;;  %v6871_v13 = vld [vmem:[#allocation63_spill] sm:$0xff]  ;;  %v6872_v3 = vld [vmem:[#allocation64_spill] sm:$0xff] }
 0x756   :  { %4493 = vmatpush1.bf16.msra.mxu0 %v6862_v40  ;;  %4557 = vmatpush1.bf16.msra.mxu1 %v6863_v12  ;;  %v6873_v40 = vld [vmem:[#allocation65_spill] sm:$0xff]  ;;  %v6874_v12 = vld [vmem:[#allocation66_spill] sm:$0xff] }
 0x757   :  { %4495 = vmatprep.subr.bf16.mxu0 %v6864_v16  ;;  %4559 = vmatprep.subr.bf16.mxu1 %v6865_v19  ;;  %v6875_v16 = vld [vmem:[#allocation67_spill] sm:$0xff]  ;;  %v6876_v19 = vld [vmem:[#allocation13_spill] sm:$0xff] }
 0x75a   :  { %4497 = vmatpush1.bf16.msra.mxu0 %v6866_v57  ;;  %4561 = vmatpush1.bf16.msra.mxu1 %v6867_v36  ;;  %v6877_v57 = vld [vmem:[#allocation14_spill] sm:$0xff] }
 0x75b   :  { %4499 = vmatprep.subr.bf16.mxu0 %v6868_v22  ;;  %4563 = vmatprep.subr.bf16.mxu1 %v6869_v0 }
 0x75e   :  { %4501 = vmatpush1.bf16.msra.mxu0 %v6870_v32  ;;  %4565 = vmatpush1.bf16.msra.mxu1 %v6871_v13 }
 0x75f   :  { %4503 = vmatprep.subr.bf16.mxu0 %v6872_v3  ;;  %4567 = vmatprep.subr.bf16.mxu1 %v6873_v40  ;;  %v6880_v40 = vld [vmem:[#allocation70_spill] sm:$0xff] }
 0x762   :  { %4505 = vmatpush1.bf16.msra.mxu0 %v6874_v12  ;;  %4569 = vmatpush1.bf16.msra.mxu1 %v6875_v16  ;;  %v6881_v16 = vld [vmem:[#allocation71_spill] sm:$0xff] }
 0x763   :  { %4571 = vmatprep.subr.bf16.mxu0 %v6876_v19  ;;  %4603 = vmatprep.subr.bf16.mxu1 %v6877_v57 }
 0x7d8   :  { %v2235_v36 = vpop.f32.mrb[22].mxu0  ;;  %v2306_v22 = vpop.f32.mrb[22].mxu1 }
 0x7d9   :  { %v2236_v0 = vadd.f32 %v2235_v36, %v6878_v39  ;;  %v2237_v63 = vpop.f32.mrb[23].mxu0  ;;  %v2308_v32 = vpop.f32.mrb[23].mxu1  ;;  %v2307_v11 = vadd.f32 %v2306_v22, %v6881_v16 }
 0x7da   :  { %v2238_v13 = vadd.f32 %v2237_v63, %v6879_v54  ;;  %v2309_v12 = vadd.f32 %v2308_v32, %v6880_v40  ;;  %v2336_v32 = vld [vmem:[#allocation6 + $0xc0] sm:$0xff] }
 0x7db   :  { %v3158_v38 = vmul.f32 -1.442695, %v2236_v0 }
 0x7dc   :  { %v3159_v3 = vmul.f32 -1.442695, %v2238_v13  ;;  %v3160_v23 = vmul.f32 -1.442695, %v2309_v12  ;;  %v2337_v12 = vld [vmem:[#allocation6 + $0xc8] sm:$0xff] }
 0x7dd   :  { %4970 = vpow2.f32 %v3158_v38 }
 0x7de   :  { %4972 = vpow2.f32 %v3159_v3 }
 0x7df   :  { %4974 = vpow2.f32 %v3160_v23 }
 0x7e0   :  { %4976 = vtanh.f32 %v2307_v11 }
 0x7e7   :  { %v4971_v19 = vpop.eup %4970 }
 0x7e8   :  { %v4973_v56 = vpop.eup %4972  ;;  %v2314_v57 = vadd.f32 1.0, %v4971_v19 }
 0x7e9   :  { %v2320_v5 = vadd.f32 1.0, %v4973_v56  ;;  %v4975_v36 = vpop.eup %4974 }
 0x7ea   :  { %4978 = vrcp.f32 %v2314_v57  ;;  %v4977_v39 = vpop.eup %4976  ;;  %v2327_v38 = vadd.f32 1.0, %v4975_v36 }
 0x7eb   :  { %4980 = vrcp.f32 %v2320_v5 }
 0x7ec   :  { %4982 = vrcp.f32 %v2327_v38 }
 0x7f4   :  { %v4979_v63 = vpop.eup %4978 }
 0x7f5   :  { %v4981_v0 = vpop.eup %4980  ;;  %v2331_v13 = vmul.f32 %v4979_v63, %v4977_v39  ;;  %v2339_v39 = vld [vmem:[#allocation6 + $0xd8] sm:$0xff] }
 0x7f6   :  { %v2330_v3 = vmul.f32 %v4981_v0, %v6067_v29  ;;  %v2338_v29 = vld [vmem:[#allocation6 + $0xd0] sm:$0xff]  ;;  %v4983_v63 = vpop.eup %4982 }
 0x7f8   :  { %v2406_v40 = vpop.f32.mrb[24].mxu0  ;;  %v2477_v22 = vpop.f32.mrb[24].mxu1  ;;  %v6177_v16 = vadd.f32 %v2331_v13, %v2330_v3 }
 0x7f9   :  { %v2482_v23 = vadd.f32 %v2406_v40, %v2336_v32  ;;  %v2408_v11 = vpop.f32.mrb[25].mxu0  ;;  %v2479_v56 = vpop.f32.mrb[25].mxu1  ;;  %v2484_v44 = vadd.f32 %v2477_v22, %v2338_v29  ;;  %v6925_v29 = vld [vmem:[#allocation58_spill] sm:$0xff] }
 0x7fa   :  { %v2483_v19 = vadd.f32 %v2408_v11, %v2337_v12  ;;  %4984 = vtanh.f32 %v6177_v16  ;;  %v2485_v36 = vadd.f32 %v2479_v56, %v2339_v39 }
 0x7fb   :  { %v3161_v5 = vmul.f32 -1.442695, %v2482_v23 }
 0x7fc   :  { %v3162_v57 = vmul.f32 -1.442695, %v2483_v19  ;;  %v3163_v54 = vmul.f32 -1.442695, %v2485_v36 }
 0x7fd   :  { %4986 = vpow2.f32 %v3161_v5 }
 0x7fe   :  { %4988 = vpow2.f32 %v3162_v57 }
 0x7ff   :  { %4990 = vpow2.f32 %v3163_v54 }
 0x800   :  { %4992 = vtanh.f32 %v2484_v44  ;;  %v6924_v44 = vld [vmem:[#allocation57_spill] sm:$0xff] }
 0x804   :  { %v4985_v0 = vpop.eup %4984 }
 0x805   :  { %v2334_v13 = vmul.f32 %v4985_v0, %v4983_v63  ;;  %v6926_v63 = vld [vmem:[#allocation59_spill] sm:$0xff]  ;;  %v6927_v0 = vld [vmem:[#allocation60_spill] sm:$0xff] }
 0x807   :  { %v4987_v3 = vpop.eup %4986  ;;  %2574 = vmatprep.mubr.f32.mxu0 %v2334_v13  ;;  %2645 = vmatprep.mubr.f32.mxu1 %v2334_v13  ;;  %v6928_v13 = vld [vmem:[#allocation61_spill] sm:$0xff] }
 0x808   :  { %v4989_v40 = vpop.eup %4988  ;;  %v2489_v38 = vadd.f32 1.0, %v4987_v3  ;;  %v6929_v3 = vld [vmem:[#allocation62_spill] sm:$0xff] }
 0x809   :  { %v2495_v32 = vadd.f32 1.0, %v4989_v40  ;;  %v4991_v12 = vpop.eup %4990  ;;  %v6930_v40 = vld [vmem:[#allocation63_spill] sm:$0xff] }
 0x80a   :  { %4994 = vrcp.f32 %v2489_v38  ;;  %v4993_v23 = vpop.eup %4992  ;;  %v2502_v5 = vadd.f32 1.0, %v4991_v12  ;;  %v6931_v38 = vld [vmem:[#allocation64_spill] sm:$0xff]  ;;  %v6933_v12 = vld [vmem:[#allocation66_spill] sm:$0xff] }
 0x80b   :  { %4996 = vrcp.f32 %v2495_v32  ;;  %v6932_v32 = vld [vmem:[#allocation65_spill] sm:$0xff] }
 0x80c   :  { %4998 = vrcp.f32 %v2502_v5 }
 0x814   :  { %v4995_v11 = vpop.eup %4994 }
 0x815   :  { %v4997_v56 = vpop.eup %4996  ;;  %v2506_v19 = vmul.f32 %v4995_v11, %v4993_v23  ;;  %v6934_v23 = vld [vmem:[#allocation67_spill] sm:$0xff] }
 0x816   :  { %v2505_v57 = vmul.f32 %v4997_v56, %v6071_v53  ;;  %v4999_v39 = vpop.eup %4998  ;;  %v6923_v53 = vld [vmem:[#allocation56_spill] sm:$0xff] }
 0x818   :  { %v6181_v22 = vadd.f32 %v2506_v19, %v2505_v57  ;;  %v6935_v19 = vld [vmem:[#allocation68_spill] sm:$0xff] }
 0x81a   :  { %5000 = vtanh.f32 %v6181_v22 }
 0x824   :  { %v5001_v36 = vpop.eup %5000 }
 0x825   :  { %v2509_v54 = vmul.f32 %v5001_v36, %v4999_v39  ;;  %v6936_v36 = vld [vmem:[#allocation69_spill] sm:$0xff] }
 0x827   :  { %2575 = vmatmul.mubr.f32.vlgmr.msra.gmra.mrb[26].mxu0 %v2509_v54  ;;  %2646 = vmatmul.mubr.f32.vlgmr.msra.gmra.mrb[26].mxu1 %v2509_v54 }
 0x828   :  { %4573 = vmatpush1.bf16.msra.mxu0 %v5219_v8  ;;  %4605 = vmatpush1.bf16.msra.mxu1 %v5232_v25  ;;  %v6882_v8 = vld [vmem:[#allocation17_spill] sm:$0xff] }
 0x829   :  { %4575 = vmatprep.subr.bf16.mxu0 %v5221_v9  ;;  %4607 = vmatprep.subr.bf16.mxu1 %v5242_v33  ;;  %v6883_v9 = vld [vmem:[#allocation15_spill] sm:$0xff]  ;;  %v6886_v25 = vld [vmem:[#allocation21_spill] sm:$0xff]  ;;  %v6889_v33 = vld [vmem:[#allocation20_spill] sm:$0xff] }
 0x82a   :  { %2745 = vmatprep.mubr.f32.mxu0 %v6531_v4  ;;  %2816 = vmatprep.mubr.f32.mxu1 %v6531_v4 }
 0x82c   :  { %4577 = vmatpush1.bf16.msra.mxu0 %v5225_v14  ;;  %4609 = vmatpush1.bf16.msra.mxu1 %v5244_v37  ;;  %v6884_v14 = vld [vmem:[#allocation19_spill] sm:$0xff] }
 0x82d   :  { %4579 = vmatprep.subr.bf16.mxu0 %v5228_v17  ;;  %4611 = vmatprep.subr.bf16.mxu1 %v5250_v45  ;;  %v6885_v17 = vld [vmem:[#allocation16_spill] sm:$0xff]  ;;  %v6890_v37 = vld [vmem:[#allocation23_spill] sm:$0xff]  ;;  %v6892_v45 = vld [vmem:[#allocation25_spill] sm:$0xff] }
 0x830   :  { %4581 = vmatpush1.bf16.msra.mxu0 %v5235_v26  ;;  %4613 = vmatpush1.bf16.msra.mxu1 %v5256_v48  ;;  %v6887_v26 = vld [vmem:[#allocation18_spill] sm:$0xff]  ;;  %v6894_v48 = vld [vmem:[#allocation27_spill] sm:$0xff] }
 0x831   :  { %4583 = vmatprep.subr.bf16.mxu0 %v5239_v30  ;;  %4615 = vmatprep.subr.bf16.mxu1 %v5259_v52  ;;  %v6888_v30 = vld [vmem:[#allocation22_spill] sm:$0xff]  ;;  %v6895_v52 = vld [vmem:[#allocation28_spill] sm:$0xff] }
 0x834   :  { %4585 = vmatpush1.bf16.msra.mxu0 %v5248_v42  ;;  %4617 = vmatpush1.bf16.msra.mxu1 %v5268_v62  ;;  %v6891_v42 = vld [vmem:[#allocation24_spill] sm:$0xff]  ;;  %v6898_v62 = vld [vmem:[#allocation31_spill] sm:$0xff] }
 0x835   :  { %4587 = vmatprep.subr.bf16.mxu0 %v5253_v46  ;;  %4619 = vmatprep.subr.bf16.mxu1 %v5271_v1  ;;  %v6893_v46 = vld [vmem:[#allocation26_spill] sm:$0xff]  ;;  %v6899_v1 = vld [vmem:[#allocation32_spill] sm:$0xff] }
 0x838   :  { %4589 = vmatpush1.bf16.msra.mxu0 %v5262_v55  ;;  %4621 = vmatpush1.bf16.msra.mxu1 %v5280_v15  ;;  %v6896_v55 = vld [vmem:[#allocation29_spill] sm:$0xff]  ;;  %v6902_v15 = vld [vmem:[#allocation35_spill] sm:$0xff] }
 0x839   :  { %4591 = vmatprep.subr.bf16.mxu0 %v5265_v58  ;;  %4623 = vmatprep.subr.bf16.mxu1 %v5283_v18  ;;  %v6897_v58 = vld [vmem:[#allocation30_spill] sm:$0xff]  ;;  %v6903_v18 = vld [vmem:[#allocation36_spill] sm:$0xff] }
 0x83c   :  { %4593 = vmatpush1.bf16.msra.mxu0 %v5274_v7  ;;  %4625 = vmatpush1.bf16.msra.mxu1 %v5292_v31  ;;  %v6900_v7 = vld [vmem:[#allocation33_spill] sm:$0xff]  ;;  %v6906_v31 = vld [vmem:[#allocation39_spill] sm:$0xff] }
 0x83d   :  { %4595 = vmatprep.subr.bf16.mxu0 %v5277_v10  ;;  %4627 = vmatprep.subr.bf16.mxu1 %v5295_v34  ;;  %v6901_v10 = vld [vmem:[#allocation34_spill] sm:$0xff]  ;;  %v6907_v34 = vld [vmem:[#allocation40_spill] sm:$0xff] }
 0x840   :  { %4597 = vmatpush1.bf16.msra.mxu0 %v5286_v24  ;;  %4629 = vmatpush1.bf16.msra.mxu1 %v5302_v43  ;;  %v6904_v24 = vld [vmem:[#allocation37_spill] sm:$0xff]  ;;  %v6909_v43 = vld [vmem:[#allocation42_spill] sm:$0xff] }
 0x841   :  { %4599 = vmatprep.subr.bf16.mxu0 %v5289_v27  ;;  %4631 = vmatprep.subr.bf16.mxu1 %v5307_v51  ;;  %v6905_v27 = vld [vmem:[#allocation38_spill] sm:$0xff]  ;;  %v6911_v51 = vld [vmem:[#allocation44_spill] sm:$0xff] }
 0x844   :  { %4601 = vmatpush1.bf16.msra.mxu0 %v5298_v41  ;;  %4633 = vmatpush1.bf16.msra.mxu1 %v5313_v61  ;;  %v6908_v41 = vld [vmem:[#allocation41_spill] sm:$0xff]  ;;  %v6913_v61 = vld [vmem:[#allocation46_spill] sm:$0xff] }
 0x845   :  { %4635 = vmatprep.subr.bf16.mxu0 %v5304_v47  ;;  %4699 = vmatprep.subr.bf16.mxu1 %v5319_v6  ;;  %v6910_v47 = vld [vmem:[#allocation43_spill] sm:$0xff]  ;;  %v6915_v6 = vld [vmem:[#allocation48_spill] sm:$0xff] }
 0x847   :  { %2746 = vmatmul.mubr.f32.vlgmr.msra.gmra.mrb[28].mxu0 %v2509_v54  ;;  %2817 = vmatmul.mubr.f32.vlgmr.msra.gmra.mrb[28].mxu1 %v2509_v54 }
 0x848   :  { %4637 = vmatpush1.bf16.msra.mxu0 %v5310_v60  ;;  %4701 = vmatpush1.bf16.msra.mxu1 %v5327_v21  ;;  %v6912_v60 = vld [vmem:[#allocation45_spill] sm:$0xff]  ;;  %v6917_v21 = vld [vmem:[#allocation50_spill] sm:$0xff] }
 0x849   :  { %4639 = vmatprep.subr.bf16.mxu0 %v5316_v2  ;;  %4703 = vmatprep.subr.bf16.mxu1 %v5333_v35  ;;  %v6914_v2 = vld [vmem:[#allocation47_spill] sm:$0xff]  ;;  %v6919_v35 = vld [vmem:[#allocation52_spill] sm:$0xff] }
 0x84c   :  { %4641 = vmatpush1.bf16.msra.mxu0 %v5323_v20  ;;  %4705 = vmatpush1.bf16.msra.mxu1 %v5340_v50  ;;  %v6916_v20 = vld [vmem:[#allocation49_spill] sm:$0xff]  ;;  %v6921_v50 = vld [vmem:[#allocation54_spill] sm:$0xff] }
 0x84d   :  { %4643 = vmatprep.subr.bf16.mxu0 %v5330_v28  ;;  %4707 = vmatprep.subr.bf16.mxu1 %v5346_v59  ;;  %v6918_v28 = vld [vmem:[#allocation51_spill] sm:$0xff] }
 0x84e   :  { %v6922_v59 = vld [vmem:[#allocation55_spill] sm:$0xff] }
 0x850   :  { %4645 = vmatpush1.bf16.msra.mxu0 %v5337_v49  ;;  %4709 = vmatpush1.bf16.msra.mxu1 %v6882_v8  ;;  %v6920_v49 = vld [vmem:[#allocation53_spill] sm:$0xff] }
 0x851   :  { %4647 = vmatprep.subr.bf16.mxu0 %v6883_v9  ;;  %4711 = vmatprep.subr.bf16.mxu1 %v6884_v14  ;;  %v6937_v14 = vld [vmem:[#allocation70_spill] sm:$0xff] }
 0x854   :  { %4649 = vmatpush1.bf16.msra.mxu0 %v6885_v17  ;;  %4713 = vmatpush1.bf16.msra.mxu1 %v6886_v25 }
 0x855   :  { %4651 = vmatprep.subr.bf16.mxu0 %v6887_v26  ;;  %4715 = vmatprep.subr.bf16.mxu1 %v6888_v30  ;;  %v6938_v26 = vld [vmem:[#allocation71_spill] sm:$0xff] }
 0x858   :  { %4653 = vmatpush1.bf16.msra.mxu0 %v6889_v33  ;;  %4717 = vmatpush1.bf16.msra.mxu1 %v6890_v37 }
 0x859   :  { %4655 = vmatprep.subr.bf16.mxu0 %v6891_v42  ;;  %4719 = vmatprep.subr.bf16.mxu1 %v6892_v45 }
 0x85c   :  { %4657 = vmatpush1.bf16.msra.mxu0 %v6893_v46  ;;  %4721 = vmatpush1.bf16.msra.mxu1 %v6894_v48 }
 0x85d   :  { %4659 = vmatprep.subr.bf16.mxu0 %v6895_v52  ;;  %4723 = vmatprep.subr.bf16.mxu1 %v6896_v55 }
 0x860   :  { %4661 = vmatpush1.bf16.msra.mxu0 %v6897_v58  ;;  %4725 = vmatpush1.bf16.msra.mxu1 %v6898_v62 }
 0x861   :  { %4663 = vmatprep.subr.bf16.mxu0 %v6899_v1  ;;  %4727 = vmatprep.subr.bf16.mxu1 %v6900_v7  ;;  %v2677_v7 = vld [vmem:[#allocation6 + $0xe0] sm:$0xff] }
 0x864   :  { %4665 = vmatpush1.bf16.msra.mxu0 %v6901_v10  ;;  %4729 = vmatpush1.bf16.msra.mxu1 %v6902_v15  ;;  %v2678_v10 = vld [vmem:[#allocation6 + $0xe8] sm:$0xff] }
 0x865   :  { %4667 = vmatprep.subr.bf16.mxu0 %v6903_v18  ;;  %4731 = vmatprep.subr.bf16.mxu1 %v6904_v24 }
 0x868   :  { %4669 = vmatpush1.bf16.msra.mxu0 %v6905_v27  ;;  %4733 = vmatpush1.bf16.msra.mxu1 %v6906_v31 }
 0x869   :  { %4671 = vmatprep.subr.bf16.mxu0 %v6907_v34  ;;  %4735 = vmatprep.subr.bf16.mxu1 %v6908_v41 }
 0x86c   :  { %4673 = vmatpush1.bf16.msra.mxu0 %v6909_v43  ;;  %4737 = vmatpush1.bf16.msra.mxu1 %v6910_v47 }
 0x86d   :  { %4675 = vmatprep.subr.bf16.mxu0 %v6911_v51  ;;  %4739 = vmatprep.subr.bf16.mxu1 %v6912_v60  ;;  %v2680_v51 = vld [vmem:[#allocation6 + $0xf8] sm:$0xff] }
 0x870   :  { %4677 = vmatpush1.bf16.msra.mxu0 %v6913_v61  ;;  %4741 = vmatpush1.bf16.msra.mxu1 %v6914_v2 }
 0x871   :  { %4679 = vmatprep.subr.bf16.mxu0 %v6915_v6  ;;  %4743 = vmatprep.subr.bf16.mxu1 %v6916_v20 }
 0x874   :  { %4681 = vmatpush1.bf16.msra.mxu0 %v6917_v21  ;;  %4745 = vmatpush1.bf16.msra.mxu1 %v6918_v28 }
 0x875   :  { %4683 = vmatprep.subr.bf16.mxu0 %v6919_v35  ;;  %4747 = vmatprep.subr.bf16.mxu1 %v6920_v49 }
 0x878   :  { %4685 = vmatpush1.bf16.msra.mxu0 %v6921_v50  ;;  %4749 = vmatpush1.bf16.msra.mxu1 %v6922_v59 }
 0x879   :  { %4687 = vmatprep.subr.bf16.mxu0 %v6923_v53  ;;  %4751 = vmatprep.subr.bf16.mxu1 %v6924_v44 }
 0x87c   :  { %4689 = vmatpush1.bf16.msra.mxu0 %v6925_v29  ;;  %4753 = vmatpush1.bf16.msra.mxu1 %v6926_v63 }
 0x87d   :  { %4691 = vmatprep.subr.bf16.mxu0 %v6927_v0  ;;  %4755 = vmatprep.subr.bf16.mxu1 %v6928_v13 }
 0x880   :  { %4693 = vmatpush1.bf16.msra.mxu0 %v6929_v3  ;;  %4757 = vmatpush1.bf16.msra.mxu1 %v6930_v40 }
 0x881   :  { %4695 = vmatprep.subr.bf16.mxu0 %v6931_v38  ;;  %4759 = vmatprep.subr.bf16.mxu1 %v6932_v32 }
 0x884   :  { %4697 = vmatpush1.bf16.msra.mxu0 %v6933_v12  ;;  %4761 = vmatpush1.bf16.msra.mxu1 %v6934_v23  ;;  %v3024_v12 = vld [vmem:[%s6353_s4] sm:$0xff]  ;;  %v3025_v23 = vld [vmem:[%s6353_s4 + $0x8] sm:$0xff] }
 0x8fa   :  { %v2576_v11 = vpop.f32.mrb[26].mxu0  ;;  %v2647_v56 = vpop.f32.mrb[26].mxu1 }
 0x8fb   :  { %v2577_v5 = vadd.f32 %v2576_v11, %v6935_v19  ;;  %v2578_v57 = vpop.f32.mrb[27].mxu0  ;;  %v2649_v39 = vpop.f32.mrb[27].mxu1  ;;  %v2648_v30 = vadd.f32 %v2647_v56, %v6938_v26  ;;  %v4763_v11 = vpack.c.bf16 %v3025_v23, %v3024_v12  ;;  %v5126_v56 = vmov 0.0|0.0  }
 0x8fc   :  { %v2579_v54 = vadd.f32 %v2578_v57, %v6936_v36  ;;  %v2650_v17 = vadd.f32 %v2649_v39, %v6937_v14  ;;  %4762 = vmatprep.subr.bf16.mxu0 %v5126_v56  ;;  %v3028_v39 = vld [vmem:[%s6353_s4 + $0x20] sm:$0xff] }
 0x8fd   :  { %v3164_v8 = vmul.f32 -1.442695, %v2577_v5  ;;  %v3027_v5 = vld [vmem:[%s6353_s4 + $0x18] sm:$0xff] }
 0x8fe   :  { %v3165_v9 = vmul.f32 -1.442695, %v2579_v54  ;;  %v3166_v25 = vmul.f32 -1.442695, %v2650_v17  ;;  %v3029_v54 = vld [vmem:[%s6353_s4 + $0x28] sm:$0xff]  ;;  %v3031_v17 = vld [vmem:[%s6353_s4 + $0x38] sm:$0xff] }
 0x8ff   :  { %5002 = vpow2.f32 %v3164_v8  ;;  %v4769_v8 = vpack.c.bf16 %v3029_v54, %v3028_v39 }
 0x900   :  { %5004 = vpow2.f32 %v3165_v9  ;;  %v3030_v9 = vld [vmem:[%s6353_s4 + $0x30] sm:$0xff] }
 0x901   :  { %5006 = vpow2.f32 %v3166_v25  ;;  %v4772_v25 = vpack.c.bf16 %v3031_v17, %v3030_v9 }
 0x902   :  { %5008 = vtanh.f32 %v2648_v30  ;;  %v3032_v30 = vld [vmem:[%s6353_s4 + $0x40] sm:$0xff] }
 0x909   :  { %v5003_v33 = vpop.eup %5002 }
 0x90a   :  { %v5005_v37 = vpop.eup %5004  ;;  %v2655_v42 = vadd.f32 1.0, %v5003_v33  ;;  %v3033_v33 = vld [vmem:[%s6353_s4 + $0x48] sm:$0xff] }
 0x90b   :  { %v2661_v45 = vadd.f32 1.0, %v5005_v37  ;;  %v5007_v46 = vpop.eup %5006  ;;  %v4775_v37 = vpack.c.bf16 %v3033_v33, %v3032_v30 }
 0x90c   :  { %5010 = vrcp.f32 %v2655_v42  ;;  %v5009_v48 = vpop.eup %5008  ;;  %v2668_v62 = vadd.f32 1.0, %v5007_v46  ;;  %v3034_v42 = vld [vmem:[%s6353_s4 + $0x50] sm:$0xff]  ;;  %v3036_v46 = vld [vmem:[%s6353_s4 + $0x60] sm:$0xff] }
 0x90d   :  { %5012 = vrcp.f32 %v2661_v45  ;;  %v3035_v45 = vld [vmem:[%s6353_s4 + $0x58] sm:$0xff] }
 0x90e   :  { %5014 = vrcp.f32 %v2668_v62  ;;  %v3039_v62 = vld [vmem:[%s6353_s4 + $0x78] sm:$0xff] }
 0x916   :  { %v5011_v52 = vpop.eup %5010 }
 0x917   :  { %v5013_v55 = vpop.eup %5012  ;;  %v2672_v58 = vmul.f32 %v5011_v52, %v5009_v48  ;;  %v4778_v48 = vpack.c.bf16 %v3035_v45, %v3034_v42  ;;  %v3037_v52 = vld [vmem:[%s6353_s4 + $0x68] sm:$0xff] }
 0x918   :  { %v2671_v1 = vmul.f32 %v5013_v55, %v6177_v16  ;;  %v2679_v16 = vld [vmem:[#allocation6 + $0xf0] sm:$0xff]  ;;  %v5015_v61 = vpop.eup %5014  ;;  %v4781_v55 = vpack.c.bf16 %v3037_v52, %v3036_v46 }
 0x91a   :  { %v2747_v15 = vpop.f32.mrb[28].mxu0  ;;  %v2818_v18 = vpop.f32.mrb[28].mxu1  ;;  %v6285_v24 = vadd.f32 %v2672_v58, %v2671_v1  ;;  %v3038_v58 = vld [vmem:[%s6353_s4 + $0x70] sm:$0xff] }
 0x91b   :  { %v2823_v27 = vadd.f32 %v2747_v15, %v2677_v7  ;;  %v2749_v31 = vpop.f32.mrb[29].mxu0  ;;  %v2820_v34 = vpop.f32.mrb[29].mxu1  ;;  %v2825_v20 = vadd.f32 %v2818_v18, %v2679_v16  ;;  %v4784_v1 = vpack.c.bf16 %v3039_v62, %v3038_v58 }
 0x91c   :  { %v2824_v41 = vadd.f32 %v2749_v31, %v2678_v10  ;;  %5016 = vtanh.f32 %v6285_v24  ;;  %v2826_v60 = vadd.f32 %v2820_v34, %v2680_v51 }
 0x91d   :  { %v3167_v43 = vmul.f32 -1.442695, %v2823_v27 }
 0x91e   :  { %v3168_v47 = vmul.f32 -1.442695, %v2824_v41  ;;  %v3169_v6 = vmul.f32 -1.442695, %v2826_v60 }
 0x91f   :  { %5018 = vpow2.f32 %v3167_v43 }
 0x920   :  { %5020 = vpow2.f32 %v3168_v47 }
 0x921   :  { %5022 = vpow2.f32 %v3169_v6 }
 0x922   :  { %5024 = vtanh.f32 %v2825_v20 }
 0x926   :  { %v5017_v2 = vpop.eup %5016 }
 0x927   :  { %v2675_v21 = vmul.f32 %v5017_v2, %v5015_v61 }
 0x929   :  { %v5019_v28 = vpop.eup %5018  ;;  %2915 = vmatprep.mubr.f32.mxu0 %v2675_v21  ;;  %2986 = vmatprep.mubr.f32.mxu1 %v2675_v21 }
 0x92a   :  { %v5021_v35 = vpop.eup %5020  ;;  %v2830_v49 = vadd.f32 1.0, %v5019_v28 }
 0x92b   :  { %v2836_v50 = vadd.f32 1.0, %v5021_v35  ;;  %v5023_v59 = vpop.eup %5022 }
 0x92c   :  { %5026 = vrcp.f32 %v2830_v49  ;;  %v5025_v53 = vpop.eup %5024  ;;  %v2843_v0 = vadd.f32 1.0, %v5023_v59 }
 0x92d   :  { %5028 = vrcp.f32 %v2836_v50  ;;  %v3173_v50 = vld [vmem:[%s6354_s5] ss:$0 sm:$0xff] }
 0x92e   :  { %5030 = vrcp.f32 %v2843_v0 }
 0x936   :  { %v5027_v44 = vpop.eup %5026 }
 0x937   :  { %v5029_v29 = vpop.eup %5028  ;;  %v2847_v63 = vmul.f32 %v5027_v44, %v5025_v53 }
 0x938   :  { %v2846_v13 = vmul.f32 %v5029_v29, %v6181_v22  ;;  %v5031_v40 = vpop.eup %5030  ;;  %v3026_v22 = vld [vmem:[%s6353_s4 + $0x10] sm:$0xff] }
 0x939   :  { %v4766_v57 = vpack.c.bf16 %v3027_v5, %v3026_v22 }
 0x93a   :  { %v2848_v3 = vadd.f32 %v2847_v63, %v2846_v13 }
 0x93c   :  { %5032 = vtanh.f32 %v2848_v3 }
 0x946   :  { %v5033_v38 = vpop.eup %5032 }
 0x947   :  { %v2850_v32 = vmul.f32 %v5033_v38, %v5031_v40 }
 0x949   :  { %2916 = vmatmul.mubr.f32.vlgmr.msra.gmra.mrb[30].mxu0 %v2850_v32  ;;  %2987 = vmatmul.mubr.f32.vlgmr.msra.gmra.mrb[30].mxu1 %v2850_v32 }
 0x94a   :  { %4764 = vmatpush3.bf16.msra.mxu0 %v4763_v11  ;;  %3223 = vmatprep.mubr.msk.f32.mxu0 %vm5127_vm0, %v6531_v4 }
 0x94b   :  { %4765 = vmatprep.subr.bf16.mxu0 %v5126_v56 }
 0x94e   :  { %4767 = vmatpush3.bf16.msra.mxu0 %v4766_v57 }
 0x94f   :  { %4768 = vmatprep.subr.bf16.mxu0 %v5126_v56 }
 0x952   :  { %4770 = vmatpush3.bf16.msra.mxu0 %v4769_v8 }
 0x953   :  { %4771 = vmatprep.subr.bf16.mxu0 %v5126_v56 }
 0x956   :  { %4773 = vmatpush3.bf16.msra.mxu0 %v4772_v25 }
 0x957   :  { %4774 = vmatprep.subr.bf16.mxu0 %v5126_v56 }
 0x95a   :  { %4776 = vmatpush3.bf16.msra.mxu0 %v4775_v37 }
 0x95b   :  { %4777 = vmatprep.subr.bf16.mxu0 %v5126_v56 }
 0x95e   :  { %4779 = vmatpush3.bf16.msra.mxu0 %v4778_v48 }
 0x95f   :  { %4780 = vmatprep.subr.bf16.mxu0 %v5126_v56 }
 0x962   :  { %4782 = vmatpush3.bf16.msra.mxu0 %v4781_v55 }
 0x963   :  { %4783 = vmatprep.subr.bf16.mxu0 %v5126_v56 }
 0x966   :  { %4785 = vmatpush3.bf16.msra.mxu0 %v4784_v1 }
 0xa1c   :  { %v2917_v7 = vpop.f32.mrb[30].mxu0  ;;  %v2988_v10 = vpop.f32.mrb[30].mxu1 }
 0xa1d   :  { %v2918_v15 = vadd.f32 %v2917_v7, %v6935_v19  ;;  %v2919_v4 = vpop.f32.mrb[31].mxu0  ;;  %v2990_v18 = vpop.f32.mrb[31].mxu1  ;;  %v2989_v47 = vadd.f32 %v2988_v10, %v6938_v26 }
 0xa1e   :  { %v2920_v27 = vadd.f32 %v2919_v4, %v6936_v36  ;;  %v2991_v41 = vadd.f32 %v2990_v18, %v6937_v14 }
 0xa1f   :  { %v3170_v31 = vmul.f32 -1.442695, %v2918_v15 }
 0xa20   :  { %v3171_v34 = vmul.f32 -1.442695, %v2920_v27  ;;  %v3172_v43 = vmul.f32 -1.442695, %v2991_v41 }
 0xa21   :  { %5034 = vpow2.f32 %v3170_v31 }
 0xa22   :  { %5036 = vpow2.f32 %v3171_v34 }
 0xa23   :  { %5038 = vpow2.f32 %v3172_v43 }
 0xa24   :  { %5040 = vtanh.f32 %v2989_v47 }
 0xa2b   :  { %v5035_v51 = vpop.eup %5034 }
 0xa2c   :  { %v5037_v60 = vpop.eup %5036  ;;  %v2996_v16 = vadd.f32 1.0, %v5035_v51 }
 0xa2d   :  { %v3002_v61 = vadd.f32 1.0, %v5037_v60  ;;  %v5039_v19 = vpop.eup %5038 }
 0xa2e   :  { %5042 = vrcp.f32 %v2996_v16  ;;  %v5041_v2 = vpop.eup %5040  ;;  %v3009_v21 = vadd.f32 1.0, %v5039_v19 }
 0xa2f   :  { %5044 = vrcp.f32 %v3002_v61 }
 0xa30   :  { %5046 = vrcp.f32 %v3009_v21 }
 0xa38   :  { %v5043_v36 = vpop.eup %5042 }
 0xa39   :  { %v5045_v6 = vpop.eup %5044  ;;  %v3013_v20 = vmul.f32 %v5043_v36, %v5041_v2 }
 0xa3a   :  { %v3012_v28 = vmul.f32 %v5045_v6, %v6285_v24  ;;  %v5047_v26 = vpop.eup %5046 }
 0xa3c   :  { %v3014_v14 = vadd.f32 %v3013_v20, %v3012_v28 }
 0xa3e   :  { %5048 = vtanh.f32 %v3014_v14 }
 0xa48   :  { %v5049_v35 = vpop.eup %5048 }
 0xa49   :  { %v3016_v49 = vmul.f32 %v5049_v35, %v5047_v26 }
 0xa4b   :  { %3224 = vmatmul.mubr.f32.vlgmr.msra.gmra.mrb[32].mxu0 %v3016_v49 }
 0xb1e   :  { %v3113_v59 = vpop.f32.mrb[32].mxu0 }
 0xb1f   :  { %v3114_v53 = vadd.f32 %v3173_v50, %v3113_v59  ;;  %v3225_v44 = vpop.f32.mrb[33].mxu0 }
 0xb21   :  { %3118 = vst.msk [vmem:[%s6355_s6] sm:$0xff] %vm3117_vm1, %v3114_v53 }
 0xb22   :  { %3123 = vsyncpa [#allocation7], 1 }
 0xb23   :  { %3124 = vsyncpa [#allocation9], 1 }

</bundles_post_ra>
